<compile_context>
chip_gen: v6e
topology: v6e:2x2x1
jax: 0.10.0
libtpu: 0.0.40
codegen_flags: <defaults>
</compile_context>

<pallas_src>
import functools

import jax
import jax.numpy as jnp
from jax.experimental import pallas as pl
from jax.experimental.pallas import tpu as pltpu


def feature_enhancement_kernel(x_ref, w1t_ref, b1_ref, w2_ref, b2_ref,
                               wsp_ref, bsp_ref, out_ref, *, H, W, K):
    HW = H * W
    P = (K - 1) // 2          # 3
    PAD = P * W + P           # flat padding that covers every 2-D tap offset

    x = x_ref[...].astype(jnp.float32)                                # (C, HW) lane-dense

    # ---- channel attention: GAP -> 1x1 conv -> ReLU -> 1x1 conv -> Sigmoid ----
    gap = jnp.sum(x, axis=1, keepdims=True) * (1.0 / HW)              # (C, 1)
    hidden = jnp.sum(w1t_ref[...] * gap, axis=0, keepdims=True) + b1_ref[...]   # (1, C//4)
    hidden = jnp.maximum(hidden, 0.0)                                 # ReLU
    ca = jnp.sum(w2_ref[...] * hidden, axis=1, keepdims=True) + b2_ref[...]     # (C, 1)
    ca = jax.nn.sigmoid(ca)

    x2 = x * ca                                                        # (C, HW) full-lane VPU

    # ---- spatial attention: mean/max over C, 7x7 conv (2->1, pad 3), sigmoid ----
    avg_p = jnp.mean(x2, axis=0, keepdims=True)                        # (1, HW)
    max_p = jnp.max(x2, axis=0, keepdims=True)                         # (1, HW)

    # Zero-pad the flattened planes once; every tap (dy, dx) is then a static
    # lane-offset window  padded[:, dy*W + dx : dy*W + dx + HW]  (register-level
    # relayout on the XLU, no VMEM traffic).  The zero pad handles the row
    # (y) boundary; a per-dx column mask handles the x boundary.
    zpad = jnp.zeros((1, PAD), jnp.float32)
    pad_a = jnp.concatenate([zpad, avg_p, zpad], axis=1)               # (1, HW + 2*PAD)
    pad_m = jnp.concatenate([zpad, max_p, zpad], axis=1)

    # Column index of each flat position (exact: W is a power of two here; the
    # +0.5 keeps floor() exact for general W as well).
    lidx = jax.lax.broadcasted_iota(jnp.int32, (1, HW), 1).astype(jnp.float32)
    xcol = lidx - float(W) * jnp.floor((lidx + 0.5) / float(W))        # (1, HW)

    acc = jnp.zeros((1, HW), jnp.float32) + bsp_ref[0]
    for dx in range(K):                                                # column mask shared per dx
        part = jnp.zeros((1, HW), jnp.float32)
        for dy in range(K):
            off = dy * W + dx
            part = part + wsp_ref[dy * K + dx] * pad_a[:, off:off + HW]
            part = part + wsp_ref[K * K + dy * K + dx] * pad_m[:, off:off + HW]
        valid = (xcol >= float(P - dx)) & (xcol <= float(W - 1 + P - dx))
        acc = acc + jnp.where(valid, part, 0.0)

    sa = jax.nn.sigmoid(acc)                                           # (1, HW)

    # Lane-dense (C, 256) store -> unmasked full-width vst.
    out_ref[...] = (x2 * sa).astype(out_ref.dtype)


def feature_enhancement(x, params):
    """x: (B, C, H, W) float32. params in PyTorch conv layouts."""
    B, C, H, W = x.shape
    Cr = C // 4
    K = 7
    HW = H * W
    w1, b1, w2, b2, wsp, bsp = params

    # Lane-dense layout for the kernel: (B, C, H*W).
    x_flat = x.reshape(B, C, HW)

    # Reshape params into kernel-friendly 2-D / flat layouts (pure glue).
    w1t = jnp.transpose(w1[:, :, 0, 0])          # (C, C//4)
    b1r = b1.reshape(1, Cr)                      # (1, C//4)
    w2r = w2[:, :, 0, 0]                         # (C, C//4)
    b2r = b2.reshape(C, 1)                       # (C, 1)
    wspf = wsp[0].reshape(2 * K * K)             # (98,)  -> SMEM scalars
    bspf = bsp.reshape(1)                        # (1,)   -> SMEM scalar

    kernel = functools.partial(feature_enhancement_kernel, H=H, W=W, K=K)

    out_flat = pl.pallas_call(
        kernel,
        out_shape=jax.ShapeDtypeStruct((B, C, HW), x.dtype),
        grid=(B,),
        in_specs=[
            pl.BlockSpec((None, C, HW), lambda b: (b, 0, 0)),      # x (batch squeezed)
            pl.BlockSpec((C, Cr), lambda b: (0, 0)),               # w1^T
            pl.BlockSpec((1, Cr), lambda b: (0, 0)),               # b1
            pl.BlockSpec((C, Cr), lambda b: (0, 0)),               # w2
            pl.BlockSpec((C, 1), lambda b: (0, 0)),                # b2
            pl.BlockSpec(memory_space=pltpu.MemorySpace.SMEM),     # 7x7 weights (flat)
            pl.BlockSpec(memory_space=pltpu.MemorySpace.SMEM),     # 7x7 bias
        ],
        out_specs=pl.BlockSpec((None, C, HW), lambda b: (b, 0, 0)),
        compiler_params=pltpu.CompilerParams(
            dimension_semantics=("parallel",)),                    # batch across TCs on v7x
    )(x_flat, w1t, b1r, w2r, b2r, wspf, bspf)

    return out_flat.reshape(B, C, H, W)


def reference(x, params):
    """Pure-JAX reference matching the PyTorch forward exactly."""
    w1, b1, w2, b2, wsp, bsp = params
    gap = jnp.mean(x, axis=(2, 3), keepdims=True)                         # (B,C,1,1)
    h = jnp.einsum('oc,bcij->boij', w1[:, :, 0, 0], gap) + b1[None, :, None, None]
    h = jax.nn.relu(h)
    ca = jnp.einsum('oc,bcij->boij', w2[:, :, 0, 0], h) + b2[None, :, None, None]
    ca = jax.nn.sigmoid(ca)
    x2 = x * ca
    avg = jnp.mean(x2, axis=1, keepdims=True)
    mx = jnp.max(x2, axis=1, keepdims=True)
    inp = jnp.concatenate([avg, mx], axis=1)                              # (B,2,H,W)
    sa = jax.lax.conv_general_dilated(
        inp, wsp, window_strides=(1, 1), padding=[(3, 3), (3, 3)],
        dimension_numbers=('NCHW', 'OIHW', 'NCHW')) + bsp[None, :, None, None]
    sa = jax.nn.sigmoid(sa)
    return x2 * sa


if __name__ == "__main__":
    B, C, H, W = 2, 8, 16, 16
    Cr = C // 4
    K = 7

    key = jax.random.PRNGKey(0)
    k1, k2, k3, k4, k5, k6, kx = jax.random.split(key, 7)
    # Parameters in PyTorch layouts: Conv2d weight (out, in, kh, kw), bias (out,)
    w1 = jax.random.normal(k1, (Cr, C, 1, 1), jnp.float32) * 0.1
    b1 = jax.random.normal(k2, (Cr,), jnp.float32) * 0.1
    w2 = jax.random.normal(k3, (C, Cr, 1, 1), jnp.float32) * 0.1
    b2 = jax.random.normal(k4, (C,), jnp.float32) * 0.1
    wsp = jax.random.normal(k5, (1, 2, K, K), jnp.float32) * 0.1
    bsp = jax.random.normal(k6, (1,), jnp.float32) * 0.1
    params = (w1, b1, w2, b2, wsp, bsp)

    x = jax.random.normal(kx, (B, C, H, W), jnp.float32)

    out = jax.block_until_ready(feature_enhancement(x, params))
    ref = reference(x, params)
    max_err = float(jnp.max(jnp.abs(out - ref)))
    assert jnp.allclose(out, ref, atol=1e-4, rtol=1e-4), f"max abs err {max_err}"
    print("KERNEL_OK")
</pallas_src>

<mosaic_0001>
module attributes {stable_mosaic.version = 11 : i64} {
  func.func @feature_enhancement_kernel(%arg0: i32, %arg1: memref<1x8x256xf32, #tpu.memory_space<vmem>>, %arg2: memref<8x2xf32, #tpu.memory_space<vmem>>, %arg3: memref<1x2xf32, #tpu.memory_space<vmem>>, %arg4: memref<8x2xf32, #tpu.memory_space<vmem>>, %arg5: memref<8x1xf32, #tpu.memory_space<vmem>>, %arg6: memref<98xf32, #tpu.memory_space<smem>>, %arg7: memref<1xf32, #tpu.memory_space<smem>>, %arg8: memref<1x8x256xf32, #tpu.memory_space<vmem>>) attributes {dimension_semantics = [#tpu.dimension_semantics<parallel>], iteration_bounds = array<i64: 2>, scalar_prefetch = 0 : i64, scratch_operands = 0 : i64, tpu.core_type = #tpu.core_type<tc>, window_params = [{transform_indices = @transform_0, window_bounds = array<i64: 1, 8, 256>}, {pipeline_mode = #tpu.pipeline_mode<synchronous>, transform_indices = @transform_1, window_bounds = array<i64: 8, 2>}, {pipeline_mode = #tpu.pipeline_mode<synchronous>, transform_indices = @transform_2, window_bounds = array<i64: 1, 2>}, {pipeline_mode = #tpu.pipeline_mode<synchronous>, transform_indices = @transform_3, window_bounds = array<i64: 8, 2>}, {pipeline_mode = #tpu.pipeline_mode<synchronous>, transform_indices = @transform_4, window_bounds = array<i64: 8, 1>}, {transform_indices = @transform_5, window_bounds = array<i64: 98>}, {transform_indices = @transform_6, window_bounds = array<i64: 1>}, {transform_indices = @transform_7, window_bounds = array<i64: 1, 8, 256>}]} {
    %c0 = arith.constant 0 : index
    %c0_0 = arith.constant 0 : index
    %c0_1 = arith.constant 0 : index
    %0 = vector.load %arg1[%c0, %c0_0, %c0_1] : memref<1x8x256xf32, #tpu.memory_space<vmem>>, vector<1x8x256xf32>
    %1 = vector.shape_cast %0 : vector<1x8x256xf32> to vector<8x256xf32>
    %cst = arith.constant dense<0.000000e+00> : vector<8xf32>
    %2 = vector.multi_reduction <add>, %1, %cst [1] : vector<8x256xf32> to vector<8xf32>
    %3 = vector.shape_cast %2 : vector<8xf32> to vector<8x1xf32>
    %cst_2 = arith.constant 3.906250e-03 : f32
    %4 = vector.broadcast %cst_2 : f32 to vector<8x1xf32>
    %5 = arith.mulf %3, %4 : vector<8x1xf32>
    %c0_3 = arith.constant 0 : index
    %c0_4 = arith.constant 0 : index
    %6 = vector.load %arg2[%c0_3, %c0_4] : memref<8x2xf32, #tpu.memory_space<vmem>>, vector<8x2xf32>
    %7 = vector.broadcast %5 : vector<8x1xf32> to vector<8x2xf32>
    %8 = arith.mulf %6, %7 : vector<8x2xf32>
    %cst_5 = arith.constant dense<0.000000e+00> : vector<2xf32>
    %9 = vector.multi_reduction <add>, %8, %cst_5 [0] : vector<8x2xf32> to vector<2xf32>
    %10 = vector.shape_cast %9 : vector<2xf32> to vector<1x2xf32>
    %c0_6 = arith.constant 0 : index
    %c0_7 = arith.constant 0 : index
    %11 = vector.load %arg3[%c0_6, %c0_7] : memref<1x2xf32, #tpu.memory_space<vmem>>, vector<1x2xf32>
    %12 = arith.addf %10, %11 : vector<1x2xf32>
    %cst_8 = arith.constant 0.000000e+00 : f32
    %13 = vector.broadcast %cst_8 : f32 to vector<1x2xf32>
    %14 = arith.maximumf %12, %13 : vector<1x2xf32>
    %c0_9 = arith.constant 0 : index
    %c0_10 = arith.constant 0 : index
    %15 = vector.load %arg4[%c0_9, %c0_10] : memref<8x2xf32, #tpu.memory_space<vmem>>, vector<8x2xf32>
    %16 = vector.broadcast %14 : vector<1x2xf32> to vector<8x2xf32>
    %17 = arith.mulf %15, %16 : vector<8x2xf32>
    %cst_11 = arith.constant dense<0.000000e+00> : vector<8xf32>
    %18 = vector.multi_reduction <add>, %17, %cst_11 [1] : vector<8x2xf32> to vector<8xf32>
    %19 = vector.shape_cast %18 : vector<8xf32> to vector<8x1xf32>
    %c0_12 = arith.constant 0 : index
    %c0_13 = arith.constant 0 : index
    %20 = vector.load %arg5[%c0_12, %c0_13] : memref<8x1xf32, #tpu.memory_space<vmem>>, vector<8x1xf32>
    %21 = arith.addf %19, %20 : vector<8x1xf32>
    %22 = arith.negf %21 : vector<8x1xf32>
    %23 = math.exp %22 : vector<8x1xf32>
    %cst_14 = arith.constant 1.000000e+00 : f32
    %24 = vector.broadcast %cst_14 : f32 to vector<8x1xf32>
    %25 = arith.addf %24, %23 : vector<8x1xf32>
    %26 = arith.divf %24, %25 : vector<8x1xf32>
    %27 = vector.broadcast %26 : vector<8x1xf32> to vector<8x256xf32>
    %28 = arith.mulf %1, %27 : vector<8x256xf32>
    %cst_15 = arith.constant dense<0.000000e+00> : vector<256xf32>
    %29 = vector.multi_reduction <add>, %28, %cst_15 [0] : vector<8x256xf32> to vector<256xf32>
    %30 = vector.shape_cast %29 : vector<256xf32> to vector<1x256xf32>
    %cst_16 = arith.constant 8.000000e+00 : f32
    %31 = vector.broadcast %cst_16 : f32 to vector<1x256xf32>
    %32 = arith.divf %30, %31 : vector<1x256xf32>
    %cst_17 = arith.constant dense<0xFF800000> : vector<256xf32>
    %33 = vector.multi_reduction <maximumf>, %28, %cst_17 [0] : vector<8x256xf32> to vector<256xf32>
    %34 = vector.shape_cast %33 : vector<256xf32> to vector<1x256xf32>
    %cst_18 = arith.constant 0.000000e+00 : f32
    %35 = vector.broadcast %cst_18 : f32 to vector<1x51xf32>
    %36 = tpu.concatenate %35, %32, %35 in 1 : vector<1x51xf32>, vector<1x256xf32>, vector<1x51xf32> -> vector<1x358xf32>
    %37 = tpu.concatenate %35, %34, %35 in 1 : vector<1x51xf32>, vector<1x256xf32>, vector<1x51xf32> -> vector<1x358xf32>
    %38 = tpu.iota {dimensions = array<i32: 1>} : vector<1x256xi32>
    %39 = arith.sitofp %38 : vector<1x256xi32> to vector<1x256xf32>
    %cst_19 = arith.constant 5.000000e-01 : f32
    %40 = vector.broadcast %cst_19 : f32 to vector<1x256xf32>
    %41 = arith.addf %39, %40 : vector<1x256xf32>
    %cst_20 = arith.constant 1.600000e+01 : f32
    %42 = vector.broadcast %cst_20 : f32 to vector<1x256xf32>
    %43 = arith.divf %41, %42 : vector<1x256xf32>
    %44 = math.floor %43 : vector<1x256xf32>
    %cst_21 = arith.constant 1.600000e+01 : f32
    %45 = vector.broadcast %cst_21 : f32 to vector<1x256xf32>
    %46 = arith.mulf %45, %44 : vector<1x256xf32>
    %47 = arith.subf %39, %46 : vector<1x256xf32>
    %cst_22 = arith.constant 0.000000e+00 : f32
    %48 = vector.broadcast %cst_22 : f32 to vector<1x256xf32>
    %c0_23 = arith.constant 0 : index
    %49 = memref.load %arg7[%c0_23] : memref<1xf32, #tpu.memory_space<smem>>
    %50 = vector.broadcast %49 : f32 to vector<1x256xf32>
    %51 = arith.addf %48, %50 : vector<1x256xf32>
    %cst_24 = arith.constant 0.000000e+00 : f32
    %52 = vector.broadcast %cst_24 : f32 to vector<1x256xf32>
    %c0_25 = arith.constant 0 : index
    %53 = memref.load %arg6[%c0_25] : memref<98xf32, #tpu.memory_space<smem>>
    %54 = vector.extract_strided_slice %36 {offsets = [0, 0], sizes = [1, 256], strides = [1, 1]} : vector<1x358xf32> to vector<1x256xf32>
    %55 = vector.broadcast %53 : f32 to vector<1x256xf32>
    %56 = arith.mulf %55, %54 : vector<1x256xf32>
    %57 = arith.addf %52, %56 : vector<1x256xf32>
    %c49 = arith.constant 49 : index
    %58 = memref.load %arg6[%c49] : memref<98xf32, #tpu.memory_space<smem>>
    %59 = vector.extract_strided_slice %37 {offsets = [0, 0], sizes = [1, 256], strides = [1, 1]} : vector<1x358xf32> to vector<1x256xf32>
    %60 = vector.broadcast %58 : f32 to vector<1x256xf32>
    %61 = arith.mulf %60, %59 : vector<1x256xf32>
    %62 = arith.addf %57, %61 : vector<1x256xf32>
    %c7 = arith.constant 7 : index
    %63 = memref.load %arg6[%c7] : memref<98xf32, #tpu.memory_space<smem>>
    %64 = vector.extract_strided_slice %36 {offsets = [0, 16], sizes = [1, 256], strides = [1, 1]} : vector<1x358xf32> to vector<1x256xf32>
    %65 = vector.broadcast %63 : f32 to vector<1x256xf32>
    %66 = arith.mulf %65, %64 : vector<1x256xf32>
    %67 = arith.addf %62, %66 : vector<1x256xf32>
    %c56 = arith.constant 56 : index
    %68 = memref.load %arg6[%c56] : memref<98xf32, #tpu.memory_space<smem>>
    %69 = vector.extract_strided_slice %37 {offsets = [0, 16], sizes = [1, 256], strides = [1, 1]} : vector<1x358xf32> to vector<1x256xf32>
    %70 = vector.broadcast %68 : f32 to vector<1x256xf32>
    %71 = arith.mulf %70, %69 : vector<1x256xf32>
    %72 = arith.addf %67, %71 : vector<1x256xf32>
    %c14 = arith.constant 14 : index
    %73 = memref.load %arg6[%c14] : memref<98xf32, #tpu.memory_space<smem>>
    %74 = vector.extract_strided_slice %36 {offsets = [0, 32], sizes = [1, 256], strides = [1, 1]} : vector<1x358xf32> to vector<1x256xf32>
    %75 = vector.broadcast %73 : f32 to vector<1x256xf32>
    %76 = arith.mulf %75, %74 : vector<1x256xf32>
    %77 = arith.addf %72, %76 : vector<1x256xf32>
    %c63 = arith.constant 63 : index
    %78 = memref.load %arg6[%c63] : memref<98xf32, #tpu.memory_space<smem>>
    %79 = vector.extract_strided_slice %37 {offsets = [0, 32], sizes = [1, 256], strides = [1, 1]} : vector<1x358xf32> to vector<1x256xf32>
    %80 = vector.broadcast %78 : f32 to vector<1x256xf32>
    %81 = arith.mulf %80, %79 : vector<1x256xf32>
    %82 = arith.addf %77, %81 : vector<1x256xf32>
    %c21 = arith.constant 21 : index
    %83 = memref.load %arg6[%c21] : memref<98xf32, #tpu.memory_space<smem>>
    %84 = vector.extract_strided_slice %36 {offsets = [0, 48], sizes = [1, 256], strides = [1, 1]} : vector<1x358xf32> to vector<1x256xf32>
    %85 = vector.broadcast %83 : f32 to vector<1x256xf32>
    %86 = arith.mulf %85, %84 : vector<1x256xf32>
    %87 = arith.addf %82, %86 : vector<1x256xf32>
    %c70 = arith.constant 70 : index
    %88 = memref.load %arg6[%c70] : memref<98xf32, #tpu.memory_space<smem>>
    %89 = vector.extract_strided_slice %37 {offsets = [0, 48], sizes = [1, 256], strides = [1, 1]} : vector<1x358xf32> to vector<1x256xf32>
    %90 = vector.broadcast %88 : f32 to vector<1x256xf32>
    %91 = arith.mulf %90, %89 : vector<1x256xf32>
    %92 = arith.addf %87, %91 : vector<1x256xf32>
    %c28 = arith.constant 28 : index
    %93 = memref.load %arg6[%c28] : memref<98xf32, #tpu.memory_space<smem>>
    %94 = vector.extract_strided_slice %36 {offsets = [0, 64], sizes = [1, 256], strides = [1, 1]} : vector<1x358xf32> to vector<1x256xf32>
    %95 = vector.broadcast %93 : f32 to vector<1x256xf32>
    %96 = arith.mulf %95, %94 : vector<1x256xf32>
    %97 = arith.addf %92, %96 : vector<1x256xf32>
    %c77 = arith.constant 77 : index
    %98 = memref.load %arg6[%c77] : memref<98xf32, #tpu.memory_space<smem>>
    %99 = vector.extract_strided_slice %37 {offsets = [0, 64], sizes = [1, 256], strides = [1, 1]} : vector<1x358xf32> to vector<1x256xf32>
    %100 = vector.broadcast %98 : f32 to vector<1x256xf32>
    %101 = arith.mulf %100, %99 : vector<1x256xf32>
    %102 = arith.addf %97, %101 : vector<1x256xf32>
    %c35 = arith.constant 35 : index
    %103 = memref.load %arg6[%c35] : memref<98xf32, #tpu.memory_space<smem>>
    %104 = vector.extract_strided_slice %36 {offsets = [0, 80], sizes = [1, 256], strides = [1, 1]} : vector<1x358xf32> to vector<1x256xf32>
    %105 = vector.broadcast %103 : f32 to vector<1x256xf32>
    %106 = arith.mulf %105, %104 : vector<1x256xf32>
    %107 = arith.addf %102, %106 : vector<1x256xf32>
    %c84 = arith.constant 84 : index
    %108 = memref.load %arg6[%c84] : memref<98xf32, #tpu.memory_space<smem>>
    %109 = vector.extract_strided_slice %37 {offsets = [0, 80], sizes = [1, 256], strides = [1, 1]} : vector<1x358xf32> to vector<1x256xf32>
    %110 = vector.broadcast %108 : f32 to vector<1x256xf32>
    %111 = arith.mulf %110, %109 : vector<1x256xf32>
    %112 = arith.addf %107, %111 : vector<1x256xf32>
    %c42 = arith.constant 42 : index
    %113 = memref.load %arg6[%c42] : memref<98xf32, #tpu.memory_space<smem>>
    %114 = vector.extract_strided_slice %36 {offsets = [0, 96], sizes = [1, 256], strides = [1, 1]} : vector<1x358xf32> to vector<1x256xf32>
    %115 = vector.broadcast %113 : f32 to vector<1x256xf32>
    %116 = arith.mulf %115, %114 : vector<1x256xf32>
    %117 = arith.addf %112, %116 : vector<1x256xf32>
    %c91 = arith.constant 91 : index
    %118 = memref.load %arg6[%c91] : memref<98xf32, #tpu.memory_space<smem>>
    %119 = vector.extract_strided_slice %37 {offsets = [0, 96], sizes = [1, 256], strides = [1, 1]} : vector<1x358xf32> to vector<1x256xf32>
    %120 = vector.broadcast %118 : f32 to vector<1x256xf32>
    %121 = arith.mulf %120, %119 : vector<1x256xf32>
    %122 = arith.addf %117, %121 : vector<1x256xf32>
    %cst_26 = arith.constant 3.000000e+00 : f32
    %123 = vector.broadcast %cst_26 : f32 to vector<1x256xf32>
    %124 = arith.cmpf oge, %47, %123 : vector<1x256xf32>
    %cst_27 = arith.constant 1.800000e+01 : f32
    %125 = vector.broadcast %cst_27 : f32 to vector<1x256xf32>
    %126 = arith.cmpf ole, %47, %125 : vector<1x256xf32>
    %127 = arith.andi %124, %126 : vector<1x256xi1>
    %cst_28 = arith.constant 0.000000e+00 : f32
    %128 = vector.broadcast %cst_28 : f32 to vector<1x256xf32>
    %129 = arith.select %127, %122, %128 : vector<1x256xi1>, vector<1x256xf32>
    %130 = arith.addf %51, %129 : vector<1x256xf32>
    %cst_29 = arith.constant 0.000000e+00 : f32
    %131 = vector.broadcast %cst_29 : f32 to vector<1x256xf32>
    %c1 = arith.constant 1 : index
    %132 = memref.load %arg6[%c1] : memref<98xf32, #tpu.memory_space<smem>>
    %133 = vector.extract_strided_slice %36 {offsets = [0, 1], sizes = [1, 256], strides = [1, 1]} : vector<1x358xf32> to vector<1x256xf32>
    %134 = vector.broadcast %132 : f32 to vector<1x256xf32>
    %135 = arith.mulf %134, %133 : vector<1x256xf32>
    %136 = arith.addf %131, %135 : vector<1x256xf32>
    %c50 = arith.constant 50 : index
    %137 = memref.load %arg6[%c50] : memref<98xf32, #tpu.memory_space<smem>>
    %138 = vector.extract_strided_slice %37 {offsets = [0, 1], sizes = [1, 256], strides = [1, 1]} : vector<1x358xf32> to vector<1x256xf32>
    %139 = vector.broadcast %137 : f32 to vector<1x256xf32>
    %140 = arith.mulf %139, %138 : vector<1x256xf32>
    %141 = arith.addf %136, %140 : vector<1x256xf32>
    %c8 = arith.constant 8 : index
    %142 = memref.load %arg6[%c8] : memref<98xf32, #tpu.memory_space<smem>>
    %143 = vector.extract_strided_slice %36 {offsets = [0, 17], sizes = [1, 256], strides = [1, 1]} : vector<1x358xf32> to vector<1x256xf32>
    %144 = vector.broadcast %142 : f32 to vector<1x256xf32>
    %145 = arith.mulf %144, %143 : vector<1x256xf32>
    %146 = arith.addf %141, %145 : vector<1x256xf32>
    %c57 = arith.constant 57 : index
    %147 = memref.load %arg6[%c57] : memref<98xf32, #tpu.memory_space<smem>>
    %148 = vector.extract_strided_slice %37 {offsets = [0, 17], sizes = [1, 256], strides = [1, 1]} : vector<1x358xf32> to vector<1x256xf32>
    %149 = vector.broadcast %147 : f32 to vector<1x256xf32>
    %150 = arith.mulf %149, %148 : vector<1x256xf32>
    %151 = arith.addf %146, %150 : vector<1x256xf32>
    %c15 = arith.constant 15 : index
    %152 = memref.load %arg6[%c15] : memref<98xf32, #tpu.memory_space<smem>>
    %153 = vector.extract_strided_slice %36 {offsets = [0, 33], sizes = [1, 256], strides = [1, 1]} : vector<1x358xf32> to vector<1x256xf32>
    %154 = vector.broadcast %152 : f32 to vector<1x256xf32>
    %155 = arith.mulf %154, %153 : vector<1x256xf32>
    %156 = arith.addf %151, %155 : vector<1x256xf32>
    %c64 = arith.constant 64 : index
    %157 = memref.load %arg6[%c64] : memref<98xf32, #tpu.memory_space<smem>>
    %158 = vector.extract_strided_slice %37 {offsets = [0, 33], sizes = [1, 256], strides = [1, 1]} : vector<1x358xf32> to vector<1x256xf32>
    %159 = vector.broadcast %157 : f32 to vector<1x256xf32>
    %160 = arith.mulf %159, %158 : vector<1x256xf32>
    %161 = arith.addf %156, %160 : vector<1x256xf32>
    %c22 = arith.constant 22 : index
    %162 = memref.load %arg6[%c22] : memref<98xf32, #tpu.memory_space<smem>>
    %163 = vector.extract_strided_slice %36 {offsets = [0, 49], sizes = [1, 256], strides = [1, 1]} : vector<1x358xf32> to vector<1x256xf32>
    %164 = vector.broadcast %162 : f32 to vector<1x256xf32>
    %165 = arith.mulf %164, %163 : vector<1x256xf32>
    %166 = arith.addf %161, %165 : vector<1x256xf32>
    %c71 = arith.constant 71 : index
    %167 = memref.load %arg6[%c71] : memref<98xf32, #tpu.memory_space<smem>>
    %168 = vector.extract_strided_slice %37 {offsets = [0, 49], sizes = [1, 256], strides = [1, 1]} : vector<1x358xf32> to vector<1x256xf32>
    %169 = vector.broadcast %167 : f32 to vector<1x256xf32>
    %170 = arith.mulf %169, %168 : vector<1x256xf32>
    %171 = arith.addf %166, %170 : vector<1x256xf32>
    %c29 = arith.constant 29 : index
    %172 = memref.load %arg6[%c29] : memref<98xf32, #tpu.memory_space<smem>>
    %173 = vector.extract_strided_slice %36 {offsets = [0, 65], sizes = [1, 256], strides = [1, 1]} : vector<1x358xf32> to vector<1x256xf32>
    %174 = vector.broadcast %172 : f32 to vector<1x256xf32>
    %175 = arith.mulf %174, %173 : vector<1x256xf32>
    %176 = arith.addf %171, %175 : vector<1x256xf32>
    %c78 = arith.constant 78 : index
    %177 = memref.load %arg6[%c78] : memref<98xf32, #tpu.memory_space<smem>>
    %178 = vector.extract_strided_slice %37 {offsets = [0, 65], sizes = [1, 256], strides = [1, 1]} : vector<1x358xf32> to vector<1x256xf32>
    %179 = vector.broadcast %177 : f32 to vector<1x256xf32>
    %180 = arith.mulf %179, %178 : vector<1x256xf32>
    %181 = arith.addf %176, %180 : vector<1x256xf32>
    %c36 = arith.constant 36 : index
    %182 = memref.load %arg6[%c36] : memref<98xf32, #tpu.memory_space<smem>>
    %183 = vector.extract_strided_slice %36 {offsets = [0, 81], sizes = [1, 256], strides = [1, 1]} : vector<1x358xf32> to vector<1x256xf32>
    %184 = vector.broadcast %182 : f32 to vector<1x256xf32>
    %185 = arith.mulf %184, %183 : vector<1x256xf32>
    %186 = arith.addf %181, %185 : vector<1x256xf32>
    %c85 = arith.constant 85 : index
    %187 = memref.load %arg6[%c85] : memref<98xf32, #tpu.memory_space<smem>>
    %188 = vector.extract_strided_slice %37 {offsets = [0, 81], sizes = [1, 256], strides = [1, 1]} : vector<1x358xf32> to vector<1x256xf32>
    %189 = vector.broadcast %187 : f32 to vector<1x256xf32>
    %190 = arith.mulf %189, %188 : vector<1x256xf32>
    %191 = arith.addf %186, %190 : vector<1x256xf32>
    %c43 = arith.constant 43 : index
    %192 = memref.load %arg6[%c43] : memref<98xf32, #tpu.memory_space<smem>>
    %193 = vector.extract_strided_slice %36 {offsets = [0, 97], sizes = [1, 256], strides = [1, 1]} : vector<1x358xf32> to vector<1x256xf32>
    %194 = vector.broadcast %192 : f32 to vector<1x256xf32>
    %195 = arith.mulf %194, %193 : vector<1x256xf32>
    %196 = arith.addf %191, %195 : vector<1x256xf32>
    %c92 = arith.constant 92 : index
    %197 = memref.load %arg6[%c92] : memref<98xf32, #tpu.memory_space<smem>>
    %198 = vector.extract_strided_slice %37 {offsets = [0, 97], sizes = [1, 256], strides = [1, 1]} : vector<1x358xf32> to vector<1x256xf32>
    %199 = vector.broadcast %197 : f32 to vector<1x256xf32>
    %200 = arith.mulf %199, %198 : vector<1x256xf32>
    %201 = arith.addf %196, %200 : vector<1x256xf32>
    %cst_30 = arith.constant 2.000000e+00 : f32
    %202 = vector.broadcast %cst_30 : f32 to vector<1x256xf32>
    %203 = arith.cmpf oge, %47, %202 : vector<1x256xf32>
    %cst_31 = arith.constant 1.700000e+01 : f32
    %204 = vector.broadcast %cst_31 : f32 to vector<1x256xf32>
    %205 = arith.cmpf ole, %47, %204 : vector<1x256xf32>
    %206 = arith.andi %203, %205 : vector<1x256xi1>
    %cst_32 = arith.constant 0.000000e+00 : f32
    %207 = vector.broadcast %cst_32 : f32 to vector<1x256xf32>
    %208 = arith.select %206, %201, %207 : vector<1x256xi1>, vector<1x256xf32>
    %209 = arith.addf %130, %208 : vector<1x256xf32>
    %cst_33 = arith.constant 0.000000e+00 : f32
    %210 = vector.broadcast %cst_33 : f32 to vector<1x256xf32>
    %c2 = arith.constant 2 : index
    %211 = memref.load %arg6[%c2] : memref<98xf32, #tpu.memory_space<smem>>
    %212 = vector.extract_strided_slice %36 {offsets = [0, 2], sizes = [1, 256], strides = [1, 1]} : vector<1x358xf32> to vector<1x256xf32>
    %213 = vector.broadcast %211 : f32 to vector<1x256xf32>
    %214 = arith.mulf %213, %212 : vector<1x256xf32>
    %215 = arith.addf %210, %214 : vector<1x256xf32>
    %c51 = arith.constant 51 : index
    %216 = memref.load %arg6[%c51] : memref<98xf32, #tpu.memory_space<smem>>
    %217 = vector.extract_strided_slice %37 {offsets = [0, 2], sizes = [1, 256], strides = [1, 1]} : vector<1x358xf32> to vector<1x256xf32>
    %218 = vector.broadcast %216 : f32 to vector<1x256xf32>
    %219 = arith.mulf %218, %217 : vector<1x256xf32>
    %220 = arith.addf %215, %219 : vector<1x256xf32>
    %c9 = arith.constant 9 : index
    %221 = memref.load %arg6[%c9] : memref<98xf32, #tpu.memory_space<smem>>
    %222 = vector.extract_strided_slice %36 {offsets = [0, 18], sizes = [1, 256], strides = [1, 1]} : vector<1x358xf32> to vector<1x256xf32>
    %223 = vector.broadcast %221 : f32 to vector<1x256xf32>
    %224 = arith.mulf %223, %222 : vector<1x256xf32>
    %225 = arith.addf %220, %224 : vector<1x256xf32>
    %c58 = arith.constant 58 : index
    %226 = memref.load %arg6[%c58] : memref<98xf32, #tpu.memory_space<smem>>
    %227 = vector.extract_strided_slice %37 {offsets = [0, 18], sizes = [1, 256], strides = [1, 1]} : vector<1x358xf32> to vector<1x256xf32>
    %228 = vector.broadcast %226 : f32 to vector<1x256xf32>
    %229 = arith.mulf %228, %227 : vector<1x256xf32>
    %230 = arith.addf %225, %229 : vector<1x256xf32>
    %c16 = arith.constant 16 : index
    %231 = memref.load %arg6[%c16] : memref<98xf32, #tpu.memory_space<smem>>
    %232 = vector.extract_strided_slice %36 {offsets = [0, 34], sizes = [1, 256], strides = [1, 1]} : vector<1x358xf32> to vector<1x256xf32>
    %233 = vector.broadcast %231 : f32 to vector<1x256xf32>
    %234 = arith.mulf %233, %232 : vector<1x256xf32>
    %235 = arith.addf %230, %234 : vector<1x256xf32>
    %c65 = arith.constant 65 : index
    %236 = memref.load %arg6[%c65] : memref<98xf32, #tpu.memory_space<smem>>
    %237 = vector.extract_strided_slice %37 {offsets = [0, 34], sizes = [1, 256], strides = [1, 1]} : vector<1x358xf32> to vector<1x256xf32>
    %238 = vector.broadcast %236 : f32 to vector<1x256xf32>
    %239 = arith.mulf %238, %237 : vector<1x256xf32>
    %240 = arith.addf %235, %239 : vector<1x256xf32>
    %c23 = arith.constant 23 : index
    %241 = memref.load %arg6[%c23] : memref<98xf32, #tpu.memory_space<smem>>
    %242 = vector.extract_strided_slice %36 {offsets = [0, 50], sizes = [1, 256], strides = [1, 1]} : vector<1x358xf32> to vector<1x256xf32>
    %243 = vector.broadcast %241 : f32 to vector<1x256xf32>
    %244 = arith.mulf %243, %242 : vector<1x256xf32>
    %245 = arith.addf %240, %244 : vector<1x256xf32>
    %c72 = arith.constant 72 : index
    %246 = memref.load %arg6[%c72] : memref<98xf32, #tpu.memory_space<smem>>
    %247 = vector.extract_strided_slice %37 {offsets = [0, 50], sizes = [1, 256], strides = [1, 1]} : vector<1x358xf32> to vector<1x256xf32>
    %248 = vector.broadcast %246 : f32 to vector<1x256xf32>
    %249 = arith.mulf %248, %247 : vector<1x256xf32>
    %250 = arith.addf %245, %249 : vector<1x256xf32>
    %c30 = arith.constant 30 : index
    %251 = memref.load %arg6[%c30] : memref<98xf32, #tpu.memory_space<smem>>
    %252 = vector.extract_strided_slice %36 {offsets = [0, 66], sizes = [1, 256], strides = [1, 1]} : vector<1x358xf32> to vector<1x256xf32>
    %253 = vector.broadcast %251 : f32 to vector<1x256xf32>
    %254 = arith.mulf %253, %252 : vector<1x256xf32>
    %255 = arith.addf %250, %254 : vector<1x256xf32>
    %c79 = arith.constant 79 : index
    %256 = memref.load %arg6[%c79] : memref<98xf32, #tpu.memory_space<smem>>
    %257 = vector.extract_strided_slice %37 {offsets = [0, 66], sizes = [1, 256], strides = [1, 1]} : vector<1x358xf32> to vector<1x256xf32>
    %258 = vector.broadcast %256 : f32 to vector<1x256xf32>
    %259 = arith.mulf %258, %257 : vector<1x256xf32>
    %260 = arith.addf %255, %259 : vector<1x256xf32>
    %c37 = arith.constant 37 : index
    %261 = memref.load %arg6[%c37] : memref<98xf32, #tpu.memory_space<smem>>
    %262 = vector.extract_strided_slice %36 {offsets = [0, 82], sizes = [1, 256], strides = [1, 1]} : vector<1x358xf32> to vector<1x256xf32>
    %263 = vector.broadcast %261 : f32 to vector<1x256xf32>
    %264 = arith.mulf %263, %262 : vector<1x256xf32>
    %265 = arith.addf %260, %264 : vector<1x256xf32>
    %c86 = arith.constant 86 : index
    %266 = memref.load %arg6[%c86] : memref<98xf32, #tpu.memory_space<smem>>
    %267 = vector.extract_strided_slice %37 {offsets = [0, 82], sizes = [1, 256], strides = [1, 1]} : vector<1x358xf32> to vector<1x256xf32>
    %268 = vector.broadcast %266 : f32 to vector<1x256xf32>
    %269 = arith.mulf %268, %267 : vector<1x256xf32>
    %270 = arith.addf %265, %269 : vector<1x256xf32>
    %c44 = arith.constant 44 : index
    %271 = memref.load %arg6[%c44] : memref<98xf32, #tpu.memory_space<smem>>
    %272 = vector.extract_strided_slice %36 {offsets = [0, 98], sizes = [1, 256], strides = [1, 1]} : vector<1x358xf32> to vector<1x256xf32>
    %273 = vector.broadcast %271 : f32 to vector<1x256xf32>
    %274 = arith.mulf %273, %272 : vector<1x256xf32>
    %275 = arith.addf %270, %274 : vector<1x256xf32>
    %c93 = arith.constant 93 : index
    %276 = memref.load %arg6[%c93] : memref<98xf32, #tpu.memory_space<smem>>
    %277 = vector.extract_strided_slice %37 {offsets = [0, 98], sizes = [1, 256], strides = [1, 1]} : vector<1x358xf32> to vector<1x256xf32>
    %278 = vector.broadcast %276 : f32 to vector<1x256xf32>
    %279 = arith.mulf %278, %277 : vector<1x256xf32>
    %280 = arith.addf %275, %279 : vector<1x256xf32>
    %cst_34 = arith.constant 1.000000e+00 : f32
    %281 = vector.broadcast %cst_34 : f32 to vector<1x256xf32>
    %282 = arith.cmpf oge, %47, %281 : vector<1x256xf32>
    %cst_35 = arith.constant 1.600000e+01 : f32
    %283 = vector.broadcast %cst_35 : f32 to vector<1x256xf32>
    %284 = arith.cmpf ole, %47, %283 : vector<1x256xf32>
    %285 = arith.andi %282, %284 : vector<1x256xi1>
    %cst_36 = arith.constant 0.000000e+00 : f32
    %286 = vector.broadcast %cst_36 : f32 to vector<1x256xf32>
    %287 = arith.select %285, %280, %286 : vector<1x256xi1>, vector<1x256xf32>
    %288 = arith.addf %209, %287 : vector<1x256xf32>
    %cst_37 = arith.constant 0.000000e+00 : f32
    %289 = vector.broadcast %cst_37 : f32 to vector<1x256xf32>
    %c3 = arith.constant 3 : index
    %290 = memref.load %arg6[%c3] : memref<98xf32, #tpu.memory_space<smem>>
    %291 = vector.extract_strided_slice %36 {offsets = [0, 3], sizes = [1, 256], strides = [1, 1]} : vector<1x358xf32> to vector<1x256xf32>
    %292 = vector.broadcast %290 : f32 to vector<1x256xf32>
    %293 = arith.mulf %292, %291 : vector<1x256xf32>
    %294 = arith.addf %289, %293 : vector<1x256xf32>
    %c52 = arith.constant 52 : index
    %295 = memref.load %arg6[%c52] : memref<98xf32, #tpu.memory_space<smem>>
    %296 = vector.extract_strided_slice %37 {offsets = [0, 3], sizes = [1, 256], strides = [1, 1]} : vector<1x358xf32> to vector<1x256xf32>
    %297 = vector.broadcast %295 : f32 to vector<1x256xf32>
    %298 = arith.mulf %297, %296 : vector<1x256xf32>
    %299 = arith.addf %294, %298 : vector<1x256xf32>
    %c10 = arith.constant 10 : index
    %300 = memref.load %arg6[%c10] : memref<98xf32, #tpu.memory_space<smem>>
    %301 = vector.extract_strided_slice %36 {offsets = [0, 19], sizes = [1, 256], strides = [1, 1]} : vector<1x358xf32> to vector<1x256xf32>
    %302 = vector.broadcast %300 : f32 to vector<1x256xf32>
    %303 = arith.mulf %302, %301 : vector<1x256xf32>
    %304 = arith.addf %299, %303 : vector<1x256xf32>
    %c59 = arith.constant 59 : index
    %305 = memref.load %arg6[%c59] : memref<98xf32, #tpu.memory_space<smem>>
    %306 = vector.extract_strided_slice %37 {offsets = [0, 19], sizes = [1, 256], strides = [1, 1]} : vector<1x358xf32> to vector<1x256xf32>
    %307 = vector.broadcast %305 : f32 to vector<1x256xf32>
    %308 = arith.mulf %307, %306 : vector<1x256xf32>
    %309 = arith.addf %304, %308 : vector<1x256xf32>
    %c17 = arith.constant 17 : index
    %310 = memref.load %arg6[%c17] : memref<98xf32, #tpu.memory_space<smem>>
    %311 = vector.extract_strided_slice %36 {offsets = [0, 35], sizes = [1, 256], strides = [1, 1]} : vector<1x358xf32> to vector<1x256xf32>
    %312 = vector.broadcast %310 : f32 to vector<1x256xf32>
    %313 = arith.mulf %312, %311 : vector<1x256xf32>
    %314 = arith.addf %309, %313 : vector<1x256xf32>
    %c66 = arith.constant 66 : index
    %315 = memref.load %arg6[%c66] : memref<98xf32, #tpu.memory_space<smem>>
    %316 = vector.extract_strided_slice %37 {offsets = [0, 35], sizes = [1, 256], strides = [1, 1]} : vector<1x358xf32> to vector<1x256xf32>
    %317 = vector.broadcast %315 : f32 to vector<1x256xf32>
    %318 = arith.mulf %317, %316 : vector<1x256xf32>
    %319 = arith.addf %314, %318 : vector<1x256xf32>
    %c24 = arith.constant 24 : index
    %320 = memref.load %arg6[%c24] : memref<98xf32, #tpu.memory_space<smem>>
    %321 = vector.extract_strided_slice %36 {offsets = [0, 51], sizes = [1, 256], strides = [1, 1]} : vector<1x358xf32> to vector<1x256xf32>
    %322 = vector.broadcast %320 : f32 to vector<1x256xf32>
    %323 = arith.mulf %322, %321 : vector<1x256xf32>
    %324 = arith.addf %319, %323 : vector<1x256xf32>
    %c73 = arith.constant 73 : index
    %325 = memref.load %arg6[%c73] : memref<98xf32, #tpu.memory_space<smem>>
    %326 = vector.extract_strided_slice %37 {offsets = [0, 51], sizes = [1, 256], strides = [1, 1]} : vector<1x358xf32> to vector<1x256xf32>
    %327 = vector.broadcast %325 : f32 to vector<1x256xf32>
    %328 = arith.mulf %327, %326 : vector<1x256xf32>
    %329 = arith.addf %324, %328 : vector<1x256xf32>
    %c31 = arith.constant 31 : index
    %330 = memref.load %arg6[%c31] : memref<98xf32, #tpu.memory_space<smem>>
    %331 = vector.extract_strided_slice %36 {offsets = [0, 67], sizes = [1, 256], strides = [1, 1]} : vector<1x358xf32> to vector<1x256xf32>
    %332 = vector.broadcast %330 : f32 to vector<1x256xf32>
    %333 = arith.mulf %332, %331 : vector<1x256xf32>
    %334 = arith.addf %329, %333 : vector<1x256xf32>
    %c80 = arith.constant 80 : index
    %335 = memref.load %arg6[%c80] : memref<98xf32, #tpu.memory_space<smem>>
    %336 = vector.extract_strided_slice %37 {offsets = [0, 67], sizes = [1, 256], strides = [1, 1]} : vector<1x358xf32> to vector<1x256xf32>
    %337 = vector.broadcast %335 : f32 to vector<1x256xf32>
    %338 = arith.mulf %337, %336 : vector<1x256xf32>
    %339 = arith.addf %334, %338 : vector<1x256xf32>
    %c38 = arith.constant 38 : index
    %340 = memref.load %arg6[%c38] : memref<98xf32, #tpu.memory_space<smem>>
    %341 = vector.extract_strided_slice %36 {offsets = [0, 83], sizes = [1, 256], strides = [1, 1]} : vector<1x358xf32> to vector<1x256xf32>
    %342 = vector.broadcast %340 : f32 to vector<1x256xf32>
    %343 = arith.mulf %342, %341 : vector<1x256xf32>
    %344 = arith.addf %339, %343 : vector<1x256xf32>
    %c87 = arith.constant 87 : index
    %345 = memref.load %arg6[%c87] : memref<98xf32, #tpu.memory_space<smem>>
    %346 = vector.extract_strided_slice %37 {offsets = [0, 83], sizes = [1, 256], strides = [1, 1]} : vector<1x358xf32> to vector<1x256xf32>
    %347 = vector.broadcast %345 : f32 to vector<1x256xf32>
    %348 = arith.mulf %347, %346 : vector<1x256xf32>
    %349 = arith.addf %344, %348 : vector<1x256xf32>
    %c45 = arith.constant 45 : index
    %350 = memref.load %arg6[%c45] : memref<98xf32, #tpu.memory_space<smem>>
    %351 = vector.extract_strided_slice %36 {offsets = [0, 99], sizes = [1, 256], strides = [1, 1]} : vector<1x358xf32> to vector<1x256xf32>
    %352 = vector.broadcast %350 : f32 to vector<1x256xf32>
    %353 = arith.mulf %352, %351 : vector<1x256xf32>
    %354 = arith.addf %349, %353 : vector<1x256xf32>
    %c94 = arith.constant 94 : index
    %355 = memref.load %arg6[%c94] : memref<98xf32, #tpu.memory_space<smem>>
    %356 = vector.extract_strided_slice %37 {offsets = [0, 99], sizes = [1, 256], strides = [1, 1]} : vector<1x358xf32> to vector<1x256xf32>
    %357 = vector.broadcast %355 : f32 to vector<1x256xf32>
    %358 = arith.mulf %357, %356 : vector<1x256xf32>
    %359 = arith.addf %354, %358 : vector<1x256xf32>
    %cst_38 = arith.constant 0.000000e+00 : f32
    %360 = vector.broadcast %cst_38 : f32 to vector<1x256xf32>
    %361 = arith.cmpf oge, %47, %360 : vector<1x256xf32>
    %cst_39 = arith.constant 1.500000e+01 : f32
    %362 = vector.broadcast %cst_39 : f32 to vector<1x256xf32>
    %363 = arith.cmpf ole, %47, %362 : vector<1x256xf32>
    %364 = arith.andi %361, %363 : vector<1x256xi1>
    %cst_40 = arith.constant 0.000000e+00 : f32
    %365 = vector.broadcast %cst_40 : f32 to vector<1x256xf32>
    %366 = arith.select %364, %359, %365 : vector<1x256xi1>, vector<1x256xf32>
    %367 = arith.addf %288, %366 : vector<1x256xf32>
    %cst_41 = arith.constant 0.000000e+00 : f32
    %368 = vector.broadcast %cst_41 : f32 to vector<1x256xf32>
    %c4 = arith.constant 4 : index
    %369 = memref.load %arg6[%c4] : memref<98xf32, #tpu.memory_space<smem>>
    %370 = vector.extract_strided_slice %36 {offsets = [0, 4], sizes = [1, 256], strides = [1, 1]} : vector<1x358xf32> to vector<1x256xf32>
    %371 = vector.broadcast %369 : f32 to vector<1x256xf32>
    %372 = arith.mulf %371, %370 : vector<1x256xf32>
    %373 = arith.addf %368, %372 : vector<1x256xf32>
    %c53 = arith.constant 53 : index
    %374 = memref.load %arg6[%c53] : memref<98xf32, #tpu.memory_space<smem>>
    %375 = vector.extract_strided_slice %37 {offsets = [0, 4], sizes = [1, 256], strides = [1, 1]} : vector<1x358xf32> to vector<1x256xf32>
    %376 = vector.broadcast %374 : f32 to vector<1x256xf32>
    %377 = arith.mulf %376, %375 : vector<1x256xf32>
    %378 = arith.addf %373, %377 : vector<1x256xf32>
    %c11 = arith.constant 11 : index
    %379 = memref.load %arg6[%c11] : memref<98xf32, #tpu.memory_space<smem>>
    %380 = vector.extract_strided_slice %36 {offsets = [0, 20], sizes = [1, 256], strides = [1, 1]} : vector<1x358xf32> to vector<1x256xf32>
    %381 = vector.broadcast %379 : f32 to vector<1x256xf32>
    %382 = arith.mulf %381, %380 : vector<1x256xf32>
    %383 = arith.addf %378, %382 : vector<1x256xf32>
    %c60 = arith.constant 60 : index
    %384 = memref.load %arg6[%c60] : memref<98xf32, #tpu.memory_space<smem>>
    %385 = vector.extract_strided_slice %37 {offsets = [0, 20], sizes = [1, 256], strides = [1, 1]} : vector<1x358xf32> to vector<1x256xf32>
    %386 = vector.broadcast %384 : f32 to vector<1x256xf32>
    %387 = arith.mulf %386, %385 : vector<1x256xf32>
    %388 = arith.addf %383, %387 : vector<1x256xf32>
    %c18 = arith.constant 18 : index
    %389 = memref.load %arg6[%c18] : memref<98xf32, #tpu.memory_space<smem>>
    %390 = vector.extract_strided_slice %36 {offsets = [0, 36], sizes = [1, 256], strides = [1, 1]} : vector<1x358xf32> to vector<1x256xf32>
    %391 = vector.broadcast %389 : f32 to vector<1x256xf32>
    %392 = arith.mulf %391, %390 : vector<1x256xf32>
    %393 = arith.addf %388, %392 : vector<1x256xf32>
    %c67 = arith.constant 67 : index
    %394 = memref.load %arg6[%c67] : memref<98xf32, #tpu.memory_space<smem>>
    %395 = vector.extract_strided_slice %37 {offsets = [0, 36], sizes = [1, 256], strides = [1, 1]} : vector<1x358xf32> to vector<1x256xf32>
    %396 = vector.broadcast %394 : f32 to vector<1x256xf32>
    %397 = arith.mulf %396, %395 : vector<1x256xf32>
    %398 = arith.addf %393, %397 : vector<1x256xf32>
    %c25 = arith.constant 25 : index
    %399 = memref.load %arg6[%c25] : memref<98xf32, #tpu.memory_space<smem>>
    %400 = vector.extract_strided_slice %36 {offsets = [0, 52], sizes = [1, 256], strides = [1, 1]} : vector<1x358xf32> to vector<1x256xf32>
    %401 = vector.broadcast %399 : f32 to vector<1x256xf32>
    %402 = arith.mulf %401, %400 : vector<1x256xf32>
    %403 = arith.addf %398, %402 : vector<1x256xf32>
    %c74 = arith.constant 74 : index
    %404 = memref.load %arg6[%c74] : memref<98xf32, #tpu.memory_space<smem>>
    %405 = vector.extract_strided_slice %37 {offsets = [0, 52], sizes = [1, 256], strides = [1, 1]} : vector<1x358xf32> to vector<1x256xf32>
    %406 = vector.broadcast %404 : f32 to vector<1x256xf32>
    %407 = arith.mulf %406, %405 : vector<1x256xf32>
    %408 = arith.addf %403, %407 : vector<1x256xf32>
    %c32 = arith.constant 32 : index
    %409 = memref.load %arg6[%c32] : memref<98xf32, #tpu.memory_space<smem>>
    %410 = vector.extract_strided_slice %36 {offsets = [0, 68], sizes = [1, 256], strides = [1, 1]} : vector<1x358xf32> to vector<1x256xf32>
    %411 = vector.broadcast %409 : f32 to vector<1x256xf32>
    %412 = arith.mulf %411, %410 : vector<1x256xf32>
    %413 = arith.addf %408, %412 : vector<1x256xf32>
    %c81 = arith.constant 81 : index
    %414 = memref.load %arg6[%c81] : memref<98xf32, #tpu.memory_space<smem>>
    %415 = vector.extract_strided_slice %37 {offsets = [0, 68], sizes = [1, 256], strides = [1, 1]} : vector<1x358xf32> to vector<1x256xf32>
    %416 = vector.broadcast %414 : f32 to vector<1x256xf32>
    %417 = arith.mulf %416, %415 : vector<1x256xf32>
    %418 = arith.addf %413, %417 : vector<1x256xf32>
    %c39 = arith.constant 39 : index
    %419 = memref.load %arg6[%c39] : memref<98xf32, #tpu.memory_space<smem>>
    %420 = vector.extract_strided_slice %36 {offsets = [0, 84], sizes = [1, 256], strides = [1, 1]} : vector<1x358xf32> to vector<1x256xf32>
    %421 = vector.broadcast %419 : f32 to vector<1x256xf32>
    %422 = arith.mulf %421, %420 : vector<1x256xf32>
    %423 = arith.addf %418, %422 : vector<1x256xf32>
    %c88 = arith.constant 88 : index
    %424 = memref.load %arg6[%c88] : memref<98xf32, #tpu.memory_space<smem>>
    %425 = vector.extract_strided_slice %37 {offsets = [0, 84], sizes = [1, 256], strides = [1, 1]} : vector<1x358xf32> to vector<1x256xf32>
    %426 = vector.broadcast %424 : f32 to vector<1x256xf32>
    %427 = arith.mulf %426, %425 : vector<1x256xf32>
    %428 = arith.addf %423, %427 : vector<1x256xf32>
    %c46 = arith.constant 46 : index
    %429 = memref.load %arg6[%c46] : memref<98xf32, #tpu.memory_space<smem>>
    %430 = vector.extract_strided_slice %36 {offsets = [0, 100], sizes = [1, 256], strides = [1, 1]} : vector<1x358xf32> to vector<1x256xf32>
    %431 = vector.broadcast %429 : f32 to vector<1x256xf32>
    %432 = arith.mulf %431, %430 : vector<1x256xf32>
    %433 = arith.addf %428, %432 : vector<1x256xf32>
    %c95 = arith.constant 95 : index
    %434 = memref.load %arg6[%c95] : memref<98xf32, #tpu.memory_space<smem>>
    %435 = vector.extract_strided_slice %37 {offsets = [0, 100], sizes = [1, 256], strides = [1, 1]} : vector<1x358xf32> to vector<1x256xf32>
    %436 = vector.broadcast %434 : f32 to vector<1x256xf32>
    %437 = arith.mulf %436, %435 : vector<1x256xf32>
    %438 = arith.addf %433, %437 : vector<1x256xf32>
    %cst_42 = arith.constant -1.000000e+00 : f32
    %439 = vector.broadcast %cst_42 : f32 to vector<1x256xf32>
    %440 = arith.cmpf oge, %47, %439 : vector<1x256xf32>
    %cst_43 = arith.constant 1.400000e+01 : f32
    %441 = vector.broadcast %cst_43 : f32 to vector<1x256xf32>
    %442 = arith.cmpf ole, %47, %441 : vector<1x256xf32>
    %443 = arith.andi %440, %442 : vector<1x256xi1>
    %cst_44 = arith.constant 0.000000e+00 : f32
    %444 = vector.broadcast %cst_44 : f32 to vector<1x256xf32>
    %445 = arith.select %443, %438, %444 : vector<1x256xi1>, vector<1x256xf32>
    %446 = arith.addf %367, %445 : vector<1x256xf32>
    %cst_45 = arith.constant 0.000000e+00 : f32
    %447 = vector.broadcast %cst_45 : f32 to vector<1x256xf32>
    %c5 = arith.constant 5 : index
    %448 = memref.load %arg6[%c5] : memref<98xf32, #tpu.memory_space<smem>>
    %449 = vector.extract_strided_slice %36 {offsets = [0, 5], sizes = [1, 256], strides = [1, 1]} : vector<1x358xf32> to vector<1x256xf32>
    %450 = vector.broadcast %448 : f32 to vector<1x256xf32>
    %451 = arith.mulf %450, %449 : vector<1x256xf32>
    %452 = arith.addf %447, %451 : vector<1x256xf32>
    %c54 = arith.constant 54 : index
    %453 = memref.load %arg6[%c54] : memref<98xf32, #tpu.memory_space<smem>>
    %454 = vector.extract_strided_slice %37 {offsets = [0, 5], sizes = [1, 256], strides = [1, 1]} : vector<1x358xf32> to vector<1x256xf32>
    %455 = vector.broadcast %453 : f32 to vector<1x256xf32>
    %456 = arith.mulf %455, %454 : vector<1x256xf32>
    %457 = arith.addf %452, %456 : vector<1x256xf32>
    %c12 = arith.constant 12 : index
    %458 = memref.load %arg6[%c12] : memref<98xf32, #tpu.memory_space<smem>>
    %459 = vector.extract_strided_slice %36 {offsets = [0, 21], sizes = [1, 256], strides = [1, 1]} : vector<1x358xf32> to vector<1x256xf32>
    %460 = vector.broadcast %458 : f32 to vector<1x256xf32>
    %461 = arith.mulf %460, %459 : vector<1x256xf32>
    %462 = arith.addf %457, %461 : vector<1x256xf32>
    %c61 = arith.constant 61 : index
    %463 = memref.load %arg6[%c61] : memref<98xf32, #tpu.memory_space<smem>>
    %464 = vector.extract_strided_slice %37 {offsets = [0, 21], sizes = [1, 256], strides = [1, 1]} : vector<1x358xf32> to vector<1x256xf32>
    %465 = vector.broadcast %463 : f32 to vector<1x256xf32>
    %466 = arith.mulf %465, %464 : vector<1x256xf32>
    %467 = arith.addf %462, %466 : vector<1x256xf32>
    %c19 = arith.constant 19 : index
    %468 = memref.load %arg6[%c19] : memref<98xf32, #tpu.memory_space<smem>>
    %469 = vector.extract_strided_slice %36 {offsets = [0, 37], sizes = [1, 256], strides = [1, 1]} : vector<1x358xf32> to vector<1x256xf32>
    %470 = vector.broadcast %468 : f32 to vector<1x256xf32>
    %471 = arith.mulf %470, %469 : vector<1x256xf32>
    %472 = arith.addf %467, %471 : vector<1x256xf32>
    %c68 = arith.constant 68 : index
    %473 = memref.load %arg6[%c68] : memref<98xf32, #tpu.memory_space<smem>>
    %474 = vector.extract_strided_slice %37 {offsets = [0, 37], sizes = [1, 256], strides = [1, 1]} : vector<1x358xf32> to vector<1x256xf32>
    %475 = vector.broadcast %473 : f32 to vector<1x256xf32>
    %476 = arith.mulf %475, %474 : vector<1x256xf32>
    %477 = arith.addf %472, %476 : vector<1x256xf32>
    %c26 = arith.constant 26 : index
    %478 = memref.load %arg6[%c26] : memref<98xf32, #tpu.memory_space<smem>>
    %479 = vector.extract_strided_slice %36 {offsets = [0, 53], sizes = [1, 256], strides = [1, 1]} : vector<1x358xf32> to vector<1x256xf32>
    %480 = vector.broadcast %478 : f32 to vector<1x256xf32>
    %481 = arith.mulf %480, %479 : vector<1x256xf32>
    %482 = arith.addf %477, %481 : vector<1x256xf32>
    %c75 = arith.constant 75 : index
    %483 = memref.load %arg6[%c75] : memref<98xf32, #tpu.memory_space<smem>>
    %484 = vector.extract_strided_slice %37 {offsets = [0, 53], sizes = [1, 256], strides = [1, 1]} : vector<1x358xf32> to vector<1x256xf32>
    %485 = vector.broadcast %483 : f32 to vector<1x256xf32>
    %486 = arith.mulf %485, %484 : vector<1x256xf32>
    %487 = arith.addf %482, %486 : vector<1x256xf32>
    %c33 = arith.constant 33 : index
    %488 = memref.load %arg6[%c33] : memref<98xf32, #tpu.memory_space<smem>>
    %489 = vector.extract_strided_slice %36 {offsets = [0, 69], sizes = [1, 256], strides = [1, 1]} : vector<1x358xf32> to vector<1x256xf32>
    %490 = vector.broadcast %488 : f32 to vector<1x256xf32>
    %491 = arith.mulf %490, %489 : vector<1x256xf32>
    %492 = arith.addf %487, %491 : vector<1x256xf32>
    %c82 = arith.constant 82 : index
    %493 = memref.load %arg6[%c82] : memref<98xf32, #tpu.memory_space<smem>>
    %494 = vector.extract_strided_slice %37 {offsets = [0, 69], sizes = [1, 256], strides = [1, 1]} : vector<1x358xf32> to vector<1x256xf32>
    %495 = vector.broadcast %493 : f32 to vector<1x256xf32>
    %496 = arith.mulf %495, %494 : vector<1x256xf32>
    %497 = arith.addf %492, %496 : vector<1x256xf32>
    %c40 = arith.constant 40 : index
    %498 = memref.load %arg6[%c40] : memref<98xf32, #tpu.memory_space<smem>>
    %499 = vector.extract_strided_slice %36 {offsets = [0, 85], sizes = [1, 256], strides = [1, 1]} : vector<1x358xf32> to vector<1x256xf32>
    %500 = vector.broadcast %498 : f32 to vector<1x256xf32>
    %501 = arith.mulf %500, %499 : vector<1x256xf32>
    %502 = arith.addf %497, %501 : vector<1x256xf32>
    %c89 = arith.constant 89 : index
    %503 = memref.load %arg6[%c89] : memref<98xf32, #tpu.memory_space<smem>>
    %504 = vector.extract_strided_slice %37 {offsets = [0, 85], sizes = [1, 256], strides = [1, 1]} : vector<1x358xf32> to vector<1x256xf32>
    %505 = vector.broadcast %503 : f32 to vector<1x256xf32>
    %506 = arith.mulf %505, %504 : vector<1x256xf32>
    %507 = arith.addf %502, %506 : vector<1x256xf32>
    %c47 = arith.constant 47 : index
    %508 = memref.load %arg6[%c47] : memref<98xf32, #tpu.memory_space<smem>>
    %509 = vector.extract_strided_slice %36 {offsets = [0, 101], sizes = [1, 256], strides = [1, 1]} : vector<1x358xf32> to vector<1x256xf32>
    %510 = vector.broadcast %508 : f32 to vector<1x256xf32>
    %511 = arith.mulf %510, %509 : vector<1x256xf32>
    %512 = arith.addf %507, %511 : vector<1x256xf32>
    %c96 = arith.constant 96 : index
    %513 = memref.load %arg6[%c96] : memref<98xf32, #tpu.memory_space<smem>>
    %514 = vector.extract_strided_slice %37 {offsets = [0, 101], sizes = [1, 256], strides = [1, 1]} : vector<1x358xf32> to vector<1x256xf32>
    %515 = vector.broadcast %513 : f32 to vector<1x256xf32>
    %516 = arith.mulf %515, %514 : vector<1x256xf32>
    %517 = arith.addf %512, %516 : vector<1x256xf32>
    %cst_46 = arith.constant -2.000000e+00 : f32
    %518 = vector.broadcast %cst_46 : f32 to vector<1x256xf32>
    %519 = arith.cmpf oge, %47, %518 : vector<1x256xf32>
    %cst_47 = arith.constant 1.300000e+01 : f32
    %520 = vector.broadcast %cst_47 : f32 to vector<1x256xf32>
    %521 = arith.cmpf ole, %47, %520 : vector<1x256xf32>
    %522 = arith.andi %519, %521 : vector<1x256xi1>
    %cst_48 = arith.constant 0.000000e+00 : f32
    %523 = vector.broadcast %cst_48 : f32 to vector<1x256xf32>
    %524 = arith.select %522, %517, %523 : vector<1x256xi1>, vector<1x256xf32>
    %525 = arith.addf %446, %524 : vector<1x256xf32>
    %cst_49 = arith.constant 0.000000e+00 : f32
    %526 = vector.broadcast %cst_49 : f32 to vector<1x256xf32>
    %c6 = arith.constant 6 : index
    %527 = memref.load %arg6[%c6] : memref<98xf32, #tpu.memory_space<smem>>
    %528 = vector.extract_strided_slice %36 {offsets = [0, 6], sizes = [1, 256], strides = [1, 1]} : vector<1x358xf32> to vector<1x256xf32>
    %529 = vector.broadcast %527 : f32 to vector<1x256xf32>
    %530 = arith.mulf %529, %528 : vector<1x256xf32>
    %531 = arith.addf %526, %530 : vector<1x256xf32>
    %c55 = arith.constant 55 : index
    %532 = memref.load %arg6[%c55] : memref<98xf32, #tpu.memory_space<smem>>
    %533 = vector.extract_strided_slice %37 {offsets = [0, 6], sizes = [1, 256], strides = [1, 1]} : vector<1x358xf32> to vector<1x256xf32>
    %534 = vector.broadcast %532 : f32 to vector<1x256xf32>
    %535 = arith.mulf %534, %533 : vector<1x256xf32>
    %536 = arith.addf %531, %535 : vector<1x256xf32>
    %c13 = arith.constant 13 : index
    %537 = memref.load %arg6[%c13] : memref<98xf32, #tpu.memory_space<smem>>
    %538 = vector.extract_strided_slice %36 {offsets = [0, 22], sizes = [1, 256], strides = [1, 1]} : vector<1x358xf32> to vector<1x256xf32>
    %539 = vector.broadcast %537 : f32 to vector<1x256xf32>
    %540 = arith.mulf %539, %538 : vector<1x256xf32>
    %541 = arith.addf %536, %540 : vector<1x256xf32>
    %c62 = arith.constant 62 : index
    %542 = memref.load %arg6[%c62] : memref<98xf32, #tpu.memory_space<smem>>
    %543 = vector.extract_strided_slice %37 {offsets = [0, 22], sizes = [1, 256], strides = [1, 1]} : vector<1x358xf32> to vector<1x256xf32>
    %544 = vector.broadcast %542 : f32 to vector<1x256xf32>
    %545 = arith.mulf %544, %543 : vector<1x256xf32>
    %546 = arith.addf %541, %545 : vector<1x256xf32>
    %c20 = arith.constant 20 : index
    %547 = memref.load %arg6[%c20] : memref<98xf32, #tpu.memory_space<smem>>
    %548 = vector.extract_strided_slice %36 {offsets = [0, 38], sizes = [1, 256], strides = [1, 1]} : vector<1x358xf32> to vector<1x256xf32>
    %549 = vector.broadcast %547 : f32 to vector<1x256xf32>
    %550 = arith.mulf %549, %548 : vector<1x256xf32>
    %551 = arith.addf %546, %550 : vector<1x256xf32>
    %c69 = arith.constant 69 : index
    %552 = memref.load %arg6[%c69] : memref<98xf32, #tpu.memory_space<smem>>
    %553 = vector.extract_strided_slice %37 {offsets = [0, 38], sizes = [1, 256], strides = [1, 1]} : vector<1x358xf32> to vector<1x256xf32>
    %554 = vector.broadcast %552 : f32 to vector<1x256xf32>
    %555 = arith.mulf %554, %553 : vector<1x256xf32>
    %556 = arith.addf %551, %555 : vector<1x256xf32>
    %c27 = arith.constant 27 : index
    %557 = memref.load %arg6[%c27] : memref<98xf32, #tpu.memory_space<smem>>
    %558 = vector.extract_strided_slice %36 {offsets = [0, 54], sizes = [1, 256], strides = [1, 1]} : vector<1x358xf32> to vector<1x256xf32>
    %559 = vector.broadcast %557 : f32 to vector<1x256xf32>
    %560 = arith.mulf %559, %558 : vector<1x256xf32>
    %561 = arith.addf %556, %560 : vector<1x256xf32>
    %c76 = arith.constant 76 : index
    %562 = memref.load %arg6[%c76] : memref<98xf32, #tpu.memory_space<smem>>
    %563 = vector.extract_strided_slice %37 {offsets = [0, 54], sizes = [1, 256], strides = [1, 1]} : vector<1x358xf32> to vector<1x256xf32>
    %564 = vector.broadcast %562 : f32 to vector<1x256xf32>
    %565 = arith.mulf %564, %563 : vector<1x256xf32>
    %566 = arith.addf %561, %565 : vector<1x256xf32>
    %c34 = arith.constant 34 : index
    %567 = memref.load %arg6[%c34] : memref<98xf32, #tpu.memory_space<smem>>
    %568 = vector.extract_strided_slice %36 {offsets = [0, 70], sizes = [1, 256], strides = [1, 1]} : vector<1x358xf32> to vector<1x256xf32>
    %569 = vector.broadcast %567 : f32 to vector<1x256xf32>
    %570 = arith.mulf %569, %568 : vector<1x256xf32>
    %571 = arith.addf %566, %570 : vector<1x256xf32>
    %c83 = arith.constant 83 : index
    %572 = memref.load %arg6[%c83] : memref<98xf32, #tpu.memory_space<smem>>
    %573 = vector.extract_strided_slice %37 {offsets = [0, 70], sizes = [1, 256], strides = [1, 1]} : vector<1x358xf32> to vector<1x256xf32>
    %574 = vector.broadcast %572 : f32 to vector<1x256xf32>
    %575 = arith.mulf %574, %573 : vector<1x256xf32>
    %576 = arith.addf %571, %575 : vector<1x256xf32>
    %c41 = arith.constant 41 : index
    %577 = memref.load %arg6[%c41] : memref<98xf32, #tpu.memory_space<smem>>
    %578 = vector.extract_strided_slice %36 {offsets = [0, 86], sizes = [1, 256], strides = [1, 1]} : vector<1x358xf32> to vector<1x256xf32>
    %579 = vector.broadcast %577 : f32 to vector<1x256xf32>
    %580 = arith.mulf %579, %578 : vector<1x256xf32>
    %581 = arith.addf %576, %580 : vector<1x256xf32>
    %c90 = arith.constant 90 : index
    %582 = memref.load %arg6[%c90] : memref<98xf32, #tpu.memory_space<smem>>
    %583 = vector.extract_strided_slice %37 {offsets = [0, 86], sizes = [1, 256], strides = [1, 1]} : vector<1x358xf32> to vector<1x256xf32>
    %584 = vector.broadcast %582 : f32 to vector<1x256xf32>
    %585 = arith.mulf %584, %583 : vector<1x256xf32>
    %586 = arith.addf %581, %585 : vector<1x256xf32>
    %c48 = arith.constant 48 : index
    %587 = memref.load %arg6[%c48] : memref<98xf32, #tpu.memory_space<smem>>
    %588 = vector.extract_strided_slice %36 {offsets = [0, 102], sizes = [1, 256], strides = [1, 1]} : vector<1x358xf32> to vector<1x256xf32>
    %589 = vector.broadcast %587 : f32 to vector<1x256xf32>
    %590 = arith.mulf %589, %588 : vector<1x256xf32>
    %591 = arith.addf %586, %590 : vector<1x256xf32>
    %c97 = arith.constant 97 : index
    %592 = memref.load %arg6[%c97] : memref<98xf32, #tpu.memory_space<smem>>
    %593 = vector.extract_strided_slice %37 {offsets = [0, 102], sizes = [1, 256], strides = [1, 1]} : vector<1x358xf32> to vector<1x256xf32>
    %594 = vector.broadcast %592 : f32 to vector<1x256xf32>
    %595 = arith.mulf %594, %593 : vector<1x256xf32>
    %596 = arith.addf %591, %595 : vector<1x256xf32>
    %cst_50 = arith.constant -3.000000e+00 : f32
    %597 = vector.broadcast %cst_50 : f32 to vector<1x256xf32>
    %598 = arith.cmpf oge, %47, %597 : vector<1x256xf32>
    %cst_51 = arith.constant 1.200000e+01 : f32
    %599 = vector.broadcast %cst_51 : f32 to vector<1x256xf32>
    %600 = arith.cmpf ole, %47, %599 : vector<1x256xf32>
    %601 = arith.andi %598, %600 : vector<1x256xi1>
    %cst_52 = arith.constant 0.000000e+00 : f32
    %602 = vector.broadcast %cst_52 : f32 to vector<1x256xf32>
    %603 = arith.select %601, %596, %602 : vector<1x256xi1>, vector<1x256xf32>
    %604 = arith.addf %525, %603 : vector<1x256xf32>
    %605 = arith.negf %604 : vector<1x256xf32>
    %606 = math.exp %605 : vector<1x256xf32>
    %cst_53 = arith.constant 1.000000e+00 : f32
    %607 = vector.broadcast %cst_53 : f32 to vector<1x256xf32>
    %608 = arith.addf %607, %606 : vector<1x256xf32>
    %609 = arith.divf %607, %608 : vector<1x256xf32>
    %610 = vector.broadcast %609 : vector<1x256xf32> to vector<8x256xf32>
    %611 = arith.mulf %28, %610 : vector<8x256xf32>
    %c0_54 = arith.constant 0 : index
    %c0_55 = arith.constant 0 : index
    %c0_56 = arith.constant 0 : index
    %612 = vector.load %arg8[%c0_54, %c0_55, %c0_56] : memref<1x8x256xf32, #tpu.memory_space<vmem>>, vector<1x8x256xf32>
    %613 = vector.shape_cast %612 : vector<1x8x256xf32> to vector<8x256xf32>
    %614 = vector.shape_cast %611 : vector<8x256xf32> to vector<1x8x256xf32>
    tpu.vector_store %arg8[%c0_54, %c0_55, %c0_56], %614 {strides = array<i32>} : memref<1x8x256xf32, #tpu.memory_space<vmem>>, vector<1x8x256xf32>,
    return
  }
  func.func @transform_0(%arg0: i32) -> (i32, i32, i32) {
    %c0_i32 = arith.constant 0 : i32
    %c0_i32_0 = arith.constant 0 : i32
    %c0_i32_1 = arith.constant 0 : i32
    return %arg0, %c0_i32, %c0_i32_0 : i32, i32, i32
  }
  func.func @transform_1(%arg0: i32) -> (i32, i32) {
    %c0_i32 = arith.constant 0 : i32
    %c0_i32_0 = arith.constant 0 : i32
    %c0_i32_1 = arith.constant 0 : i32
    return %c0_i32, %c0_i32_0 : i32, i32
  }
  func.func @transform_2(%arg0: i32) -> (i32, i32) {
    %c0_i32 = arith.constant 0 : i32
    %c0_i32_0 = arith.constant 0 : i32
    %c0_i32_1 = arith.constant 0 : i32
    return %c0_i32, %c0_i32_0 : i32, i32
  }
  func.func @transform_3(%arg0: i32) -> (i32, i32) {
    %c0_i32 = arith.constant 0 : i32
    %c0_i32_0 = arith.constant 0 : i32
    %c0_i32_1 = arith.constant 0 : i32
    return %c0_i32, %c0_i32_0 : i32, i32
  }
  func.func @transform_4(%arg0: i32) -> (i32, i32) {
    %c0_i32 = arith.constant 0 : i32
    %c0_i32_0 = arith.constant 0 : i32
    %c0_i32_1 = arith.constant 0 : i32
    return %c0_i32, %c0_i32_0 : i32, i32
  }
  func.func @transform_5(%arg0: i32) -> i32 {
    %c0_i32 = arith.constant 0 : i32
    %c0_i32_0 = arith.constant 0 : i32
    return %c0_i32 : i32
  }
  func.func @transform_6(%arg0: i32) -> i32 {
    %c0_i32 = arith.constant 0 : i32
    %c0_i32_0 = arith.constant 0 : i32
    return %c0_i32 : i32
  }
  func.func @transform_7(%arg0: i32) -> (i32, i32, i32) {
    %c0_i32 = arith.constant 0 : i32
    %c0_i32_0 = arith.constant 0 : i32
    %c0_i32_1 = arith.constant 0 : i32
    return %arg0, %c0_i32, %c0_i32_0 : i32, i32, i32
  }
}

</mosaic_0001>

<bundles_post_ra>
// kernel: tpu_custom_call.1
= control target key start
LH: loop header
LB: loop body
LE: loop exit
PB: predicated region body
PF: predicated region fallthrough
CT: control target
= control target key end

     0   :  { %s5179_s0 = inlined_call_operand.hbm [shape: f32[2,8,256], index: 0, kind: input, shape index: {}]   ;;  %s5180_s1 = inlined_call_operand.vmem [shape: f32[8,2], index: 1, kind: input, shape index: {}]   ;;  %s5181_s2 = inlined_call_operand.vmem [shape: f32[1,2], index: 2, kind: input, shape index: {}]   ;;  %s5182_s3 = inlined_call_operand.vmem [shape: f32[8,2], index: 3, kind: input, shape index: {}]   ;;  %s5183_s4 = inlined_call_operand.vmem [shape: f32[8,1], index: 4, kind: input, shape index: {}]   ;;  %s5184_s5 = inlined_call_operand.vmem [shape: f32[98], index: 5, kind: input, shape index: {}]   ;;  %s5185_s6 = inlined_call_operand.<no memory space> [shape: f32[1], index: 6, kind: input, shape index: {}]   ;;  %s5186_s7 = inlined_call_operand.hbm [shape: f32[2,8,256], index: 7, kind: output, shape index: {}]  }
   0x1   :  { %5281 = sst [smem:[#allocation138_spill]] %s5184_s5 }
   0x2   :  { %12 = sst [smem:[#allocation2]] %s5185_s6 }
   0x3   :  { %13 = vsyncpa [#allocation4], 0 }
   0x4   :  { %15 = vsyncpa [#allocation4 + $0x1], 0 }
   0x5   :  { %16 = vsyncpa [#allocation6], 0 }
   0x6   :  { %17 = vsyncpa [#allocation5], 0 }
   0x7   :  { %19 = vsyncpa [#allocation5 + $0x1], 0  ;;  %s3013_s26 = smov 0   ;;  %s3015_s27 = smov 0  }
   0x8   :  { %s3017_s28 = smov 0   ;;  %s3019_s29 = smov 0  }
   0x9 LB: > { %s3034_s6 = sadd.s32 4294967295, %s2951_s29   ;;  %s2637_s30 = sadd.s32 4294967294, %s2951_s29   ;;  %s2951_s29 = sphi %s3019_s29, %s5588_s29   ;;  %s2947_s28 = sphi %s3017_s28, %s5587_s28   ;;  %s2943_s27 = sphi %s3015_s27, %s5586_s27   ;;  %s2939_s26 = sphi %s3013_s26, %s5585_s26  }
   0xa   : > { %p45_p0 = scmp.ne.s32.totalorder %s2943_s27, %s2939_s26  ;;  %p5187_p1 = scmp.eq.s32.totalorder %s3034_s6, 0 }
   0xb   : > { %p201_p3 = scmp.eq.s32.totalorder %s2637_s30, 1  ;;  %p2638_p5 = scmp.ge.s32.totalorder %s2951_s29, 1 }
   0xc   : > { %p3043_p4 = por %p5187_p1, %p45_p0  ;;  %p208_p7 = scmp.lt.s32.totalorder %s2951_s29, 3 }
   0xd   : > { %p3048_p6 = por %p201_p3, %p45_p0  ;;  %s5284_s5 = sld [smem:[#allocation138_spill]] }
   0xe   : > { %s5282_s8 = scalar_select %p3043_p4, 1, 0 }
   0xf   : > { %s5283_s9 = scalar_select %p3048_p6, 1, 0 }
  0x10   : > { %p3056_p8 = pnand %p2638_p5, %p208_p7  ;;  %s3064_s14 = sadd.s32 1, %s2951_s29  }
  0x11   : > { %s29_s16 = ssub.s32 %s2951_s29, %s3064_s14  ;;  %s32_s18 = sadd.s32 1, %s2947_s28 }
  0x12   : > { %s5285_s13 = scalar_select %p3056_p8, 1, 0 }
  0x13   : > { %s233_s12 = sshll.u32 %s5284_s5, 4  ;;  %p2763_p10 = pneg %p3056_p8  ;;  %s234_s12 = int_to_ptr.vmem [resolvable:$true] %s233_s12 }
  0x14   : > { %p3074_p12 = scmp.eq.s32.totalorder %s29_s16, 0  ;;  %p39_p13 = scmp.ne.s32.totalorder %s2947_s28, %s2943_s27 }
  0x15   : > { %p3068_p11 = pnand %p2763_p10, %p5187_p1  ;;  %s2840_s19 = scalar_lea.vmem %s234_s12, 16 }
  0x16   : > { %p2841_p0 = scmp.ne.s32.totalorder %s234_s12, %s2840_s19  ;;  %p2848_p9 = scmp.lt.s32.totalorder %s234_s12, %s234_s12 }
  0x17   : > { %p2842_p3 = pneg %p3068_p11  ;;  %p2849_p2 = scmp.lt.s32.totalorder %s2840_s19, %s2840_s19 }
  0x19   : > { %p2843_p5 = pnand %p2842_p3, %p2841_p0  ;;  %p2850_p10 = por %p2849_p2, %p2848_p9 }
  0x1b   : > { %p2844_p7 = pneg %p2843_p5 }
  0x1d   : > { %p2851_p1 = pnand %p2850_p10, %p2844_p7 }
  0x1f   : > { %2854 = shalt.err (!%p2851_p1)
}
  0x20   : > { %s2953_s20 = smov [#allocation7]   ;;  %p40_p2 = scmp.eq.s32.totalorder %s2951_s29, 0 }
  0x21   : > { %2766 = dma.vmem_to_smem (!%p3068_p11), %s234_s12, 16, %s2953_s20, [#allocation6]  }
  0x22   : > { %s3088_s21 = scalar_select %p3074_p12, %s2947_s28, %s32_s18  }
  0x23   : > { %p5288_p1 = scmp.eq.s32.totalorder %s3034_s6, 1  ;;  %p2776_p0 = scmp.lt.s32.totalorder %s2951_s29, 2 }
  0x24   : > { %s247_s23 = sand.u32 1, %s2947_s28   ;;  %p41_p3 = por %p40_p2, %p39_p13 }
  0x25   : > { %p3096_p9 = por %p5288_p1, %p39_p13  ;;  %s2641_s24 = sshll.u32 %s247_s23, 4 }
  0x26   : > { %s2753_s25 = sshll.u32 %s2951_s29, 8  ;;  %s251_s12 = scalar_lea.vmem [#allocation3], %s2641_s24 }
  0x27   : > { %s5289_s22 = scalar_select %p3096_p9, 1, 0 }
  0x28   : > { %s3109_s11 = scalar_lea.hbm %s5179_s0, %s2753_s25  ;;  %s259_s15 = sshll.u32 %s251_s12, 4  ;;  %s260_s15 = int_to_ptr.vmem [resolvable:$true] %s259_s15 }
  0x29   : > { %p3111_p11 = pnand %p2776_p0, %p41_p3  ;;  %s248_s17 = scalar_lea.sflag [#allocation4], %s247_s23 }
  0x2a   : > { %s2855_s18 = scalar_lea.hbm %s3109_s11, 256  ;;  %s2860_s25 = scalar_lea.hbm %s5179_s0, 512 }
  0x2b   : > { %p2856_p12 = scmp.ne.s32.totalorder %s3109_s11, %s2855_s18  ;;  %p2857_p13 = pneg %p3111_p11 }
  0x2c   : > { %p2861_p10 = scmp.lt.s32.totalorder %s3109_s11, %s5179_s0  ;;  %p2862_p2 = scmp.lt.s32.totalorder %s2860_s25, %s2855_s18 }
  0x2d   : > { %p2858_p5 = pnand %p2857_p13, %p2856_p12 }
  0x2e   : > { %p2863_p1 = por %p2862_p2, %p2861_p10 }
  0x2f   : > { %p2859_p7 = pneg %p2858_p5 }
  0x31   : > { %p2864_p0 = pnand %p2863_p1, %p2859_p7 }
  0x33   : > { %2867 = shalt.err (!%p2864_p0)
}
  0x34   : > { %s2868_s10 = scalar_lea.vmem %s260_s15, 256  ;;  %s2954_s23 = smov [#allocation3]  }
  0x35   : > { %p2869_p3 = scmp.ne.s32.totalorder %s260_s15, %s2868_s10  ;;  %s2873_s12 = sshll.u32 %s2954_s23, 4  ;;  %s2874_s12 = int_to_ptr.vmem [resolvable:$false] %s2873_s12 }
  0x36   : > { %s2875_s5 = scalar_lea.vmem %s2874_s12, 512  ;;  %p2876_p12 = scmp.lt.s32.totalorder %s260_s15, %s2874_s12 }
  0x37   : > { %p2871_p6 = pnand %p2869_p3, %p2857_p13  ;;  %p2877_p5 = scmp.lt.s32.totalorder %s2875_s5, %s2868_s10 }
  0x39   : > { %p2872_p9 = pneg %p2871_p6  ;;  %p2878_p4 = por %p2877_p5, %p2876_p12 }
  0x3b   : > { %p2879_p8 = pnand %p2878_p4, %p2872_p9 }
  0x3d   : > { %2882 = shalt.err (!%p2879_p8)
}
  0x3e   : > { %2770 = dma.hbm_to_vmem [thread:$0]  (!%p3111_p11), %s3109_s11, 256, %s260_s15, %s248_s17  }
  0x3f   : > { %p5291_p7 = scmp.ne.s32.totalorder %s5285_s13, 0 }
  0x41   : > { %268 = sbr.rel (%p5291_p7) target bundleno = 1475 (0x5c3), region = 48 }
  0x46   : > { %s3132_s18 = sand.u32 1, %s2943_s27   ;;  %p5292_p4 = scmp.ne.s32.totalorder %s5282_s8, 0 }
  0x47   : > { %s2645_s19 = sshll.u32 %s3132_s18, 4  ;;  %s271_s20 = scalar_lea.sflag [#allocation4], %s3132_s18 }
  0x48   : > { %s274_s5 = scalar_lea.vmem [#allocation3], %s2645_s19 }
  0x49   : > { %2926 = dma.done.wait (%p5292_p4), %s271_s20, 256  }
  0x4a   : > { %2928 = vsyncadd (%p5292_p4), %s271_s20, 4294967040  ;;  %p5293_p6 = scmp.eq.s32.totalorder %s3034_s6, 0 }
  0x4c   : > { %2930 = dma.done.wait (%p5293_p6), [#allocation6], 16   ;;  %p5294_p8 = pmov %p5293_p6 }
  0x4e   : > { %2932 = vsyncadd (%p5294_p8), [#allocation6], 4294967280 }
  0x4f   : > { %283 = sfence }
  0x50   : > { %v310_v0 = vld [vmem:[%s274_s5] sm:$0xff]  ;;  %v311_v1 = vld [vmem:[%s274_s5 + $0x8] sm:$0xff]  ;;  %vm318_vm0 = vcmask 15360   ;;  %v5191_v11 = vlaneseq  ;;  %v2955_v24 = vmov 0   ;;  %s2956_s24 = smov 51   ;;  %s2651_s10 = sld [smem:[#allocation7 + $0x38]] }
  0x51   : > { %v312_v2 = vadd.f32 %v311_v1, %v310_v0  ;;  %v316_v3 = vld [vmem:[%s5180_s1] sm:$0xff]  ;;  %2826 = vset.pattern.permute.xlu1 %v2955_v24  ;;  %2827 = vset.pattern.permute.xlu0 %v2955_v24  ;;  %vm386_vm1 = vcmask 416768   ;;  %s2653_s23 = sld [smem:[#allocation7 + $0x3f]]  ;;  %s2957_s12 = smov 112   ;;  %vm450_vm2 = vcmask 916480   ;;  %vm491_vm3 = vcmask 785408  }
  0x52   : > { %v331_v14 = vshrl.u32 %v5191_v11, 7  ;;  %v326_v15 = vld [vmem:[%s5181_s2] sm:$0x1]  ;;  %s2655_s20 = sld [smem:[#allocation7 + $0x46]]  ;;  %s2958_s13 = smov 96   ;;  %vm532_vm4 = vcmask 654336  }
  0x53   : > { %313 = vadd.xlane.f32.xlu0 %v312_v2  ;;  %v329_v20 = vld [vmem:[%s5182_s3] sm:$0xff]  ;;  %s2657_s5 = sld [smem:[#allocation7 + $0x4d]]  ;;  %s2959_s8 = smov 80   ;;  %vm573_vm5 = vcmask 523264   ;;  %vm614_vm6 = vcmask 392192   ;;  %vm655_vm7 = vcmask 261120  }
  0x54   : > { %v3154_v18 = vsub.s32 0, %v331_v14  ;;  %v338_v25 = vld [vmem:[%s5183_s4] sm:$0xff]  ;;  %s2659_s11 = sld [smem:[#allocation7 + $0x54]]  ;;  %s2960_s16 = smov 64  }
  0x55   : > { %s2661_s15 = sld [smem:[#allocation7 + $0x5b]]  ;;  %s2961_s25 = smov 48  }
  0x56   : > { %5295 = vst [vmem:[#allocation12_spill] sm:$0xff] %v3154_v18  ;;  %v458_v59 = vstv %s2651_s10  ;;  %s2665_s17 = sld [smem:[#allocation7 + $0x39]]  ;;  %p5582_p11 = scmp.ne.s32.totalorder %s5289_s22, 0 }
  0x57   : > { %s2667_s30 = sld [smem:[#allocation7 + $0x40]] }
  0x58   : > { %s2669_s10 = sld [smem:[#allocation7 + $0x47]] }
  0x5a   : > { %v622_v14 = vstv %s2659_s11  ;;  %s2679_s11 = sld [smem:[#allocation7 + $0x3a]] }
  0x5d   : > { %v775_v24 = vstv %s2667_s30  ;;  %s2662_s30 = sld [smem:[#allocation7 + $0x1]] }
  0xdc   : > { %v314_v4 = vpop.xlane.xlu0 %313 }
  0xdd   : > { %v315_v5 = vmul.f32 0.00390625, %v314_v4  ;;  %v499_v4 = vstv %s2653_s23  ;;  %s2671_s23 = sld [smem:[#allocation7 + $0x4e]] }
  0xdf   : > { %v317_v6 = vmul.f32 %v316_v3, %v315_v5 }
  0xe1   : > { %v319_v7 = vsel %vm318_vm0, %v317_v6, 0.0 }
  0xe2   : > { %v320_v8 = vrot.slane %v319_v7, 4 }
  0xe4   : > { %v321_v9 = vadd.f32 %v320_v8, %v319_v7  ;;  %v540_v7 = vstv %s2655_s20  ;;  %s2673_s20 = sld [smem:[#allocation7 + $0x55]] }
  0xe6   : > { %v322_v10 = vrot.slane %v321_v9, 2 }
  0xe8   : > { %v323_v12 = vadd.f32 %v322_v10, %v321_v9  ;;  %v581_v10 = vstv %s2657_s5  ;;  %s2675_s5 = sld [smem:[#allocation7 + $0x5c]] }
  0xea   : > { %v324_v13 = vrot.slane %v323_v12, 1 }
  0xec   : > { %v325_v16 = vadd.f32 %v324_v13, %v323_v12 }
  0xee   : > { %v327_v17 = vadd.f32 %v326_v15, %v325_v16 }
  0xf0   : > { %v328_v19 = vmax.f32 %v327_v17, 0.0  ;;  %v663_v17 = vstv %s2661_s15  ;;  %s2681_s15 = sld [smem:[#allocation7 + $0x41]] }
  0xf2   : > { %v333_v21 = vrot.slane %v328_v19, %v3154_v18 }
  0xf4   : > { %v334_v22 = vmul.f32 %v333_v21, %v329_v20  ;;  %v731_v21 = vstv %s2665_s17  ;;  %s2663_s17 = sld [smem:[#allocation7 + $0x32]] }
  0xf6   : > { %v335_v23 = vsel %vm318_vm0, %v334_v22, 0.0  ;;  %vm987_vm0 = vcmask 1039360  }
  0xf7   : > { %336 = vadd.xlane.f32.xlu0 %v335_v23 }
 0x180   : > { %v337_v26 = vpop.xlane.xlu0 %336 }
 0x181   : > { %v339_v27 = vadd.f32 %v338_v25, %v337_v26 }
 0x183   : > { %v2648_v28 = vmul.f32 -1.442695, %v339_v27  ;;  %v3217_v27 = vstv %s2669_s10  ;;  %s2677_s10 = sld [smem:[#allocation7 + $0x33]] }
 0x185   : > { %2828 = vpow2.f32 %v2648_v28 }
 0x192   : > { %v2829_v29 = vpop.eup %2828 }
 0x193   : > { %v343_v30 = vadd.f32 1.0, %v2829_v29 }
 0x195   : > { %2830 = vrcp.f32 %v343_v30  ;;  %v3224_v30 = vstv %s2671_s23  ;;  %s2676_s23 = sld [smem:[#allocation7 + $0x2]] }
 0x1a2   : > { %v2831_v31 = vpop.eup %2830 }
 0x1a3   : > { %348 = vperm.xlu1 %2826, %v2831_v31  }
 0x21e   : > { %v349_v32 = vpop.permute.xlu1 %348 }
 0x21f   : > { %v3164_v33 = vmul.f32 %v349_v32, %v310_v0  ;;  %v3166_v34 = vmul.f32 %v349_v32, %v311_v1 }
 0x221   : > { %5296 = vst [vmem:[#allocation13_spill] sm:$0xff] %v3164_v33  ;;  %5297 = vst [vmem:[#allocation14_spill] sm:$0xff] %v3166_v34  ;;  %v353_v35 = vrot.slane %v3164_v33, 4  ;;  %v359_v36 = vrot.slane %v3166_v34, 4 }
 0x223   : > { %v369_v37 = vmax.f32 %v3164_v33, %v353_v35  ;;  %v360_v38 = vadd.f32 %v359_v36, %v3166_v34  ;;  %v375_v39 = vmax.f32 %v3166_v34, %v359_v36  ;;  %v354_v40 = vadd.f32 %v353_v35, %v3164_v33 }
 0x224   : > { %v3231_v35 = vstv %s2673_s20  ;;  %s2683_s20 = sld [smem:[#allocation7 + $0x48]] }
 0x225   : > { %v370_v41 = vrot.slane %v369_v37, 2  ;;  %v361_v42 = vrot.slane %v360_v38, 2  ;;  %v376_v43 = vrot.slane %v375_v39, 2  ;;  %v355_v44 = vrot.slane %v354_v40, 2 }
 0x227   : > { %v371_v45 = vmax.f32 %v369_v37, %v370_v41  ;;  %v362_v46 = vadd.f32 %v361_v42, %v360_v38  ;;  %v377_v47 = vmax.f32 %v375_v39, %v376_v43  ;;  %v356_v48 = vadd.f32 %v355_v44, %v354_v40 }
 0x228   : > { %v3238_v38 = vstv %s2675_s5  ;;  %v3243_v41 = vstv %s2679_s11  ;;  %s2691_s5 = sld [smem:[#allocation7 + $0x34]] }
 0x229   : > { %v372_v49 = vrot.slane %v371_v45, 1  ;;  %v363_v50 = vrot.slane %v362_v46, 1  ;;  %v378_v53 = vrot.slane %v377_v47, 1  ;;  %v357_v54 = vrot.slane %v356_v48, 1  ;;  %s2685_s11 = sld [smem:[#allocation7 + $0x4f]] }
 0x22b   : > { %v373_v51 = vmax.f32 %v371_v45, %v372_v49  ;;  %v364_v52 = vadd.f32 %v363_v50, %v362_v46  ;;  %v379_v56 = vmax.f32 %v377_v47, %v378_v53  ;;  %v358_v57 = vadd.f32 %v357_v54, %v356_v48 }
 0x22c   : > { %v3260_v49 = vstv %s2681_s15  ;;  %s2690_s15 = sld [smem:[#allocation7 + $0x3]] }
 0x22d   : > { %395 = vrot.lane.b32.xlu1 %v373_v51, %s2956_s24  ;;  %v367_v55 = vmul.f32 0.125, %v364_v52  ;;  %v366_v58 = vmul.f32 0.125, %v358_v57  ;;  %v3266_v51 = vstv %s2663_s17  ;;  %v3270_v52 = vstv %s2662_s30  ;;  %s2687_s17 = sld [smem:[#allocation7 + $0x56]] }
 0x22e   : > { %5299 = vst [vmem:[#allocation16_spill] sm:$0xff] %v3270_v52  ;;  %s2689_s30 = sld [smem:[#allocation7 + $0x5d]] }
 0x22f   : > { %384 = vrot.lane.b32.xlu0 %v367_v55, %s2956_s24 }
 0x231   : > { %397 = vrot.lane.b32.xlu1 %v379_v56, %s2956_s24 }
 0x235   : > { %382 = vrot.lane.b32.xlu1 %v366_v58, %s2956_s24  ;;  %s2962_s24 = smov 32  }
 0x29f   : > { %v396_v60 = vpop.permute.xlu1 %395 }
 0x2a0   : > { %v3175_v61 = vsel %vm386_vm1, 0.0, %v396_v60 }
 0x2a1   : > { %5298 = vst [vmem:[#allocation15_spill] sm:$0xff] %v3175_v61  ;;  %v459_v62 = vmul.f32 %v458_v59, %v3175_v61  ;;  %v500_v6 = vmul.f32 %v499_v4, %v3175_v61  ;;  %v541_v13 = vmul.f32 %v540_v7, %v3175_v61  ;;  %v582_v20 = vmul.f32 %v581_v10, %v3175_v61  ;;  %v3252_v45 = vpop.permute.xlu0 %384 }
 0x2a2   : > { %v623_v26 = vmul.f32 %v622_v14, %v3175_v61  ;;  %v664_v32 = vmul.f32 %v663_v17, %v3175_v61  ;;  %v732_v40 = vmul.f32 %v731_v21, %v3175_v61  ;;  %v1036_v42 = vmul.f32 %v3243_v41, %v3175_v61 }
 0x2a3   : > { %v398_v63 = vpop.permute.xlu1 %397  ;;  %465 = vrot.lane.b32.xlu1 %v459_v62, %s2957_s12  ;;  %v776_v48 = vmul.f32 %v775_v24, %v3175_v61  ;;  %v1080_v53 = vmul.f32 %v3260_v49, %v3175_v61  ;;  %v702_v57 = vmul.f32 %v3266_v51, %v3175_v61 }
 0x2a4   : > { %v3180_v0 = vsel %vm386_vm1, %v396_v60, %v398_v63  ;;  %v3183_v1 = vsel %vm386_vm1, %v398_v63, 0.0  ;;  %v3291_v63 = vstv %s2676_s23  ;;  %s2695_s23 = sld [smem:[#allocation7 + $0x42]] }
 0x2a5   : > { %v460_v2 = vmul.f32 %v458_v59, %v3180_v0  ;;  %v461_v3 = vmul.f32 %v458_v59, %v3183_v1  ;;  %v501_v5 = vmul.f32 %v499_v4, %v3180_v0  ;;  %v542_v8 = vmul.f32 %v540_v7, %v3180_v0  ;;  %5303 = vst [vmem:[#allocation20_spill] sm:$0xff] %v3291_v63 }
 0x2a6   : > { %v502_v9 = vmul.f32 %v499_v4, %v3183_v1  ;;  %v583_v12 = vmul.f32 %v581_v10, %v3180_v0  ;;  %v624_v15 = vmul.f32 %v622_v14, %v3180_v0  ;;  %v543_v16 = vmul.f32 %v540_v7, %v3183_v1 }
 0x2a7   : > { %467 = vrot.lane.b32.xlu0 %v460_v2, %s2957_s12  ;;  %469 = vrot.lane.b32.xlu1 %v461_v3, %s2957_s12  ;;  %v665_v19 = vmul.f32 %v663_v17, %v3180_v0  ;;  %v733_v22 = vmul.f32 %v731_v21, %v3180_v0  ;;  %v584_v23 = vmul.f32 %v581_v10, %v3183_v1  ;;  %v383_v44 = vpop.permute.xlu1 %382  ;;  %v3283_v59 = vstv %s2677_s10  ;;  %s2693_s10 = sld [smem:[#allocation7 + $0x3b]] }
 0x2a8   : > { %v777_v25 = vmul.f32 %v775_v24, %v3180_v0  ;;  %v821_v28 = vmul.f32 %v3217_v27, %v3180_v0  ;;  %v625_v29 = vmul.f32 %v622_v14, %v3183_v1  ;;  %v865_v31 = vmul.f32 %v3224_v30, %v3180_v0  ;;  %5300 = vst [vmem:[#allocation17_spill] sm:$0xff] %v3283_v59 }
 0x2a9   : > { %v909_v36 = vmul.f32 %v3231_v35, %v3180_v0  ;;  %v666_v37 = vmul.f32 %v663_v17, %v3183_v1  ;;  %v953_v39 = vmul.f32 %v3238_v38, %v3180_v0  ;;  %v734_v43 = vmul.f32 %v731_v21, %v3183_v1 }
 0x2aa   : > { %v3255_v46 = vsel %vm386_vm1, 0.0, %v383_v44  ;;  %v1038_v47 = vmul.f32 %v3243_v41, %v3183_v1  ;;  %v3264_v50 = vsel %vm386_vm1, %v383_v44, %v3252_v45  ;;  %v778_v55 = vmul.f32 %v775_v24, %v3183_v1 }
 0x2ab   : > { %508 = vrot.lane.b32.xlu0 %v501_v5, %s2958_s13  ;;  %506 = vrot.lane.b32.xlu1 %v500_v6, %s2958_s13  ;;  %v694_v54 = vmul.f32 %v3270_v52, %v3255_v46  ;;  %v695_v56 = vmul.f32 %v3270_v52, %v3264_v50  ;;  %v703_v58 = vmul.f32 %v3266_v51, %v3180_v0  ;;  %v3301_v6 = vstv %s2683_s20  ;;  %s2697_s20 = sld [smem:[#allocation7 + $0x49]] }
 0x2ac   : > { %v1082_v2 = vmul.f32 %v3260_v49, %v3183_v1  ;;  %v820_v3 = vmul.f32 %v3217_v27, %v3175_v61  ;;  %v998_v4 = vmul.f32 %v3291_v63, %v3255_v46  ;;  %v1006_v5 = vmul.f32 %v3283_v59, %v3175_v61 }
 0x2ad   : > { %v3287_v60 = vadd.f32 %v702_v57, %v694_v54  ;;  %v3289_v62 = vadd.f32 %v703_v58, %v695_v56  ;;  %v999_v7 = vmul.f32 %v3291_v63, %v3264_v50  ;;  %v1124_v10 = vmul.f32 %v3301_v6, %v3175_v61 }
 0x2ae   : > { %v3319_v14 = vstv %s2691_s5  ;;  %v1167_v17 = vstv %s2685_s11  ;;  %v1339_v44 = vstv %s2693_s10  ;;  %s2699_s5 = sld [smem:[#allocation7 + $0x50]] }
 0x2af   : > { %549 = vrot.lane.b32.xlu0 %v542_v8, %s2959_s8  ;;  %510 = vrot.lane.b32.xlu1 %v502_v9, %s2958_s13  ;;  %5301 = vst [vmem:[#allocation18_spill] sm:$0xff] %v3287_v60  ;;  %5302 = vst [vmem:[#allocation19_spill] sm:$0xff] %v3289_v62  ;;  %v3307_v8 = vadd.f32 %v1006_v5, %v998_v4  ;;  %v1007_v9 = vmul.f32 %v3283_v59, %v3180_v0  ;;  %s2701_s11 = sld [smem:[#allocation7 + $0x57]] }
 0x2b0   : > { %5304 = vst [vmem:[#allocation21_spill] sm:$0xff] %v3319_v14  ;;  %v1168_v24 = vmul.f32 %v1167_v17, %v3175_v61  ;;  %s2711_s10 = sld [smem:[#allocation7 + $0x4a]] }
 0x2b1   : > { %v1427_v54 = vstv %s2697_s20  ;;  %s2721_s20 = sld [smem:[#allocation7 + $0x3d]] }
 0x2b3   : > { %590 = vrot.lane.b32.xlu0 %v583_v12, %s2960_s16  ;;  %547 = vrot.lane.b32.xlu1 %v541_v13, %s2959_s8  ;;  %v822_v12 = vmul.f32 %v3217_v27, %v3183_v1  ;;  %v3315_v13 = vadd.f32 %v1007_v9, %v999_v7 }
 0x2b4   : > { %v3385_v56 = vstv %s2699_s5  ;;  %s2735_s5 = sld [smem:[#allocation7 + $0x3e]] }
 0x2b5   : > { %v1473_v57 = vmul.f32 %v3385_v56, %v3180_v0 }
 0x2b7   : > { %631 = vrot.lane.b32.xlu0 %v624_v15, %s2961_s25  ;;  %551 = vrot.lane.b32.xlu1 %v543_v16, %s2959_s8  ;;  %v1126_v15 = vmul.f32 %v3301_v6, %v3183_v1  ;;  %v864_v16 = vmul.f32 %v3224_v30, %v3175_v61 }
 0x2bb   : > { %672 = vrot.lane.b32.xlu0 %v665_v19, %s2962_s24  ;;  %588 = vrot.lane.b32.xlu1 %v582_v20, %s2960_s16  ;;  %v3325_v19 = vstv %s2690_s15  ;;  %s2703_s15 = sld [smem:[#allocation7 + $0x5e]] }
 0x2bc   : > { %5305 = vst [vmem:[#allocation22_spill] sm:$0xff] %v3325_v19  ;;  %v1302_v20 = vmul.f32 %v3325_v19, %v3255_v46  ;;  %v1303_v21 = vmul.f32 %v3325_v19, %v3264_v50 }
 0x2bf   : > { %740 = vrot.lane.b32.xlu0 %v733_v22, %s2957_s12  ;;  %592 = vrot.lane.b32.xlu1 %v584_v23, %s2960_s16  ;;  %v1310_v22 = vmul.f32 %v3319_v14, %v3175_v61  ;;  %v1311_v23 = vmul.f32 %v3319_v14, %v3180_v0 }
 0x2c1   : > { %v3342_v27 = vadd.f32 %v1311_v23, %v1303_v21  ;;  %v1342_v21 = vmul.f32 %v1339_v44, %v3183_v1 }
 0x2c3   : > { %784 = vrot.lane.b32.xlu0 %v777_v25, %s2958_s13  ;;  %629 = vrot.lane.b32.xlu1 %v623_v26, %s2961_s25  ;;  %v866_v25 = vmul.f32 %v3224_v30, %v3183_v1  ;;  %v3340_v26 = vadd.f32 %v1310_v22, %v1302_v20  ;;  %5307 = vst [vmem:[#allocation24_spill] sm:$0xff] %v3342_v27 }
 0x2c5   : > { %5306 = vst [vmem:[#allocation23_spill] sm:$0xff] %v3340_v26 }
 0x2c7   : > { %828 = vrot.lane.b32.xlu0 %v821_v28, %s2959_s8  ;;  %633 = vrot.lane.b32.xlu1 %v625_v29, %s2961_s25  ;;  %v1170_v28 = vmul.f32 %v1167_v17, %v3183_v1  ;;  %v908_v29 = vmul.f32 %v3231_v35, %v3175_v61 }
 0x2cb   : > { %872 = vrot.lane.b32.xlu0 %v865_v31, %s2960_s16  ;;  %670 = vrot.lane.b32.xlu1 %v664_v32, %s2962_s24  ;;  %v1211_v31 = vstv %s2687_s17  ;;  %v910_v32 = vmul.f32 %v3231_v35, %v3183_v1  ;;  %v954_v35 = vmul.f32 %v3238_v38, %v3183_v1  ;;  %s2707_s17 = sld [smem:[#allocation7 + $0x3c]] }
 0x2cc   : > { %v1212_v30 = vmul.f32 %v1211_v31, %v3175_v61  ;;  %v1213_v58 = vmul.f32 %v1211_v31, %v3180_v0 }
 0x2cf   : > { %916 = vrot.lane.b32.xlu0 %v909_v36, %s2961_s25  ;;  %674 = vrot.lane.b32.xlu1 %v666_v37, %s2962_s24  ;;  %v1214_v36 = vmul.f32 %v1211_v31, %v3183_v1  ;;  %v952_v37 = vmul.f32 %v3238_v38, %v3175_v61  ;;  %v1081_v38 = vmul.f32 %v3260_v49, %v3180_v0 }
 0x2d0   : > { %v1169_v49 = vmul.f32 %v1167_v17, %v3180_v0 }
 0x2d3   : > { %960 = vrot.lane.b32.xlu0 %v953_v39, %s2962_s24  ;;  %738 = vrot.lane.b32.xlu1 %v732_v40, %s2957_s12  ;;  %v1255_v39 = vstv %s2689_s30  ;;  %s2709_s30 = sld [smem:[#allocation7 + $0x43]] }
 0x2d4   : > { %v1256_v40 = vmul.f32 %v1255_v39, %v3175_v61  ;;  %v1257_v5 = vmul.f32 %v1255_v39, %v3180_v0 }
 0x2d7   : > { %1042 = vrot.lane.b32.xlu0 %v1036_v42, %s2957_s12  ;;  %742 = vrot.lane.b32.xlu1 %v734_v43, %s2957_s12  ;;  %v1258_v42 = vmul.f32 %v1255_v39, %v3183_v1  ;;  %v1037_v43 = vmul.f32 %v3243_v41, %v3180_v0  ;;  %v1125_v41 = vmul.f32 %v3301_v6, %v3180_v0  ;;  %v3401_v6 = vstv %s2703_s15  ;;  %s2737_s15 = sld [smem:[#allocation7 + $0x45]] }
 0x2db   : > { %1046 = vrot.lane.b32.xlu0 %v1038_v47, %s2957_s12  ;;  %782 = vrot.lane.b32.xlu1 %v776_v48, %s2958_s13  ;;  %v1341_v47 = vmul.f32 %v1339_v44, %v3180_v0  ;;  %v1383_v48 = vstv %s2695_s23  ;;  %s2713_s23 = sld [smem:[#allocation7 + $0x51]] }
 0x2df   : > { %1086 = vrot.lane.b32.xlu0 %v1080_v53, %s2958_s13  ;;  %786 = vrot.lane.b32.xlu1 %v778_v55, %s2958_s13  ;;  %v1385_v53 = vmul.f32 %v1383_v48, %v3180_v0  ;;  %v1429_v55 = vmul.f32 %v1427_v54, %v3180_v0 }
 0x2e3   : > { %1090 = vrot.lane.b32.xlu0 %v1082_v2, %s2958_s13  ;;  %826 = vrot.lane.b32.xlu1 %v820_v3, %s2959_s8  ;;  %v3392_v2 = vstv %s2701_s11  ;;  %s2723_s11 = sld [smem:[#allocation7 + $0x44]] }
 0x2e4   : > { %v1517_v4 = vmul.f32 %v3392_v2, %v3180_v0 }
 0x2e7   : > { %1130 = vrot.lane.b32.xlu0 %v1124_v10, %s2959_s8  ;;  %830 = vrot.lane.b32.xlu1 %v822_v12, %s2959_s8  ;;  %v1561_v10 = vmul.f32 %v3401_v6, %v3180_v0  ;;  %v1340_v12 = vmul.f32 %v1339_v44, %v3175_v61 }
 0x2eb   : > { %1134 = vrot.lane.b32.xlu0 %v1126_v15, %s2959_s8  ;;  %870 = vrot.lane.b32.xlu1 %v864_v16, %s2960_s16  ;;  %v3410_v15 = vstv %s2707_s17  ;;  %s2725_s17 = sld [smem:[#allocation7 + $0x4b]] }
 0x2ec   : > { %v1644_v20 = vmul.f32 %v3410_v15, %v3175_v61 }
 0x2ef   : > { %1174 = vrot.lane.b32.xlu0 %v1168_v24, %s2960_s16  ;;  %874 = vrot.lane.b32.xlu1 %v866_v25, %s2960_s16  ;;  %v1646_v24 = vmul.f32 %v3410_v15, %v3183_v1  ;;  %v1384_v25 = vmul.f32 %v1383_v48, %v3175_v61 }
 0x2f3   : > { %1178 = vrot.lane.b32.xlu0 %v1170_v28, %s2960_s16  ;;  %914 = vrot.lane.b32.xlu1 %v908_v29, %s2961_s25  ;;  %v3430_v28 = vstv %s2709_s30  ;;  %s2739_s30 = sld [smem:[#allocation7 + $0x4c]] }
 0x2f4   : > { %v1690_v39 = vmul.f32 %v3430_v28, %v3183_v1 }
 0x2f7   : > { %1218 = vrot.lane.b32.xlu0 %v1212_v30, %s2961_s25  ;;  %918 = vrot.lane.b32.xlu1 %v910_v32, %s2961_s25  ;;  %v1688_v30 = vmul.f32 %v3430_v28, %v3175_v61  ;;  %v1386_v32 = vmul.f32 %v1383_v48, %v3183_v1 }
 0x2f9   : > { %v3573_v33 = vstv %s2739_s30  ;;  %s2745_s30 = sld [smem:[#allocation7 + $0x61]] }
 0x2fa   : > { %v2341_v27 = vmul.f32 %v3573_v33, %v3180_v0 }
 0x2fb   : > { %1222 = vrot.lane.b32.xlu0 %v1214_v36, %s2961_s25  ;;  %958 = vrot.lane.b32.xlu1 %v952_v37, %s2962_s24 }
 0x2ff   : > { %1262 = vrot.lane.b32.xlu0 %v1256_v40, %s2962_s24  ;;  %962 = vrot.lane.b32.xlu1 %v954_v35, %s2962_s24  ;;  %v1428_v40 = vmul.f32 %v1427_v54, %v3175_v61  ;;  %v3450_v35 = vstv %s2711_s10  ;;  %s2727_s10 = sld [smem:[#allocation7 + $0x52]]  ;;  %v3689_v26 = vstv %s2745_s30 }
 0x300   : > { %v1732_v44 = vmul.f32 %v3450_v35, %v3175_v61  ;;  %5338 = vst [vmem:[#allocation55_spill] sm:$0xff] %v3689_v26  ;;  %s2666_s30 = sld [smem:[#allocation7 + $0xf]] }
 0x303   : > { %1266 = vrot.lane.b32.xlu0 %v1258_v42, %s2962_s24  ;;  %1044 = vrot.lane.b32.xlu1 %v1037_v43, %s2957_s12 }
 0x307   : > { %1348 = vrot.lane.b32.xlu0 %v1341_v47, %s2957_s12  ;;  %1088 = vrot.lane.b32.xlu1 %v1081_v38, %s2958_s13  ;;  %v1430_v47 = vmul.f32 %v1427_v54, %v3183_v1 }
 0x30b   : > { %1392 = vrot.lane.b32.xlu0 %v1385_v53, %s2958_s13  ;;  %1132 = vrot.lane.b32.xlu1 %v1125_v41, %s2959_s8  ;;  %v1734_v53 = vmul.f32 %v3450_v35, %v3183_v1  ;;  %v1472_v41 = vmul.f32 %v3385_v56, %v3175_v61 }
 0x30f   : > { %1436 = vrot.lane.b32.xlu0 %v1429_v55, %s2959_s8  ;;  %1176 = vrot.lane.b32.xlu1 %v1169_v49, %s2960_s16  ;;  %v3471_v55 = vstv %s2713_s23  ;;  %s2715_s23 = sld [smem:[#allocation7 + $0x58]] }
 0x310   : > { %v1777_v34 = vmul.f32 %v3471_v55, %v3180_v0 }
 0x313   : > { %1480 = vrot.lane.b32.xlu0 %v1473_v57, %s2960_s16  ;;  %1220 = vrot.lane.b32.xlu1 %v1213_v58, %s2961_s25  ;;  %v1776_v57 = vmul.f32 %v3471_v55, %v3175_v61  ;;  %v1474_v58 = vmul.f32 %v3385_v56, %v3183_v1  ;;  %v3495_v56 = vstv %s2721_s20  ;;  %s2741_s20 = sld [smem:[#allocation7 + $0x53]] }
 0x314   : > { %v1948_v18 = vmul.f32 %v3495_v56, %v3175_v61 }
 0x315   : > { %v3394_v3 = vpop.permute.xlu1 %465 }
 0x317   : > { %1524 = vrot.lane.b32.xlu0 %v1517_v4, %s2961_s25  ;;  %1264 = vrot.lane.b32.xlu1 %v1257_v5, %s2962_s24 }
 0x319   : > { %v3403_v7 = vpop.permute.xlu0 %467  ;;  %v3405_v9 = vpop.permute.xlu1 %469 }
 0x31b   : > { %1568 = vrot.lane.b32.xlu0 %v1561_v10, %s2962_s24  ;;  %1346 = vrot.lane.b32.xlu1 %v1340_v12, %s2957_s12  ;;  %v1778_v10 = vmul.f32 %v3471_v55, %v3183_v1  ;;  %v1516_v12 = vmul.f32 %v3392_v2, %v3175_v61 }
 0x31d   : > { %v3414_v16 = vpop.permute.xlu0 %508  ;;  %v3416_v17 = vpop.permute.xlu1 %506 }
 0x31f   : > { %1650 = vrot.lane.b32.xlu0 %v1644_v20, %s2957_s12  ;;  %1350 = vrot.lane.b32.xlu1 %v1342_v21, %s2957_s12 }
 0x321   : > { %v3423_v22 = vpop.permute.xlu0 %549  ;;  %v3425_v23 = vpop.permute.xlu1 %510 }
 0x323   : > { %1654 = vrot.lane.b32.xlu0 %v1646_v24, %s2957_s12  ;;  %1390 = vrot.lane.b32.xlu1 %v1384_v25, %s2958_s13  ;;  %v1949_v24 = vmul.f32 %v3495_v56, %v3180_v0  ;;  %v1518_v25 = vmul.f32 %v3392_v2, %v3183_v1 }
 0x325   : > { %v3434_v29 = vpop.permute.xlu0 %590  ;;  %v3436_v31 = vpop.permute.xlu1 %547 }
 0x327   : > { %1694 = vrot.lane.b32.xlu0 %v1688_v30, %s2958_s13  ;;  %1394 = vrot.lane.b32.xlu1 %v1386_v32, %s2958_s13  ;;  %v3505_v30 = vstv %s2735_s5  ;;  %s2729_s5 = sld [smem:[#allocation7 + $0x59]] }
 0x329   : > { %v3443_v36 = vpop.permute.xlu0 %631  ;;  %v3445_v37 = vpop.permute.xlu1 %551 }
 0x32b   : > { %1698 = vrot.lane.b32.xlu0 %v1690_v39, %s2958_s13  ;;  %1434 = vrot.lane.b32.xlu1 %v1428_v40, %s2959_s8  ;;  %v2252_v40 = vmul.f32 %v3505_v30, %v3175_v61 }
 0x32d   : > { %v3454_v42 = vpop.permute.xlu0 %672  ;;  %v3456_v43 = vpop.permute.xlu1 %588 }
 0x32f   : > { %1738 = vrot.lane.b32.xlu0 %v1732_v44, %s2959_s8  ;;  %1438 = vrot.lane.b32.xlu1 %v1430_v47, %s2959_s8  ;;  %v1560_v44 = vmul.f32 %v3401_v6, %v3175_v61 }
 0x331   : > { %v3463_v38 = vpop.permute.xlu0 %740  ;;  %v3465_v48 = vpop.permute.xlu1 %592 }
 0x332   : > { %5308 = vst [vmem:[#allocation25_spill] sm:$0xff] %v3463_v38 }
 0x333   : > { %1742 = vrot.lane.b32.xlu0 %v1734_v53, %s2959_s8  ;;  %1478 = vrot.lane.b32.xlu1 %v1472_v41, %s2960_s16  ;;  %v2254_v53 = vmul.f32 %v3505_v30, %v3183_v1  ;;  %v1562_v41 = vmul.f32 %v3401_v6, %v3183_v1 }
 0x335   : > { %v3475_v54 = vpop.permute.xlu0 %784  ;;  %v3477_v49 = vpop.permute.xlu1 %629 }
 0x336   : > { %5309 = vst [vmem:[#allocation26_spill] sm:$0xff] %v3475_v54 }
 0x337   : > { %1782 = vrot.lane.b32.xlu0 %v1776_v57, %s2960_s16  ;;  %1482 = vrot.lane.b32.xlu1 %v1474_v58, %s2960_s16  ;;  %v3529_v57 = vstv %s2723_s11  ;;  %s2717_s11 = sld [smem:[#allocation7 + $0x5f]] }
 0x339   : > { %v3485_v4 = vpop.permute.xlu0 %828  ;;  %v3487_v5 = vpop.permute.xlu1 %633 }
 0x33a   : > { %5310 = vst [vmem:[#allocation27_spill] sm:$0xff] %v3485_v4  ;;  %v1994_v4 = vmul.f32 %v3529_v57, %v3183_v1 }
 0x33b   : > { %1786 = vrot.lane.b32.xlu0 %v1778_v10, %s2960_s16  ;;  %1522 = vrot.lane.b32.xlu1 %v1516_v12, %s2961_s25  ;;  %v1993_v12 = vmul.f32 %v3529_v57, %v3180_v0 }
 0x33d   : > { %v3497_v20 = vpop.permute.xlu0 %872  ;;  %v3499_v21 = vpop.permute.xlu1 %670 }
 0x33e   : > { %5311 = vst [vmem:[#allocation28_spill] sm:$0xff] %v3497_v20 }
 0x33f   : > { %1956 = vrot.lane.b32.xlu0 %v1949_v24, %s2957_s12  ;;  %1526 = vrot.lane.b32.xlu1 %v1518_v25, %s2961_s25  ;;  %v1645_v24 = vmul.f32 %v3410_v15, %v3180_v0  ;;  %v3539_v25 = vstv %s2737_s15  ;;  %s2743_s15 = sld [smem:[#allocation7 + $0x5a]] }
 0x340   : > { %v2297_v54 = vmul.f32 %v3539_v25, %v3180_v0 }
 0x341   : > { %v3509_v32 = vpop.permute.xlu0 %916  ;;  %v3511_v39 = vpop.permute.xlu1 %674 }
 0x342   : > { %5312 = vst [vmem:[#allocation29_spill] sm:$0xff] %v3509_v32  ;;  %v3597_v32 = vstv %s2727_s10  ;;  %s2652_s10 = sld [smem:[#allocation7 + $0xe]] }
 0x343   : > { %2258 = vrot.lane.b32.xlu0 %v2252_v40, %s2957_s12  ;;  %1566 = vrot.lane.b32.xlu1 %v1560_v44, %s2962_s24  ;;  %v2296_v44 = vmul.f32 %v3539_v25, %v3175_v61 }
 0x345   : > { %v3519_v2 = vpop.permute.xlu0 %960  ;;  %v3521_v47 = vpop.permute.xlu1 %738 }
 0x346   : > { %5313 = vst [vmem:[#allocation30_spill] sm:$0xff] %v3519_v2  ;;  %5314 = vst [vmem:[#allocation31_spill] sm:$0xff] %v3521_v47  ;;  %v1950_v2 = vmul.f32 %v3495_v56, %v3183_v1  ;;  %v3609_v56 = vstv %s2715_s23  ;;  %s2654_s23 = sld [smem:[#allocation7 + $0x15]] }
 0x347   : > { %2262 = vrot.lane.b32.xlu0 %v2254_v53, %s2957_s12  ;;  %1570 = vrot.lane.b32.xlu1 %v1562_v41, %s2962_s24  ;;  %v1689_v53 = vmul.f32 %v3430_v28, %v3180_v0  ;;  %v3563_v28 = vstv %s2725_s17  ;;  %v1821_v20 = vmul.f32 %v3609_v56, %v3180_v0  ;;  %s2731_s17 = sld [smem:[#allocation7 + $0x60]] }
 0x348   : > { %v2036_v38 = vmul.f32 %v3563_v28, %v3175_v61  ;;  %v2038_v62 = vmul.f32 %v3563_v28, %v3183_v1 }
 0x349   : > { %v3531_v58 = vpop.permute.xlu0 %1042  ;;  %v3533_v10 = vpop.permute.xlu1 %742 }
 0x34a   : > { %5315 = vst [vmem:[#allocation32_spill] sm:$0xff] %v3533_v10 }
 0x34b   : > { %2000 = vrot.lane.b32.xlu0 %v1993_v12, %s2958_s13  ;;  %1652 = vrot.lane.b32.xlu1 %v1645_v24, %s2957_s12  ;;  %v2298_v12 = vmul.f32 %v3539_v25, %v3183_v1  ;;  %v1733_v24 = vmul.f32 %v3450_v35, %v3180_v0  ;;  %v3657_v25 = vstv %s2743_s15  ;;  %s2664_s15 = sld [smem:[#allocation7 + $0x8]] }
 0x34d   : > { %v3543_v6 = vpop.permute.xlu0 %1046  ;;  %v3545_v40 = vpop.permute.xlu1 %782 }
 0x34e   : > { %5316 = vst [vmem:[#allocation33_spill] sm:$0xff] %v3545_v40  ;;  %v1992_v40 = vmul.f32 %v3529_v57, %v3175_v61  ;;  %v3645_v57 = vstv %s2717_s11  ;;  %s2660_s11 = sld [smem:[#allocation7 + $0x2a]] }
 0x34f   : > { %2302 = vrot.lane.b32.xlu0 %v2296_v44, %s2958_s13  ;;  %1696 = vrot.lane.b32.xlu1 %v1689_v53, %s2958_s13  ;;  %v2037_v53 = vmul.f32 %v3563_v28, %v3180_v0 }
 0x351   : > { %v3553_v15 = vpop.permute.xlu0 %1086  ;;  %v3555_v41 = vpop.permute.xlu1 %786 }
 0x352   : > { %5317 = vst [vmem:[#allocation34_spill] sm:$0xff] %v3555_v41 }
 0x353   : > { %2306 = vrot.lane.b32.xlu0 %v2298_v12, %s2958_s13  ;;  %1740 = vrot.lane.b32.xlu1 %v1733_v24, %s2959_s8  ;;  %v2340_v24 = vmul.f32 %v3573_v33, %v3175_v61 }
 0x355   : > { %v3565_v11 = vpop.permute.xlu0 %1090  ;;  %v3567_v44 = vpop.permute.xlu1 %826 }
 0x356   : > { %5318 = vst [vmem:[#allocation35_spill] sm:$0xff] %v3565_v11  ;;  %5319 = vst [vmem:[#allocation36_spill] sm:$0xff] %v3567_v44  ;;  %v2253_v44 = vmul.f32 %v3505_v30, %v3180_v0  ;;  %v3621_v30 = vstv %s2741_s20  ;;  %s2656_s20 = sld [smem:[#allocation7 + $0x1c]] }
 0x357   : > { %2044 = vrot.lane.b32.xlu0 %v2037_v53, %s2959_s8  ;;  %1784 = vrot.lane.b32.xlu1 %v1777_v34, %s2960_s16  ;;  %v2342_v34 = vmul.f32 %v3573_v33, %v3183_v1 }
 0x359   : > { %v3577_v35 = vpop.permute.xlu0 %1130  ;;  %v3579_v12 = vpop.permute.xlu1 %830 }
 0x35a   : > { %5320 = vst [vmem:[#allocation37_spill] sm:$0xff] %v3577_v35  ;;  %5321 = vst [vmem:[#allocation38_spill] sm:$0xff] %v3579_v12 }
 0x35b   : > { %2346 = vrot.lane.b32.xlu0 %v2340_v24, %s2959_s8  ;;  %1954 = vrot.lane.b32.xlu1 %v1948_v18, %s2957_s12 }
 0x35d   : > { %v3587_v55 = vpop.permute.xlu0 %1134  ;;  %v3589_v53 = vpop.permute.xlu1 %870 }
 0x35e   : > { %5322 = vst [vmem:[#allocation39_spill] sm:$0xff] %v3587_v55  ;;  %5323 = vst [vmem:[#allocation40_spill] sm:$0xff] %v3589_v53  ;;  %v2081_v53 = vmul.f32 %v3597_v32, %v3180_v0 }
 0x35f   : > { %2350 = vrot.lane.b32.xlu0 %v2342_v34, %s2959_s8  ;;  %1958 = vrot.lane.b32.xlu1 %v1950_v2, %s2957_s12 }
 0x361   : > { %v3599_v24 = vpop.permute.xlu0 %1174  ;;  %v3601_v18 = vpop.permute.xlu1 %874 }
 0x362   : > { %5324 = vst [vmem:[#allocation41_spill] sm:$0xff] %v3599_v24  ;;  %5325 = vst [vmem:[#allocation42_spill] sm:$0xff] %v3601_v18  ;;  %v1822_v18 = vmul.f32 %v3609_v56, %v3183_v1 }
 0x363   : > { %2088 = vrot.lane.b32.xlu0 %v2081_v53, %s2960_s16  ;;  %2260 = vrot.lane.b32.xlu1 %v2253_v44, %s2957_s12 }
 0x365   : > { %v3611_v2 = vpop.permute.xlu0 %1178  ;;  %v3613_v34 = vpop.permute.xlu1 %914 }
 0x366   : > { %5326 = vst [vmem:[#allocation43_spill] sm:$0xff] %v3611_v2  ;;  %5327 = vst [vmem:[#allocation44_spill] sm:$0xff] %v3613_v34  ;;  %v2385_v34 = vmul.f32 %v3621_v30, %v3180_v0 }
 0x367   : > { %1828 = vrot.lane.b32.xlu0 %v1821_v20, %s2961_s25  ;;  %1998 = vrot.lane.b32.xlu1 %v1992_v40, %s2958_s13  ;;  %v3633_v20 = vstv %s2729_s5  ;;  %s2658_s5 = sld [smem:[#allocation7 + $0x23]] }
 0x368   : > { %v2125_v60 = vmul.f32 %v3633_v20, %v3180_v0 }
 0x369   : > { %v3623_v44 = vpop.permute.xlu0 %1218  ;;  %v3625_v53 = vpop.permute.xlu1 %918 }
 0x36a   : > { %5328 = vst [vmem:[#allocation45_spill] sm:$0xff] %v3623_v44  ;;  %5329 = vst [vmem:[#allocation46_spill] sm:$0xff] %v3625_v53  ;;  %v3703_v53 = vstv %s2652_s10  ;;  %v1864_v44 = vmul.f32 %v3645_v57, %v3175_v61  ;;  %s2668_s10 = sld [smem:[#allocation7 + $0x16]] }
 0x36b   : > { %2392 = vrot.lane.b32.xlu0 %v2385_v34, %s2960_s16  ;;  %2002 = vrot.lane.b32.xlu1 %v1994_v4, %s2958_s13 }
 0x36d   : > { %v3635_v40 = vpop.permute.xlu0 %1222  ;;  %v3637_v47 = vpop.permute.xlu1 %958 }
 0x36e   : > { %5330 = vst [vmem:[#allocation47_spill] sm:$0xff] %v3635_v40  ;;  %5331 = vst [vmem:[#allocation48_spill] sm:$0xff] %v3637_v47  ;;  %v1865_v47 = vmul.f32 %v3645_v57, %v3180_v0  ;;  %v2124_v40 = vmul.f32 %v3633_v20, %v3175_v61 }
 0x36f   : > { %2132 = vrot.lane.b32.xlu0 %v2125_v60, %s2961_s25  ;;  %2304 = vrot.lane.b32.xlu1 %v2297_v54, %s2958_s13 }
 0x371   : > { %v3647_v4 = vpop.permute.xlu0 %1262  ;;  %v3649_v34 = vpop.permute.xlu1 %962 }
 0x372   : > { %5332 = vst [vmem:[#allocation49_spill] sm:$0xff] %v3647_v4  ;;  %5333 = vst [vmem:[#allocation50_spill] sm:$0xff] %v3649_v34  ;;  %v2429_v4 = vmul.f32 %v3657_v25, %v3180_v0  ;;  %v3667_v34 = vstv %s2731_s17  ;;  %s2650_s17 = sld [smem:[#allocation7 + $0x7]] }
 0x373   : > { %1872 = vrot.lane.b32.xlu0 %v1865_v47, %s2962_s24  ;;  %2042 = vrot.lane.b32.xlu1 %v2036_v38, %s2959_s8 }
 0x375   : > { %v3659_v60 = vpop.permute.xlu0 %1266  ;;  %v3661_v54 = vpop.permute.xlu1 %1044 }
 0x376   : > { %5334 = vst [vmem:[#allocation51_spill] sm:$0xff] %v3659_v60  ;;  %v2168_v60 = vmul.f32 %v3667_v34, %v3175_v61 }
 0x377   : > { %2436 = vrot.lane.b32.xlu0 %v2429_v4, %s2961_s25  ;;  %2046 = vrot.lane.b32.xlu1 %v2038_v62, %s2959_s8  ;;  %v2170_v62 = vmul.f32 %v3667_v34, %v3183_v1 }
 0x379   : > { %v3671_v38 = vpop.permute.xlu0 %1348  ;;  %v3673_v47 = vpop.permute.xlu1 %1088 }
 0x37a   : > { %5335 = vst [vmem:[#allocation52_spill] sm:$0xff] %v3671_v38  ;;  %v2080_v38 = vmul.f32 %v3597_v32, %v3175_v61 }
 0x37b   : > { %2174 = vrot.lane.b32.xlu0 %v2168_v60, %s2962_s24  ;;  %2348 = vrot.lane.b32.xlu1 %v2341_v27, %s2959_s8  ;;  %v2472_v60 = vmul.f32 %v3689_v26, %v3175_v61  ;;  %v1820_v26 = vmul.f32 %v3609_v56, %v3175_v61 }
 0x37d   : > { %v3681_v28 = vpop.permute.xlu0 %1392  ;;  %v3683_v4 = vpop.permute.xlu1 %1132 }
 0x37e   : > { %5336 = vst [vmem:[#allocation53_spill] sm:$0xff] %v3681_v28  ;;  %5337 = vst [vmem:[#allocation54_spill] sm:$0xff] %v3683_v4  ;;  %v2082_v28 = vmul.f32 %v3597_v32, %v3183_v1  ;;  %v3715_v32 = vsel %vm386_vm1, %v3252_v45, 0.0  ;;  %v3729_v45 = vstv %s2654_s23  ;;  %s2670_s23 = sld [smem:[#allocation7 + $0x1d]] }
 0x37f   : > { %2178 = vrot.lane.b32.xlu0 %v2170_v62, %s2962_s24  ;;  %2086 = vrot.lane.b32.xlu1 %v2080_v38, %s2960_s16 }
 0x381   : > { %v3693_v33 = vpop.permute.xlu0 %1436  ;;  %v3695_v27 = vpop.permute.xlu1 %1176 }
 0x382   : > { %5339 = vst [vmem:[#allocation56_spill] sm:$0xff] %v3693_v33  ;;  %5340 = vst [vmem:[#allocation57_spill] sm:$0xff] %v3695_v27  ;;  %v479_v33 = vmul.f32 %v3703_v53, %v3255_v46 }
 0x383   : > { %2478 = vrot.lane.b32.xlu0 %v2472_v60, %s2962_s24  ;;  %2090 = vrot.lane.b32.xlu1 %v2082_v28, %s2960_s16 }
 0x385   : > { %v3705_v62 = vpop.permute.xlu0 %1480  ;;  %v3707_v38 = vpop.permute.xlu1 %1220 }
 0x386   : > { %5341 = vst [vmem:[#allocation58_spill] sm:$0xff] %v3705_v62  ;;  %5342 = vst [vmem:[#allocation59_spill] sm:$0xff] %v3707_v38  ;;  %v481_v62 = vmul.f32 %v3703_v53, %v3715_v32  ;;  %v753_v38 = vstv %s2666_s30  ;;  %s2684_s30 = sld [smem:[#allocation7 + $0x1e]] }
 0x387   : > { %485 = vrot.lane.b32.xlu0 %v479_v33, %s2958_s13  ;;  %1826 = vrot.lane.b32.xlu1 %v1820_v26, %s2961_s25 }
 0x389   : > { %v3719_v28 = vpop.permute.xlu0 %1524  ;;  %v3721_v60 = vpop.permute.xlu1 %1264 }
 0x38a   : > { %5343 = vst [vmem:[#allocation60_spill] sm:$0xff] %v3719_v28  ;;  %5344 = vst [vmem:[#allocation61_spill] sm:$0xff] %v3721_v60  ;;  %v520_v60 = vmul.f32 %v3729_v45, %v3255_v46  ;;  %v2384_v28 = vmul.f32 %v3621_v30, %v3175_v61 }
 0x38b   : > { %489 = vrot.lane.b32.xlu0 %v481_v62, %s2958_s13  ;;  %1830 = vrot.lane.b32.xlu1 %v1822_v18, %s2961_s25  ;;  %v522_v62 = vmul.f32 %v3729_v45, %v3715_v32 }
 0x38d   : > { %v3731_v33 = vpop.permute.xlu0 %1568  ;;  %v3733_v26 = vpop.permute.xlu1 %1346 }
 0x38e   : > { %5345 = vst [vmem:[#allocation62_spill] sm:$0xff] %v3731_v33  ;;  %5346 = vst [vmem:[#allocation63_spill] sm:$0xff] %v3733_v26  ;;  %v2386_v33 = vmul.f32 %v3621_v30, %v3183_v1  ;;  %v3751_v26 = vstv %s2656_s20  ;;  %s2672_s20 = sld [smem:[#allocation7 + $0x24]] }
 0x38f   : > { %526 = vrot.lane.b32.xlu0 %v520_v60, %s2959_s8  ;;  %2390 = vrot.lane.b32.xlu1 %v2384_v28, %s2960_s16 }
 0x391   : > { %v3741_v56 = vpop.permute.xlu0 %1650  ;;  %v3743_v18 = vpop.permute.xlu1 %1350 }
 0x392   : > { %5347 = vst [vmem:[#allocation64_spill] sm:$0xff] %v3741_v56  ;;  %5348 = vst [vmem:[#allocation65_spill] sm:$0xff] %v3743_v18  ;;  %v561_v56 = vmul.f32 %v3751_v26, %v3255_v46 }
 0x393   : > { %530 = vrot.lane.b32.xlu0 %v522_v62, %s2959_s8  ;;  %2394 = vrot.lane.b32.xlu1 %v2386_v33, %s2960_s16  ;;  %v563_v62 = vmul.f32 %v3751_v26, %v3715_v32 }
 0x395   : > { %v3753_v60 = vpop.permute.xlu0 %1654  ;;  %v3755_v28 = vpop.permute.xlu1 %1390 }
 0x396   : > { %5349 = vst [vmem:[#allocation66_spill] sm:$0xff] %v3753_v60  ;;  %5350 = vst [vmem:[#allocation67_spill] sm:$0xff] %v3755_v28  ;;  %v2126_v60 = vmul.f32 %v3633_v20, %v3183_v1  ;;  %v3773_v28 = vstv %s2658_s5  ;;  %s2674_s5 = sld [smem:[#allocation7 + $0x2b]] }
 0x397   : > { %567 = vrot.lane.b32.xlu0 %v561_v56, %s2960_s16  ;;  %2130 = vrot.lane.b32.xlu1 %v2124_v40, %s2961_s25 }
 0x399   : > { %v3763_v30 = vpop.permute.xlu0 %1694  ;;  %v3765_v33 = vpop.permute.xlu1 %1394 }
 0x39a   : > { %5351 = vst [vmem:[#allocation68_spill] sm:$0xff] %v3763_v30  ;;  %5352 = vst [vmem:[#allocation69_spill] sm:$0xff] %v3765_v33  ;;  %v602_v30 = vmul.f32 %v3773_v28, %v3255_v46 }
 0x39b   : > { %571 = vrot.lane.b32.xlu0 %v563_v62, %s2960_s16  ;;  %2134 = vrot.lane.b32.xlu1 %v2126_v60, %s2961_s25  ;;  %v604_v62 = vmul.f32 %v3773_v28, %v3715_v32 }
 0x39d   : > { %v3775_v56 = vpop.permute.xlu0 %1698  ;;  %v3777_v40 = vpop.permute.xlu1 %1434 }
 0x39e   : > { %5353 = vst [vmem:[#allocation70_spill] sm:$0xff] %v3775_v56  ;;  %5354 = vst [vmem:[#allocation71_spill] sm:$0xff] %v3777_v40  ;;  %v1866_v56 = vmul.f32 %v3645_v57, %v3183_v1  ;;  %v3795_v40 = vstv %s2660_s11  ;;  %s2678_s11 = sld [smem:[#allocation7 + $0x9]] }
 0x39f   : > { %608 = vrot.lane.b32.xlu0 %v602_v30, %s2961_s25  ;;  %1870 = vrot.lane.b32.xlu1 %v1864_v44, %s2962_s24 }
 0x3a1   : > { %v3785_v20 = vpop.permute.xlu0 %1738  ;;  %v3787_v60 = vpop.permute.xlu1 %1438 }
 0x3a2   : > { %5355 = vst [vmem:[#allocation72_spill] sm:$0xff] %v3785_v20  ;;  %5356 = vst [vmem:[#allocation73_spill] sm:$0xff] %v3787_v60  ;;  %v643_v20 = vmul.f32 %v3795_v40, %v3255_v46  ;;  %v2428_v60 = vmul.f32 %v3657_v25, %v3175_v61 }
 0x3a3   : > { %612 = vrot.lane.b32.xlu0 %v604_v62, %s2961_s25  ;;  %1874 = vrot.lane.b32.xlu1 %v1866_v56, %s2962_s24  ;;  %v645_v62 = vmul.f32 %v3795_v40, %v3715_v32 }
 0x3a5   : > { %v3797_v30 = vpop.permute.xlu0 %1742  ;;  %v3799_v44 = vpop.permute.xlu1 %1478 }
 0x3a6   : > { %5357 = vst [vmem:[#allocation74_spill] sm:$0xff] %v3797_v30  ;;  %5358 = vst [vmem:[#allocation75_spill] sm:$0xff] %v3799_v44  ;;  %v2430_v30 = vmul.f32 %v3657_v25, %v3183_v1  ;;  %v3817_v44 = vstv %s2664_s15  ;;  %v437_v25 = vstv %s2650_s17  ;;  %s2680_s15 = sld [smem:[#allocation7 + $0x10]] }
 0x3a7   : > { %649 = vrot.lane.b32.xlu0 %v643_v20, %s2962_s24  ;;  %2434 = vrot.lane.b32.xlu1 %v2428_v60, %s2961_s25  ;;  %s2682_s17 = sld [smem:[#allocation7 + $0x17]] }
 0x3a9   : > { %v3807_v57 = vpop.permute.xlu0 %1782  ;;  %v3809_v56 = vpop.permute.xlu1 %1482 }
 0x3aa   : > { %5359 = vst [vmem:[#allocation76_spill] sm:$0xff] %v3807_v57  ;;  %5360 = vst [vmem:[#allocation77_spill] sm:$0xff] %v3809_v56  ;;  %v710_v57 = vmul.f32 %v3817_v44, %v3255_v46  ;;  %v2169_v56 = vmul.f32 %v3667_v34, %v3180_v0 }
 0x3ab   : > { %653 = vrot.lane.b32.xlu0 %v645_v62, %s2962_s24  ;;  %2438 = vrot.lane.b32.xlu1 %v2430_v30, %s2961_s25 }
 0x3ad   : > { %v3819_v20 = vpop.permute.xlu0 %1786  ;;  %v3821_v60 = vpop.permute.xlu1 %1522 }
 0x3ae   : > { %5361 = vst [vmem:[#allocation78_spill] sm:$0xff] %v3819_v20  ;;  %5362 = vst [vmem:[#allocation79_spill] sm:$0xff] %v3821_v60  ;;  %v712_v20 = vmul.f32 %v3817_v44, %v3715_v32  ;;  %v438_v60 = vmul.f32 %v437_v25, %v3255_v46 }
 0x3af   : > { %716 = vrot.lane.b32.xlu0 %v710_v57, %s2957_s12  ;;  %2176 = vrot.lane.b32.xlu1 %v2169_v56, %s2962_s24  ;;  %v754_v56 = vmul.f32 %v753_v38, %v3255_v46 }
 0x3b1   : > { %v3829_v62 = vpop.permute.xlu0 %1956  ;;  %v3831_v30 = vpop.permute.xlu1 %1526 }
 0x3b2   : > { %5363 = vst [vmem:[#allocation80_spill] sm:$0xff] %v3829_v62  ;;  %5364 = vst [vmem:[#allocation81_spill] sm:$0xff] %v3831_v30  ;;  %v439_v62 = vmul.f32 %v437_v25, %v3264_v50 }
 0x3b3   : > { %720 = vrot.lane.b32.xlu0 %v712_v20, %s2957_s12  ;;  %444 = vrot.lane.b32.xlu1 %v438_v60, %s2957_s12  ;;  %v756_v20 = vmul.f32 %v753_v38, %v3715_v32  ;;  %v440_v60 = vmul.f32 %v437_v25, %v3715_v32 }
 0x3b5   : > { %v3838_v34 = vpop.permute.xlu0 %2258  ;;  %v3840_v57 = vpop.permute.xlu1 %1566 }
 0x3b6   : > { %5365 = vst [vmem:[#allocation82_spill] sm:$0xff] %v3838_v34  ;;  %5366 = vst [vmem:[#allocation83_spill] sm:$0xff] %v3840_v57  ;;  %v797_v57 = vstv %s2668_s10  ;;  %s2686_s10 = sld [smem:[#allocation7 + $0x25]] }
 0x3b7   : > { %760 = vrot.lane.b32.xlu0 %v754_v56, %s2958_s13  ;;  %446 = vrot.lane.b32.xlu1 %v439_v62, %s2957_s12  ;;  %v798_v62 = vmul.f32 %v797_v57, %v3255_v46  ;;  %v480_v56 = vmul.f32 %v3703_v53, %v3264_v50 }
 0x3b9   : > { %v3846_v30 = vpop.permute.xlu0 %2262  ;;  %v3848_v33 = vpop.permute.xlu1 %1570 }
 0x3ba   : > { %5367 = vst [vmem:[#allocation84_spill] sm:$0xff] %v3846_v30  ;;  %5368 = vst [vmem:[#allocation85_spill] sm:$0xff] %v3848_v33  ;;  %v841_v30 = vstv %s2670_s23  ;;  %s2688_s23 = sld [smem:[#allocation7 + $0x2c]] }
 0x3bb   : > { %764 = vrot.lane.b32.xlu0 %v756_v20, %s2958_s13  ;;  %448 = vrot.lane.b32.xlu1 %v440_v60, %s2957_s12  ;;  %v800_v60 = vmul.f32 %v797_v57, %v3715_v32 }
 0x3bd   : > { %v3854_v34 = vpop.permute.xlu0 %2000  ;;  %v3856_v12 = vpop.permute.xlu1 %1652 }
 0x3be   : > { %5369 = vst [vmem:[#allocation86_spill] sm:$0xff] %v3854_v34  ;;  %5370 = vst [vmem:[#allocation87_spill] sm:$0xff] %v3856_v12  ;;  %v521_v34 = vmul.f32 %v3729_v45, %v3264_v50 }
 0x3bf   : > { %804 = vrot.lane.b32.xlu0 %v798_v62, %s2959_s8  ;;  %487 = vrot.lane.b32.xlu1 %v480_v56, %s2958_s13  ;;  %v842_v56 = vmul.f32 %v841_v30, %v3255_v46 }
 0x3c1   : > { %v3863_v25 = vpop.permute.xlu0 %2302  ;;  %v3865_v20 = vpop.permute.xlu1 %1696 }
 0x3c2   : > { %5371 = vst [vmem:[#allocation88_spill] sm:$0xff] %v3863_v25  ;;  %5372 = vst [vmem:[#allocation89_spill] sm:$0xff] %v3865_v20  ;;  %v562_v25 = vmul.f32 %v3751_v26, %v3264_v50 }
 0x3c3   : > { %808 = vrot.lane.b32.xlu0 %v800_v60, %s2959_s8  ;;  %528 = vrot.lane.b32.xlu1 %v521_v34, %s2959_s8  ;;  %v844_v34 = vmul.f32 %v841_v30, %v3715_v32 }
 0x3c5   : > { %v3872_v53 = vpop.permute.xlu0 %2306  ;;  %v3874_v62 = vpop.permute.xlu1 %1740 }
 0x3c6   : > { %5373 = vst [vmem:[#allocation90_spill] sm:$0xff] %v3872_v53  ;;  %5374 = vst [vmem:[#allocation91_spill] sm:$0xff] %v3874_v62  ;;  %v603_v53 = vmul.f32 %v3773_v28, %v3264_v50  ;;  %v885_v62 = vstv %s2672_s20  ;;  %s2692_s20 = sld [smem:[#allocation7 + $0xa]] }
 0x3c7   : > { %848 = vrot.lane.b32.xlu0 %v842_v56, %s2960_s16  ;;  %569 = vrot.lane.b32.xlu1 %v562_v25, %s2960_s16  ;;  %v886_v25 = vmul.f32 %v885_v62, %v3255_v46 }
 0x3c9   : > { %v3881_v45 = vpop.permute.xlu0 %2044  ;;  %v3883_v60 = vpop.permute.xlu1 %1784 }
 0x3ca   : > { %5375 = vst [vmem:[#allocation92_spill] sm:$0xff] %v3881_v45  ;;  %5376 = vst [vmem:[#allocation93_spill] sm:$0xff] %v3883_v60  ;;  %v644_v45 = vmul.f32 %v3795_v40, %v3264_v50  ;;  %v929_v60 = vstv %s2674_s5  ;;  %s2694_s5 = sld [smem:[#allocation7 + $0x11]] }
 0x3cb   : > { %852 = vrot.lane.b32.xlu0 %v844_v34, %s2960_s16  ;;  %610 = vrot.lane.b32.xlu1 %v603_v53, %s2961_s25  ;;  %v888_v53 = vmul.f32 %v885_v62, %v3715_v32 }
 0x3cd   : > { %v3890_v26 = vpop.permute.xlu0 %2346  ;;  %v3892_v56 = vpop.permute.xlu1 %1954 }
 0x3ce   : > { %5377 = vst [vmem:[#allocation94_spill] sm:$0xff] %v3890_v26  ;;  %5378 = vst [vmem:[#allocation95_spill] sm:$0xff] %v3892_v56  ;;  %v711_v26 = vmul.f32 %v3817_v44, %v3264_v50 }
 0x3cf   : > { %892 = vrot.lane.b32.xlu0 %v886_v25, %s2961_s25  ;;  %651 = vrot.lane.b32.xlu1 %v644_v45, %s2962_s24  ;;  %v930_v45 = vmul.f32 %v929_v60, %v3255_v46 }
 0x3d1   : > { %v3899_v28 = vpop.permute.xlu0 %2350  ;;  %v3901_v34 = vpop.permute.xlu1 %1958 }
 0x3d2   : > { %5379 = vst [vmem:[#allocation96_spill] sm:$0xff] %v3899_v28  ;;  %5380 = vst [vmem:[#allocation97_spill] sm:$0xff] %v3901_v34  ;;  %v755_v28 = vmul.f32 %v753_v38, %v3264_v50  ;;  %v799_v34 = vmul.f32 %v797_v57, %v3264_v50 }
 0x3d3   : > { %896 = vrot.lane.b32.xlu0 %v888_v53, %s2961_s25  ;;  %718 = vrot.lane.b32.xlu1 %v711_v26, %s2957_s12  ;;  %v932_v26 = vmul.f32 %v929_v60, %v3715_v32 }
 0x3d5   : > { %v3908_v40 = vpop.permute.xlu0 %2088  ;;  %v3910_v25 = vpop.permute.xlu1 %2260 }
 0x3d6   : > { %5381 = vst [vmem:[#allocation98_spill] sm:$0xff] %v3908_v40  ;;  %5382 = vst [vmem:[#allocation99_spill] sm:$0xff] %v3910_v25  ;;  %v1013_v40 = vstv %s2678_s11  ;;  %s2696_s11 = sld [smem:[#allocation7 + $0x18]] }
 0x3d7   : > { %936 = vrot.lane.b32.xlu0 %v930_v45, %s2962_s24  ;;  %762 = vrot.lane.b32.xlu1 %v755_v28, %s2958_s13  ;;  %v1015_v28 = vmul.f32 %v1013_v40, %v3264_v50 }
 0x3d9   : > { %v3916_v44 = vpop.permute.xlu0 %1828  ;;  %v3918_v53 = vpop.permute.xlu1 %1998 }
 0x3da   : > { %5383 = vst [vmem:[#allocation100_spill] sm:$0xff] %v3916_v44  ;;  %5384 = vst [vmem:[#allocation101_spill] sm:$0xff] %v3918_v53  ;;  %v843_v44 = vmul.f32 %v841_v30, %v3264_v50  ;;  %v1057_v53 = vstv %s2680_s15  ;;  %s2698_s15 = sld [smem:[#allocation7 + $0x1f]] }
 0x3db   : > { %940 = vrot.lane.b32.xlu0 %v932_v26, %s2962_s24  ;;  %806 = vrot.lane.b32.xlu1 %v799_v34, %s2959_s8  ;;  %v1059_v34 = vmul.f32 %v1057_v53, %v3264_v50 }
 0x3dd   : > { %v3924_v38 = vpop.permute.xlu0 %2392  ;;  %v3926_v45 = vpop.permute.xlu1 %2002 }
 0x3de   : > { %5385 = vst [vmem:[#allocation102_spill] sm:$0xff] %v3924_v38  ;;  %5386 = vst [vmem:[#allocation103_spill] sm:$0xff] %v3926_v45  ;;  %v887_v38 = vmul.f32 %v885_v62, %v3264_v50  ;;  %v1101_v45 = vstv %s2682_s17  ;;  %s2700_s17 = sld [smem:[#allocation7 + $0x26]] }
 0x3df   : > { %1022 = vrot.lane.b32.xlu0 %v1015_v28, %s2957_s12  ;;  %850 = vrot.lane.b32.xlu1 %v843_v44, %s2960_s16  ;;  %v1103_v44 = vmul.f32 %v1101_v45, %v3264_v50  ;;  %v1104_v56 = vmul.f32 %v1101_v45, %v3715_v32 }
 0x3e1   : > { %v3932_v57 = vpop.permute.xlu0 %2132  ;;  %v3934_v26 = vpop.permute.xlu1 %2304 }
 0x3e2   : > { %5387 = vst [vmem:[#allocation104_spill] sm:$0xff] %v3932_v57  ;;  %5388 = vst [vmem:[#allocation105_spill] sm:$0xff] %v3934_v26  ;;  %v931_v57 = vmul.f32 %v929_v60, %v3264_v50  ;;  %v1145_v26 = vstv %s2684_s30  ;;  %s2702_s30 = sld [smem:[#allocation7 + $0x2d]] }
 0x3e3   : > { %1066 = vrot.lane.b32.xlu0 %v1059_v34, %s2958_s13  ;;  %894 = vrot.lane.b32.xlu1 %v887_v38, %s2961_s25  ;;  %v1147_v38 = vmul.f32 %v1145_v26, %v3264_v50 }
 0x3e5   : > { %v3940_v30 = vpop.permute.xlu0 %1872  ;;  %v3942_v28 = vpop.permute.xlu1 %2042 }
 0x3e6   : > { %5389 = vst [vmem:[#allocation106_spill] sm:$0xff] %v3940_v30  ;;  %5390 = vst [vmem:[#allocation107_spill] sm:$0xff] %v3942_v28  ;;  %v1014_v30 = vmul.f32 %v1013_v40, %v3255_v46  ;;  %v1189_v28 = vstv %s2686_s10  ;;  %s2706_s10 = sld [smem:[#allocation7 + $0xb]] }
 0x3e7   : > { %1110 = vrot.lane.b32.xlu0 %v1103_v44, %s2959_s8  ;;  %938 = vrot.lane.b32.xlu1 %v931_v57, %s2962_s24  ;;  %v1191_v57 = vmul.f32 %v1189_v28, %v3264_v50 }
 0x3e9   : > { %v3948_v62 = vpop.permute.xlu0 %2436  ;;  %v3950_v34 = vpop.permute.xlu1 %2046 }
 0x3ea   : > { %5391 = vst [vmem:[#allocation108_spill] sm:$0xff] %v3948_v62  ;;  %5392 = vst [vmem:[#allocation109_spill] sm:$0xff] %v3950_v34  ;;  %v1016_v62 = vmul.f32 %v1013_v40, %v3715_v32  ;;  %v3964_v34 = vstv %s2688_s23  ;;  %v3975_v40 = vstv %s2692_s20  ;;  %s4062_s23 = sld [smem:[#allocation7]] }
 0x3eb   : > { %1154 = vrot.lane.b32.xlu0 %v1147_v38, %s2960_s16  ;;  %1020 = vrot.lane.b32.xlu1 %v1014_v30, %s2957_s12  ;;  %v1235_v30 = vmul.f32 %v3964_v34, %v3264_v50  ;;  %v1319_v24 = vmul.f32 %v3975_v40, %v3264_v50  ;;  %s4070_s20 = sld [smem:[#allocation7 + $0x31]] }
 0x3ed   : > { %v3956_v60 = vpop.permute.xlu0 %2174  ;;  %v3958_v44 = vpop.permute.xlu1 %2348 }
 0x3ee   : > { %5393 = vst [vmem:[#allocation110_spill] sm:$0xff] %v3956_v60  ;;  %5394 = vst [vmem:[#allocation111_spill] sm:$0xff] %v3958_v44  ;;  %v1058_v60 = vmul.f32 %v1057_v53, %v3255_v46  ;;  %v1318_v44 = vmul.f32 %v3975_v40, %v3255_v46 }
 0x3ef   : > { %1198 = vrot.lane.b32.xlu0 %v1191_v57, %s2961_s25  ;;  %1024 = vrot.lane.b32.xlu1 %v1016_v62, %s2957_s12 }
 0x3f1   : > { %v3966_v25 = vpop.permute.xlu0 %2178  ;;  %v3968_v38 = vpop.permute.xlu1 %2086 }
 0x3f2   : > { %5395 = vst [vmem:[#allocation112_spill] sm:$0xff] %v3966_v25  ;;  %5396 = vst [vmem:[#allocation113_spill] sm:$0xff] %v3968_v38  ;;  %v1060_v38 = vmul.f32 %v1057_v53, %v3715_v32 }
 0x3f3   : > { %1242 = vrot.lane.b32.xlu0 %v1235_v30, %s2962_s24  ;;  %1064 = vrot.lane.b32.xlu1 %v1058_v60, %s2958_s13  ;;  %v1320_v60 = vmul.f32 %v3975_v40, %v3715_v32  ;;  %v5409_v40 = vlaneseq }
 0x3f5   : > { %v3977_v57 = vpop.permute.xlu0 %2478  ;;  %v3979_v62 = vpop.permute.xlu1 %2090  ;;  %v4073_v27 = vand.u32 127, %v5409_v40 }
 0x3f6   : > { %5397 = vst [vmem:[#allocation114_spill] sm:$0xff] %v3977_v57  ;;  %5398 = vst [vmem:[#allocation115_spill] sm:$0xff] %v3979_v62  ;;  %v1102_v57 = vmul.f32 %v1101_v45, %v3255_v46  ;;  %v1361_v62 = vstv %s2694_s5  ;;  %s2708_s5 = sld [smem:[#allocation7 + $0x12]] }
 0x3f7   : > { %1324 = vrot.lane.b32.xlu0 %v1318_v44, %s2957_s12  ;;  %1068 = vrot.lane.b32.xlu1 %v1060_v38, %s2958_s13  ;;  %v1362_v38 = vmul.f32 %v1361_v62, %v3255_v46  ;;  %v5414_v4 = vcvt.s32.f32 %v4073_v27 }
 0x3f9   : > { %v3986_v25 = vpop.permute.xlu0 %485  ;;  %v3988_v30 = vpop.permute.xlu1 %1826  ;;  %v410_v14 = vadd.f32 0.5, %v5414_v4 }
 0x3fa   : > { %5399 = vst [vmem:[#allocation116_spill] sm:$0xff] %v3988_v30 }
 0x3fb   : > { %1328 = vrot.lane.b32.xlu0 %v1320_v60, %s2957_s12  ;;  %1108 = vrot.lane.b32.xlu1 %v1102_v57, %s2959_s8  ;;  %v1364_v57 = vmul.f32 %v1361_v62, %v3715_v32  ;;  %v1146_v60 = vmul.f32 %v1145_v26, %v3255_v46 }
 0x3fd   : > { %v3995_v53 = vpop.permute.xlu0 %489  ;;  %v3997_v44 = vpop.permute.xlu1 %1830 }
 0x3fe   : > { %5400 = vst [vmem:[#allocation117_spill] sm:$0xff] %v3997_v44  ;;  %v1405_v44 = vstv %s2696_s11  ;;  %s2710_s11 = sld [smem:[#allocation7 + $0x19]] }
 0x3ff   : > { %1368 = vrot.lane.b32.xlu0 %v1362_v38, %s2958_s13  ;;  %1112 = vrot.lane.b32.xlu1 %v1104_v56, %s2959_s8  ;;  %v1406_v56 = vmul.f32 %v1405_v44, %v3255_v46  ;;  %v1148_v38 = vmul.f32 %v1145_v26, %v3715_v32  ;;  %v1407_v63 = vmul.f32 %v1405_v44, %v3264_v50 }
 0x401   : > { %v4003_v30 = vpop.permute.xlu0 %526  ;;  %v4005_v20 = vpop.permute.xlu1 %2390 }
 0x402   : > { %5401 = vst [vmem:[#allocation118_spill] sm:$0xff] %v4005_v20 }
 0x403   : > { %1372 = vrot.lane.b32.xlu0 %v1364_v57, %s2958_s13  ;;  %1152 = vrot.lane.b32.xlu1 %v1146_v60, %s2960_s16  ;;  %v1408_v57 = vmul.f32 %v1405_v44, %v3715_v32  ;;  %v1190_v60 = vmul.f32 %v1189_v28, %v3255_v46  ;;  %v431_v44 = vstv %s4070_s20  ;;  %s2724_s20 = sld [smem:[#allocation7 + $0x1a]] }
 0x405   : > { %v4011_v12 = vpop.permute.xlu0 %530  ;;  %v4013_v45 = vpop.permute.xlu1 %2394 }
 0x406   : > { %5402 = vst [vmem:[#allocation119_spill] sm:$0xff] %v4013_v45  ;;  %v1449_v45 = vstv %s2698_s15  ;;  %s4104_s15 = sld [smem:[#allocation7 + $0x20]] }
 0x407   : > { %1412 = vrot.lane.b32.xlu0 %v1406_v56, %s2959_s8  ;;  %1156 = vrot.lane.b32.xlu1 %v1148_v38, %s2960_s16  ;;  %v1450_v56 = vmul.f32 %v1449_v45, %v3255_v46  ;;  %v1192_v38 = vmul.f32 %v1189_v28, %v3715_v32  ;;  %v1451_v59 = vmul.f32 %v1449_v45, %v3264_v50 }
 0x409   : > { %v4019_v20 = vpop.permute.xlu0 %567  ;;  %v4021_v33 = vpop.permute.xlu1 %2130 }
 0x40a   : > { %5403 = vst [vmem:[#allocation120_spill] sm:$0xff] %v4021_v33 }
 0x40b   : > { %1416 = vrot.lane.b32.xlu0 %v1408_v57, %s2959_s8  ;;  %1196 = vrot.lane.b32.xlu1 %v1190_v60, %s2961_s25  ;;  %v1452_v57 = vmul.f32 %v1449_v45, %v3715_v32  ;;  %v1234_v60 = vmul.f32 %v3964_v34, %v3255_v46  ;;  %v432_v45 = vmul.f32 %v431_v44, %v3175_v61  ;;  %v4121_v61 = vstv %s2710_s11  ;;  %s2738_s11 = sld [smem:[#allocation7 + $0x1b]] }
 0x40d   : > { %v4027_v2 = vpop.permute.xlu0 %571  ;;  %v4029_v26 = vpop.permute.xlu1 %2134 }
 0x40e   : > { %5404 = vst [vmem:[#allocation121_spill] sm:$0xff] %v4029_v26  ;;  %v1493_v26 = vstv %s2700_s17  ;;  %s4123_s17 = sld [smem:[#allocation7 + $0xc]] }
 0x40f   : > { %1456 = vrot.lane.b32.xlu0 %v1450_v56, %s2960_s16  ;;  %1200 = vrot.lane.b32.xlu1 %v1192_v38, %s2961_s25  ;;  %v1494_v38 = vmul.f32 %v1493_v26, %v3255_v46  ;;  %v1495_v10 = vmul.f32 %v1493_v26, %v3264_v50 }
 0x411   : > { %v4035_v33 = vpop.permute.xlu0 %608  ;;  %v4037_v18 = vpop.permute.xlu1 %1870 }
 0x412   : > { %5405 = vst [vmem:[#allocation122_spill] sm:$0xff] %v4037_v18  ;;  %v1236_v18 = vmul.f32 %v3964_v34, %v3715_v32 }
 0x413   : > { %1460 = vrot.lane.b32.xlu0 %v1452_v57, %s2960_s16  ;;  %1240 = vrot.lane.b32.xlu1 %v1234_v60, %s2962_s24  ;;  %v1496_v60 = vmul.f32 %v1493_v26, %v3715_v32 }
 0x415   : > { %v4044_v28 = vpop.permute.xlu0 %612  ;;  %v4046_v56 = vpop.permute.xlu1 %1874 }
 0x416   : > { %5406 = vst [vmem:[#allocation123_spill] sm:$0xff] %v4046_v56  ;;  %v1537_v56 = vstv %s2702_s30  ;;  %s4154_s30 = sld [smem:[#allocation7 + $0xd]] }
 0x417   : > { %1500 = vrot.lane.b32.xlu0 %v1494_v38, %s2961_s25  ;;  %1244 = vrot.lane.b32.xlu1 %v1236_v18, %s2962_s24  ;;  %v1538_v38 = vmul.f32 %v1537_v56, %v3255_v46 }
 0x419   : > { %v4053_v41 = vpop.permute.xlu0 %649  ;;  %v4055_v57 = vpop.permute.xlu1 %2434 }
 0x41a   : > { %5407 = vst [vmem:[#allocation124_spill] sm:$0xff] %v4055_v57  ;;  %v1363_v57 = vmul.f32 %v1361_v62, %v3264_v50  ;;  %v4084_v62 = vadd.s32 128, %v4073_v27 }
 0x41b   : > { %1504 = vrot.lane.b32.xlu0 %v1496_v60, %s2961_s25  ;;  %1326 = vrot.lane.b32.xlu1 %v1319_v24, %s2957_s12 }
 0x41d   : > { %v4064_v34 = vpop.permute.xlu0 %653  ;;  %v4066_v18 = vpop.permute.xlu1 %2438 }
 0x41e   : > { %5408 = vst [vmem:[#allocation125_spill] sm:$0xff] %v4066_v18  ;;  %v1540_v18 = vmul.f32 %v1537_v56, %v3715_v32 }
 0x41f   : > { %1544 = vrot.lane.b32.xlu0 %v1538_v38, %s2962_s24  ;;  %1370 = vrot.lane.b32.xlu1 %v1363_v57, %s2958_s13  ;;  %v4088_v38 = vstv %s2706_s10  ;;  %v425_v57 = vstv %s4062_s23  ;;  %s4212_s10 = sld [smem:[#allocation7 + $0x13]] }
 0x420   : > { %s4236_s23 = sld [smem:[#allocation7 + $0x14]] }
 0x421   : > { %v4077_v24 = vpop.permute.xlu0 %716  ;;  %v4079_v60 = vpop.permute.xlu1 %2176 }
 0x422   : > { %5410 = vst [vmem:[#allocation126_spill] sm:$0xff] %v4077_v24  ;;  %5411 = vst [vmem:[#allocation127_spill] sm:$0xff] %v4079_v60  ;;  %v1623_v60 = vmul.f32 %v4088_v38, %v3264_v50 }
 0x423   : > { %1548 = vrot.lane.b32.xlu0 %v1540_v18, %s2962_s24  ;;  %1414 = vrot.lane.b32.xlu1 %v1407_v63, %s2959_s8  ;;  %v426_v63 = vmul.f32 %v425_v57, %v3255_v46  ;;  %v4102_v18 = vstv %s2708_s5  ;;  %s2714_s5 = sld [smem:[#allocation7 + $0x27]] }
 0x424   : > { %v1667_v55 = vmul.f32 %v4102_v18, %v3264_v50 }
 0x425   : > { %v4091_v40 = vpop.permute.xlu0 %720  ;;  %v445_v24 = vpop.permute.xlu1 %444  ;;  %v434_v52 = vadd.f32 %v432_v45, %v426_v63  ;;  %v1539_v63 = vmul.f32 %v1537_v56, %v3264_v50 }
 0x426   : > { %5412 = vst [vmem:[#allocation128_spill] sm:$0xff] %v4091_v40  ;;  %v5415_v40 = vcvt.s32.f32 %v4084_v62 }
 0x427   : > { %1630 = vrot.lane.b32.xlu0 %v1623_v60, %s2957_s12  ;;  %1458 = vrot.lane.b32.xlu1 %v1451_v59, %s2960_s16  ;;  %v427_v60 = vmul.f32 %v425_v57, %v3264_v50 }
 0x428   : > { %v411_v11 = vadd.f32 0.5, %v5415_v40  ;;  %v1711_v40 = vmul.f32 %v4121_v61, %v3264_v50 }
 0x429   : > { %v4106_v19 = vpop.permute.xlu0 %760  ;;  %v447_v35 = vpop.permute.xlu1 %446 }
 0x42a   : > { %5413 = vst [vmem:[#allocation129_spill] sm:$0xff] %v4106_v19  ;;  %v451_v59 = vsel %vm450_vm2, %v445_v24, %v447_v35  ;;  %v433_v19 = vmul.f32 %v431_v44, %v3180_v0  ;;  %v414_v45 = vmul.f32 0.0625, %v411_v11 }
 0x42b   : > { %1674 = vrot.lane.b32.xlu0 %v1667_v55, %s2958_s13  ;;  %1502 = vrot.lane.b32.xlu1 %v1495_v10, %s2961_s25  ;;  %v455_v26 = vadd.f32 %v451_v59, %v434_v52  ;;  %v413_v10 = vmul.f32 0.0625, %v410_v14  ;;  %v471_v52 = vsel %vm450_vm2, %v3394_v3, %v3403_v7 }
 0x42c   : > { %v435_v57 = vadd.f32 %v433_v19, %v427_v60  ;;  %v472_v19 = vsel %vm450_vm2, %v3403_v7, %v3405_v9  ;;  %v4140_v60 = vstv %s4104_s15  ;;  %s2726_s15 = sld [smem:[#allocation7 + $0x21]] }
 0x42d   : > { %v4125_v24 = vpop.permute.xlu0 %764  ;;  %v449_v4 = vpop.permute.xlu1 %448  ;;  %v475_v11 = vadd.f32 %v471_v52, %v455_v26  ;;  %v1755_v59 = vmul.f32 %v4140_v60, %v3264_v50  ;;  %v415_v9 = vfloor.f32 %v413_v10  ;;  %v512_v26 = vsel %vm491_vm3, %v3416_v17, %v3414_v16 }
 0x42e   : > { %v452_v55 = vsel %vm450_vm2, %v447_v35, %v449_v4  ;;  %v416_v4 = vfloor.f32 %v414_v45 }
 0x42f   : > { %v456_v44 = vadd.f32 %v452_v55, %v435_v57  ;;  %1718 = vrot.lane.b32.xlu0 %v1711_v40, %s2959_s8  ;;  %1546 = vrot.lane.b32.xlu1 %v1539_v63, %s2962_s24  ;;  %v1622_v57 = vmul.f32 %v4088_v38, %v3255_v46 }
 0x431   : > { %v476_v56 = vadd.f32 %v472_v19, %v456_v44  ;;  %v4142_v35 = vpop.permute.xlu0 %804  ;;  %v488_v14 = vpop.permute.xlu1 %487  ;;  %v1624_v19 = vmul.f32 %v4088_v38, %v3715_v32 }
 0x432   : > { %v492_v3 = vsel %vm491_vm3, %v3986_v25, %v488_v14  ;;  %v493_v7 = vsel %vm491_vm3, %v488_v14, %v3995_v53  ;;  %v513_v25 = vsel %vm491_vm3, %v3414_v16, %v3425_v23  ;;  %v4163_v53 = vstv %s4123_s17  ;;  %s2740_s17 = sld [smem:[#allocation7 + $0x22]] }
 0x433   : > { %v496_v40 = vadd.f32 %v492_v3, %v475_v11  ;;  %v497_v63 = vadd.f32 %v493_v7, %v476_v56  ;;  %1762 = vrot.lane.b32.xlu0 %v1755_v59, %s2960_s16  ;;  %1628 = vrot.lane.b32.xlu1 %v1622_v57, %s2957_s12  ;;  %v1926_v52 = vmul.f32 %v4163_v53, %v3255_v46  ;;  %v417_v23 = vmul.f32 16.0, %v415_v9 }
 0x434   : > { %v418_v14 = vmul.f32 16.0, %v416_v4  ;;  %v553_v59 = vsel %vm532_vm4, %v3436_v31, %v3423_v22  ;;  %v1928_v7 = vmul.f32 %v4163_v53, %v3715_v32  ;;  %v1666_v9 = vmul.f32 %v4102_v18, %v3255_v46 }
 0x435   : > { %v4165_v55 = vpop.permute.xlu0 %808  ;;  %v516_v10 = vadd.f32 %v512_v26, %v496_v40  ;;  %v517_v45 = vadd.f32 %v513_v25, %v497_v63  ;;  %v529_v44 = vpop.permute.xlu1 %528  ;;  %v4200_v26 = vstv %s4154_s30  ;;  %v5418_v25 = vcvt.s32.f32 %v4084_v62  ;;  %s2742_s30 = sld [smem:[#allocation7 + $0x29]] }
 0x436   : > { %v533_v17 = vsel %vm532_vm4, %v4003_v30, %v529_v44  ;;  %v534_v16 = vsel %vm532_vm4, %v529_v44, %v4011_v12  ;;  %v554_v30 = vsel %vm532_vm4, %v3423_v22, %v3445_v37  ;;  %v5416_v22 = vcvt.s32.f32 %v4073_v27 }
 0x437   : > { %v537_v56 = vadd.f32 %v533_v17, %v516_v10  ;;  %v538_v11 = vadd.f32 %v534_v16, %v517_v45  ;;  %1932 = vrot.lane.b32.xlu0 %v1926_v52, %s2957_s12  ;;  %1632 = vrot.lane.b32.xlu1 %v1624_v19, %s2957_s12  ;;  %v4204_v10 = vsub.f32 %v5418_v25, %v418_v14 }
 0x438   : > { %v4195_v37 = vsub.f32 %v5416_v22, %v417_v23  ;;  %v595_v27 = vsel %vm573_vm5, %v3434_v29, %v3465_v48  ;;  %v2230_v62 = vmul.f32 %v4200_v26, %v3255_v46  ;;  %v1668_v19 = vmul.f32 %v4102_v18, %v3715_v32 }
 0x439   : > { %v4183_v38 = vpop.permute.xlu0 %848  ;;  %v557_v12 = vadd.f32 %v553_v59, %v537_v56  ;;  %v558_v57 = vadd.f32 %v554_v30, %v538_v11  ;;  %v570_v3 = vpop.permute.xlu1 %569  ;;  %5419 = vst [vmem:[#allocation131_spill] sm:$0xff] %v4204_v10  ;;  %v2232_v48 = vmul.f32 %v4200_v26, %v3715_v32  ;;  %v1710_v23 = vmul.f32 %v4121_v61, %v3255_v46 }
 0x43a   : > { %v574_v31 = vsel %vm573_vm5, %v4019_v20, %v570_v3  ;;  %v575_v4 = vsel %vm573_vm5, %v570_v3, %v4027_v2  ;;  %5417 = vst [vmem:[#allocation130_spill] sm:$0xff] %v4195_v37  ;;  %v594_v2 = vsel %vm573_vm5, %v3456_v43, %v3434_v29  ;;  %vm683_vm8 = vcmp.ge.f32.partialorder %v4204_v10, 3.0 }
 0x43b   : > { %v578_v40 = vadd.f32 %v574_v31, %v557_v12  ;;  %v579_v63 = vadd.f32 %v575_v4, %v558_v57  ;;  %1936 = vrot.lane.b32.xlu0 %v1928_v7, %s2957_s12  ;;  %1672 = vrot.lane.b32.xlu1 %v1666_v9, %s2958_s13  ;;  %vm685_vm9 = vcmp.le.f32.partialorder %v4204_v10, 18.0  ;;  %vm682_vm10 = vcmp.ge.f32.partialorder %v4195_v37, 3.0 }
 0x43c   : > { %vm684_vm11 = vcmp.le.f32.partialorder %v4195_v37, 18.0  ;;  %vm4250_vm12 = vmand %vm683_vm8, %vm685_vm9  ;;  %v5421_v30 = vmov 0  ;;  %v676_v12 = vsel %vm655_vm7, %v3499_v21, %v3454_v42  ;;  %v5424_v57 = vmov 0 }
 0x43d   : > { %v4214_v20 = vpop.permute.xlu0 %852  ;;  %v598_v45 = vadd.f32 %v594_v2, %v578_v40  ;;  %v599_v44 = vadd.f32 %v595_v27, %v579_v63  ;;  %v611_v52 = vpop.permute.xlu1 %610  ;;  %v5422_v30 = vsel %vm4250_vm12, 4294967295, %v5421_v30  ;;  %vm4261_vm13 = vmand %vm682_vm10, %vm684_vm11  ;;  %v1712_v21 = vmul.f32 %v4121_v61, %v3715_v32 }
 0x43e   : > { %v615_v43 = vsel %vm614_vm6, %v4035_v33, %v611_v52  ;;  %v616_v29 = vsel %vm614_vm6, %v611_v52, %v4044_v28  ;;  %v635_v33 = vsel %vm614_vm6, %v3477_v49, %v3443_v36  ;;  %v636_v28 = vsel %vm614_vm6, %v3443_v36, %v3487_v5  ;;  %5423 = vst [vmem:[#allocation133_spill] sm:$0xff] %v5422_v30 }
 0x43f   : > { %v619_v17 = vadd.f32 %v615_v43, %v598_v45  ;;  %v620_v16 = vadd.f32 %v616_v29, %v599_v44  ;;  %2236 = vrot.lane.b32.xlu0 %v2230_v62, %s2957_s12  ;;  %1676 = vrot.lane.b32.xlu1 %v1668_v19, %s2958_s13  ;;  %v5425_v57 = vsel %vm4261_vm13, 4294967295, %v5424_v57  ;;  %v2273_v22 = vstv %s4236_s23  ;;  %s4605_s23 = sld [smem:[#allocation7 + $0x35]] }
 0x440   : > { %5426 = vst [vmem:[#allocation134_spill] sm:$0xff] %v5425_v57  ;;  %v2274_v61 = vmul.f32 %v2273_v22, %v3255_v46  ;;  %v1754_v25 = vmul.f32 %v4140_v60, %v3255_v46  ;;  %v2276_v45 = vmul.f32 %v2273_v22, %v3715_v32  ;;  %v1756_v44 = vmul.f32 %v4140_v60, %v3715_v32 }
 0x441   : > { %v4240_v18 = vpop.permute.xlu0 %892  ;;  %v639_v56 = vadd.f32 %v635_v33, %v619_v17  ;;  %v640_v11 = vadd.f32 %v636_v28, %v620_v16  ;;  %v652_v14 = vpop.permute.xlu1 %651  ;;  %v4303_v52 = vstv %s2724_s20  ;;  %v4305_v62 = vstv %s2714_s5  ;;  %s2964_s20 = smov 125   ;;  %s2732_s5 = sld [smem:[#allocation7 + $0x6]] }
 0x442   : > { %5420 = vst [vmem:[#allocation132_spill] sm:$0xff] %v4240_v18  ;;  %v656_v49 = vsel %vm655_vm7, %v4053_v41, %v652_v14  ;;  %v657_v36 = vsel %vm655_vm7, %v652_v14, %v4064_v34  ;;  %v677_v41 = vsel %vm655_vm7, %v3454_v42, %v3511_v39  ;;  %v1969_v34 = vstv %s4212_s10  ;;  %v5439_v39 = vld [vmem:[#allocation17_spill] sm:$0xff]  ;;  %s2744_s10 = sld [smem:[#allocation7 + $0x30]] }
 0x443   : > { %v660_v5 = vadd.f32 %v656_v49, %v639_v56  ;;  %v661_v59 = vadd.f32 %v657_v36, %v640_v11  ;;  %2240 = vrot.lane.b32.xlu0 %v2232_v48, %s2957_s12  ;;  %1716 = vrot.lane.b32.xlu1 %v1710_v23, %s2959_s8  ;;  %v1971_v4 = vmul.f32 %v1969_v34, %v3264_v50  ;;  %v4315_v60 = vstv %s2738_s11  ;;  %s2733_s11 = sld [smem:[#allocation7 + $0x37]] }
 0x444   : > { %v2015_v29 = vmul.f32 %v4303_v52, %v3264_v50  ;;  %v1798_v48 = vmul.f32 %v4305_v62, %v3255_v46  ;;  %v2318_v23 = vmul.f32 %v4315_v60, %v3255_v46  ;;  %v1927_v33 = vmul.f32 %v4163_v53, %v3264_v50 }
 0x445   : > { %v4265_v3 = vadd.f32 %v676_v12, %v660_v5  ;;  %v4267_v7 = vadd.f32 %v677_v41, %v661_v59  ;;  %v4269_v9 = vpop.permute.xlu0 %896  ;;  %v4271_v31 = vpop.permute.xlu1 %718  ;;  %v2320_v11 = vmul.f32 %v4315_v60, %v3715_v32  ;;  %v2231_v14 = vmul.f32 %v4200_v26, %v3264_v50 }
 0x446   : > { %v4335_v49 = vstv %s2726_s15  ;;  %v1970_v59 = vmul.f32 %v1969_v34, %v3255_v46  ;;  %v1800_v41 = vmul.f32 %v4305_v62, %v3715_v32  ;;  %v4469_v57 = vstv %s2742_s30  ;;  %s2718_s15 = sld [smem:[#allocation7 + $0x5]]  ;;  %s2968_s30 = smov 122  }
 0x447   : > { %5427 = vst [vmem:[#allocation135_spill] sm:$0xff] %v4265_v3  ;;  %5428 = vst [vmem:[#allocation136_spill] sm:$0xff] %v4267_v7  ;;  %1978 = vrot.lane.b32.xlu0 %v1971_v4, %s2958_s13  ;;  %1720 = vrot.lane.b32.xlu1 %v1712_v21, %s2959_s8  ;;  %v2059_v5 = vmul.f32 %v4335_v49, %v3264_v50  ;;  %v1972_v4 = vmul.f32 %v1969_v34, %v3715_v32  ;;  %v5444_v3 = vld [vmem:[#allocation65_spill] sm:$0xff]  ;;  %vm1595_vm11 = vcmask 1022976  }
 0x449   : > { %v4285_v40 = vpop.permute.xlu0 %936  ;;  %v4287_v63 = vpop.permute.xlu1 %762 }
 0x44a   : > { %5429 = vst [vmem:[#allocation137_spill] sm:$0xff] %v4285_v40 }
 0x44b   : > { %2280 = vrot.lane.b32.xlu0 %v2274_v61, %s2958_s13  ;;  %1760 = vrot.lane.b32.xlu1 %v1754_v25, %s2960_s16  ;;  %v4354_v61 = vstv %s2740_s17  ;;  %s2719_s17 = sld [smem:[#allocation7 + $0x36]] }
 0x44d   : > { %v4294_v2 = vpop.permute.xlu0 %940  ;;  %v4296_v27 = vpop.permute.xlu1 %806 }
 0x44f   : > { %2284 = vrot.lane.b32.xlu0 %v2276_v45, %s2958_s13  ;;  %1764 = vrot.lane.b32.xlu1 %v1756_v44, %s2960_s16 }
 0x451   : > { %v1023_v19 = vpop.permute.xlu0 %1022  ;;  %v4307_v43 = vpop.permute.xlu1 %850 }
 0x453   : > { %2022 = vrot.lane.b32.xlu0 %v2015_v29, %s2959_s8  ;;  %1804 = vrot.lane.b32.xlu1 %v1798_v48, %s2961_s25  ;;  %v2362_v29 = vmul.f32 %v4354_v61, %v3255_v46  ;;  %v2275_v48 = vmul.f32 %v2273_v22, %v3264_v50  ;;  %v2364_v22 = vmul.f32 %v4354_v61, %v3715_v32 }
 0x455   : > { %v1067_v17 = vpop.permute.xlu0 %1066  ;;  %v4317_v16 = vpop.permute.xlu1 %894 }
 0x457   : > { %2324 = vrot.lane.b32.xlu0 %v2318_v23, %s2959_s8  ;;  %1934 = vrot.lane.b32.xlu1 %v1927_v33, %s2957_s12  ;;  %v1048_v23 = vsel %vm450_vm2, %v3531_v58, %v3661_v54  ;;  %v704_v58 = vmul.f32 %v3266_v51, %v3183_v1  ;;  %v1092_v51 = vsel %vm491_vm3, %v3553_v15, %v3673_v47 }
 0x459   : > { %v4325_v28 = vpop.permute.xlu0 %1110  ;;  %v4327_v56 = vpop.permute.xlu1 %938 }
 0x45b   : > { %2328 = vrot.lane.b32.xlu0 %v2320_v11, %s2959_s8  ;;  %2238 = vrot.lane.b32.xlu1 %v2231_v14, %s2957_s12  ;;  %s2728_s12 = sld [smem:[#allocation7 + $0x28]] }
 0x45d   : > { %v4337_v53 = vpop.permute.xlu0 %1154  ;;  %v1021_v36 = vpop.permute.xlu1 %1020 }
 0x45e   : > { %v1026_v21 = vsel %vm450_vm2, %v1021_v36, %v1023_v19 }
 0x45f   : > { %2066 = vrot.lane.b32.xlu0 %v2059_v5, %s2960_s16  ;;  %1976 = vrot.lane.b32.xlu1 %v1970_v59, %s2958_s13  ;;  %v1031_v25 = vadd.f32 %v1026_v21, %v3307_v8 }
 0x461   : > { %v4344_v26 = vpop.permute.xlu0 %1198  ;;  %v4346_v12 = vpop.permute.xlu1 %1024  ;;  %v1053_v11 = vadd.f32 %v1048_v23, %v1031_v25 }
 0x462   : > { %v1027_v34 = vsel %vm450_vm2, %v1023_v19, %v4346_v12  ;;  %v2014_v19 = vmul.f32 %v4303_v52, %v3255_v46 }
 0x463   : > { %1808 = vrot.lane.b32.xlu0 %v1800_v41, %s2961_s25  ;;  %1980 = vrot.lane.b32.xlu1 %v1972_v4, %s2958_s13  ;;  %v1032_v33 = vadd.f32 %v1027_v34, %v3315_v13  ;;  %v1049_v13 = vsel %vm450_vm2, %v3661_v54, %v3543_v6  ;;  %v4388_v41 = vstv %s2728_s12  ;;  %v5430_v54 = vld [vmem:[#allocation16_spill] sm:$0xff]  ;;  %s2966_s12 = smov 124  }
 0x464   : > { %v2104_v15 = vmul.f32 %v4388_v41, %v3715_v32 }
 0x465   : > { %v4357_v45 = vpop.permute.xlu0 %1242  ;;  %v1065_v44 = vpop.permute.xlu1 %1064  ;;  %v1054_v4 = vadd.f32 %v1049_v13, %v1032_v33  ;;  %v5432_v13 = vld [vmem:[#allocation128_spill] sm:$0xff] }
 0x466   : > { %v1070_v8 = vsel %vm491_vm3, %v1065_v44, %v1067_v17  ;;  %v2102_v44 = vmul.f32 %v4388_v41, %v3255_v46 }
 0x467   : > { %2368 = vrot.lane.b32.xlu0 %v2362_v29, %s2960_s16  ;;  %2282 = vrot.lane.b32.xlu1 %v2275_v48, %s2958_s13  ;;  %v1075_v5 = vadd.f32 %v1070_v8, %v1053_v11  ;;  %s2716_s13 = sld [smem:[#allocation7 + $0x2e]]  ;;  %v2016_v29 = vmul.f32 %v4303_v52, %v3715_v32 }
 0x469   : > { %v4371_v14 = vpop.permute.xlu0 %1324  ;;  %v4373_v36 = vpop.permute.xlu1 %1068  ;;  %v1097_v23 = vadd.f32 %v1092_v51, %v1075_v5 }
 0x46a   : > { %v1071_v59 = vsel %vm491_vm3, %v1067_v17, %v4373_v36  ;;  %v696_v17 = vmul.f32 %v5430_v54, %v3715_v32 }
 0x46b   : > { %2372 = vrot.lane.b32.xlu0 %v2364_v22, %s2960_s16  ;;  %2020 = vrot.lane.b32.xlu1 %v2014_v19, %s2959_s8  ;;  %v1076_v34 = vadd.f32 %v1071_v59, %v1054_v4  ;;  %v2319_v22 = vmul.f32 %v4315_v60, %v3264_v50  ;;  %v5431_v19 = vld [vmem:[#allocation35_spill] sm:$0xff]  ;;  %v5433_v4 = vld [vmem:[#allocation21_spill] sm:$0xff] }
 0x46c   : > { %v707_v8 = vadd.f32 %v704_v58, %v696_v17  ;;  %v1093_v5 = vsel %vm491_vm3, %v3673_v47, %v5431_v19  ;;  %v1312_v58 = vmul.f32 %v5433_v4, %v3183_v1  ;;  %v5435_v60 = vld [vmem:[#allocation37_spill] sm:$0xff]  ;;  %v5436_v47 = vld [vmem:[#allocation22_spill] sm:$0xff] }
 0x46d   : > { %v4390_v21 = vpop.permute.xlu0 %1328  ;;  %v1109_v25 = vpop.permute.xlu1 %1108  ;;  %v1304_v54 = vmul.f32 %v5436_v47, %v3715_v32  ;;  %v4429_v17 = vstv %s2716_s13  ;;  %s2967_s13 = smov 123  }
 0x46e   : > { %v1114_v48 = vsel %vm532_vm4, %v1109_v25, %v4325_v28  ;;  %v729_v59 = vadd.f32 %v5432_v13, %v707_v8 }
 0x46f   : > { %2108 = vrot.lane.b32.xlu0 %v2102_v44, %s2961_s25  ;;  %2024 = vrot.lane.b32.xlu1 %v2016_v29, %s2959_s8  ;;  %v1119_v33 = vadd.f32 %v1114_v48, %v1097_v23  ;;  %v1098_v44 = vadd.f32 %v1093_v5, %v1076_v34  ;;  %v5434_v29 = vld [vmem:[#allocation54_spill] sm:$0xff]  ;;  %v1842_v34 = vmul.f32 %v4429_v17, %v3255_v46 }
 0x470   : > { %v1136_v51 = vsel %vm532_vm4, %v5435_v60, %v5434_v29  ;;  %v1315_v4 = vadd.f32 %v1312_v58, %v1304_v54 }
 0x471   : > { %v4405_v11 = vpop.permute.xlu0 %1368  ;;  %v4407_v52 = vpop.permute.xlu1 %1112  ;;  %v1141_v8 = vadd.f32 %v1136_v51, %v1119_v33 }
 0x472   : > { %v1115_v25 = vsel %vm532_vm4, %v4325_v28, %v4407_v52  ;;  %v1337_v51 = vadd.f32 %v4390_v21, %v1315_v4 }
 0x473   : > { %2112 = vrot.lane.b32.xlu0 %v2104_v15, %s2961_s25  ;;  %2326 = vrot.lane.b32.xlu1 %v2319_v22, %s2959_s8  ;;  %v1120_v48 = vadd.f32 %v1115_v25, %v1098_v44  ;;  %v2058_v15 = vmul.f32 %v4335_v49, %v3255_v46  ;;  %v5437_v22 = vld [vmem:[#allocation32_spill] sm:$0xff]  ;;  %v5438_v25 = vld [vmem:[#allocation39_spill] sm:$0xff]  ;;  %s2730_s8 = sld [smem:[#allocation7 + $0x2f]] }
 0x474   : > { %v751_v5 = vadd.f32 %v5437_v22, %v729_v59  ;;  %v1137_v33 = vsel %vm532_vm4, %v5434_v29, %v5438_v25  ;;  %v1008_v59 = vmul.f32 %v5439_v39, %v3183_v1  ;;  %v5441_v39 = vld [vmem:[#allocation57_spill] sm:$0xff] }
 0x475   : > { %v4431_v23 = vpop.permute.xlu0 %1372  ;;  %v1153_v28 = vpop.permute.xlu1 %1152  ;;  %v1142_v54 = vadd.f32 %v1137_v33, %v1120_v48  ;;  %v5442_v48 = vld [vmem:[#allocation41_spill] sm:$0xff]  ;;  %v5443_v33 = vld [vmem:[#allocation34_spill] sm:$0xff] }
 0x476   : > { %v1158_v60 = vsel %vm573_vm5, %v1153_v28, %v4337_v53  ;;  %v773_v44 = vadd.f32 %v4125_v24, %v751_v5 }
 0x477   : > { %v1163_v47 = vadd.f32 %v1158_v60, %v1141_v8  ;;  %1848 = vrot.lane.b32.xlu0 %v1842_v34, %s2962_s24  ;;  %2064 = vrot.lane.b32.xlu1 %v2058_v15, %s2960_s16  ;;  %v1844_v8 = vmul.f32 %v4429_v17, %v3715_v32  ;;  %v2060_v34 = vmul.f32 %v4335_v49, %v3715_v32  ;;  %v5440_v15 = vld [vmem:[#allocation20_spill] sm:$0xff] }
 0x478   : > { %v1000_v5 = vmul.f32 %v5440_v15, %v3715_v32  ;;  %v1180_v60 = vsel %vm573_vm5, %v5442_v48, %v5441_v39  ;;  %v795_v42 = vadd.f32 %v5443_v33, %v773_v44  ;;  %v1359_v49 = vadd.f32 %v5444_v3, %v1337_v51 }
 0x479   : > { %v4449_v58 = vpop.permute.xlu0 %1412  ;;  %v4451_v28 = vpop.permute.xlu1 %1156  ;;  %v1185_v15 = vadd.f32 %v1180_v60, %v1163_v47  ;;  %v5445_v47 = vld [vmem:[#allocation43_spill] sm:$0xff] }
 0x47a   : > { %v1159_v29 = vsel %vm573_vm5, %v4337_v53, %v4451_v28  ;;  %v1011_v53 = vadd.f32 %v1008_v59, %v1000_v5  ;;  %v1381_v44 = vadd.f32 %v4431_v23, %v1359_v49  ;;  %v1181_v5 = vsel %vm573_vm5, %v5441_v39, %v5445_v47 }
 0x47b   : > { %v1164_v4 = vadd.f32 %v1159_v29, %v1142_v54  ;;  %1852 = vrot.lane.b32.xlu0 %v1844_v8, %s2962_s24  ;;  %2068 = vrot.lane.b32.xlu1 %v2060_v34, %s2960_s16  ;;  %v2406_v8 = vmul.f32 %v4469_v57, %v3255_v46  ;;  %v1799_v34 = vmul.f32 %v4305_v62, %v3264_v50 }
 0x47c   : > { %v817_v29 = vadd.f32 %v4165_v55, %v795_v42  ;;  %v1033_v48 = vadd.f32 %v4346_v12, %v1011_v53  ;;  %v2408_v49 = vmul.f32 %v4469_v57, %v3715_v32  ;;  %v2363_v12 = vmul.f32 %v4354_v61, %v3264_v50  ;;  %v5446_v53 = vld [vmem:[#allocation38_spill] sm:$0xff] }
 0x47d   : > { %v4471_v37 = vpop.permute.xlu0 %1416  ;;  %v1197_v54 = vpop.permute.xlu1 %1196  ;;  %v1186_v62 = vadd.f32 %v1181_v5, %v1164_v4  ;;  %v5448_v4 = vld [vmem:[#allocation59_spill] sm:$0xff]  ;;  %v5449_v5 = vld [vmem:[#allocation45_spill] sm:$0xff] }
 0x47e   : > { %v1202_v51 = vsel %vm614_vm6, %v1197_v54, %v4344_v26  ;;  %v5447_v54 = vld [vmem:[#allocation69_spill] sm:$0xff]  ;;  %v1055_v39 = vadd.f32 %v3543_v6, %v1033_v48  ;;  %v1224_v7 = vsel %vm614_vm6, %v5449_v5, %v5448_v4 }
 0x47f   : > { %v1207_v59 = vadd.f32 %v1202_v51, %v1185_v15  ;;  %2412 = vrot.lane.b32.xlu0 %v2406_v8, %s2961_s25  ;;  %1806 = vrot.lane.b32.xlu1 %v1799_v34, %s2961_s25  ;;  %v839_v15 = vadd.f32 %v5446_v53, %v817_v29  ;;  %v1403_v8 = vadd.f32 %v5447_v54, %v1381_v44  ;;  %v2145_v44 = vstv %s2730_s8  ;;  %s421_s8 = sld [smem:[#allocation2]] }
 0x480   : > { %v1077_v30 = vadd.f32 %v4373_v36, %v1055_v39 }
 0x481   : > { %v4487_v60 = vpop.permute.xlu0 %1456  ;;  %v4489_v42 = vpop.permute.xlu1 %1200  ;;  %v861_v61 = vadd.f32 %v4214_v20, %v839_v15  ;;  %v1425_v29 = vadd.f32 %v4471_v37, %v1403_v8  ;;  %v1229_v6 = vadd.f32 %v1224_v7, %v1207_v59  ;;  %v5451_v15 = vld [vmem:[#allocation47_spill] sm:$0xff]  ;;  %v5452_v7 = vld [vmem:[#allocation42_spill] sm:$0xff]  ;;  %v5453_v8 = vld [vmem:[#allocation73_spill] sm:$0xff] }
 0x482   : > { %v1203_v34 = vsel %vm614_vm6, %v4344_v26, %v4489_v42  ;;  %v1225_v36 = vsel %vm614_vm6, %v5448_v4, %v5451_v15  ;;  %v1099_v5 = vadd.f32 %v5431_v19, %v1077_v30 }
 0x483   : > { %v1208_v51 = vadd.f32 %v1203_v34, %v1186_v62  ;;  %2416 = vrot.lane.b32.xlu0 %v2408_v49, %s2961_s25  ;;  %2370 = vrot.lane.b32.xlu1 %v2363_v12, %s2960_s16  ;;  %v2146_v62 = vmul.f32 %v2145_v44, %v3255_v46  ;;  %v2103_v49 = vmul.f32 %v4388_v41, %v3264_v50  ;;  %s2963_s16 = smov 127  }
 0x484   : > { %v883_v59 = vadd.f32 %v5452_v7, %v861_v61  ;;  %v1447_v39 = vadd.f32 %v5453_v8, %v1425_v29  ;;  %v1121_v30 = vadd.f32 %v4407_v52, %v1099_v5 }
 0x485   : > { %v4509_v26 = vpop.permute.xlu0 %1460  ;;  %v1241_v48 = vpop.permute.xlu1 %1240  ;;  %v1230_v10 = vadd.f32 %v1225_v36, %v1208_v51  ;;  %v2449_v51 = vstv %s2744_s10  ;;  %v2407_v36 = vmul.f32 %v4469_v57, %v3264_v50  ;;  %v5460_v57 = vld [vmem:[#allocation52_spill] sm:$0xff]  ;;  %s2754_s10 = sshll.u32 %s3034_s6, 8  ;;  %s2969_s6 = smov [#allocation8]  }
 0x486   : > { %v1246_v12 = vsel %vm655_vm7, %v1241_v48, %v4357_v45  ;;  %v1469_v4 = vadd.f32 %v4509_v26, %v1447_v39  ;;  %v5456_v39 = vld [vmem:[#allocation46_spill] sm:$0xff] }
 0x487   : > { %v4516_v34 = vadd.f32 %v1246_v12, %v1229_v6  ;;  %2152 = vrot.lane.b32.xlu0 %v2146_v62, %s2962_s24  ;;  %2110 = vrot.lane.b32.xlu1 %v2103_v49, %s2961_s25  ;;  %v2148_v6 = vmul.f32 %v2145_v44, %v3715_v32  ;;  %v1843_v62 = vmul.f32 %v4429_v17, %v3264_v50 }
 0x488   : > { %v905_v49 = vadd.f32 %v4269_v9, %v883_v59  ;;  %v2451_v12 = vmul.f32 %v2449_v51, %v3264_v50  ;;  %v5455_v59 = vld [vmem:[#allocation55_spill] sm:$0xff] }
 0x489   : > { %5450 = vst [vmem:[#allocation16_spill] sm:$0xff] %v4516_v34  ;;  %v4526_v41 = vpop.permute.xlu0 %1500  ;;  %v4528_v48 = vpop.permute.xlu1 %1244  ;;  %v5459_v34 = vld [vmem:[#allocation24_spill] sm:$0xff] }
 0x48a   : > { %v1247_v61 = vsel %vm655_vm7, %v4357_v45, %v4528_v48  ;;  %v2474_v45 = vmul.f32 %v5455_v59, %v3183_v1  ;;  %v927_v52 = vadd.f32 %v5456_v39, %v905_v49  ;;  %v5461_v49 = vld [vmem:[#allocation63_spill] sm:$0xff] }
 0x48b   : > { %v4539_v19 = vadd.f32 %v1247_v61, %v1230_v10  ;;  %2156 = vrot.lane.b32.xlu0 %v2148_v6, %s2962_s24  ;;  %1850 = vrot.lane.b32.xlu1 %v1843_v62, %s2962_s24  ;;  %v5457_v10 = vld [vmem:[#allocation77_spill] sm:$0xff]  ;;  %v1143_v61 = vadd.f32 %v5438_v25, %v1121_v30  ;;  %v2147_v25 = vmul.f32 %v2145_v44, %v3264_v50 }
 0x48c   : > { %v1491_v5 = vadd.f32 %v5457_v10, %v1469_v4  ;;  %v1352_v4 = vsel %vm450_vm2, %v5461_v49, %v5460_v57  ;;  %v949_v30 = vadd.f32 %v4294_v2, %v927_v52  ;;  %v5462_v44 = vld [vmem:[#allocation53_spill] sm:$0xff]  ;;  %v5463_v52 = vld [vmem:[#allocation67_spill] sm:$0xff] }
 0x48d   : > { %5454 = vst [vmem:[#allocation35_spill] sm:$0xff] %v4539_v19  ;;  %v4543_v29 = vpop.permute.xlu0 %1504  ;;  %v1327_v17 = vpop.permute.xlu1 %1326  ;;  %v5458_v19 = vld [vmem:[#allocation23_spill] sm:$0xff] }
 0x48e   : > { %v1330_v6 = vsel %vm450_vm2, %v4371_v14, %v1327_v17  ;;  %v1331_v62 = vsel %vm450_vm2, %v1327_v17, %v4390_v21  ;;  %v1353_v14 = vsel %vm450_vm2, %v5460_v57, %v5444_v3  ;;  %v1513_v21 = vadd.f32 %v4543_v29, %v1491_v5 }
 0x48f   : > { %v1335_v40 = vadd.f32 %v1330_v6, %v5458_v19  ;;  %v1336_v18 = vadd.f32 %v1331_v62, %v5459_v34  ;;  %2458 = vrot.lane.b32.xlu0 %v2451_v12, %s2962_s24  ;;  %2414 = vrot.lane.b32.xlu1 %v2407_v36, %s2961_s25  ;;  %v1165_v34 = vadd.f32 %v4451_v28, %v1143_v61  ;;  %v5465_v61 = vld [vmem:[#allocation50_spill] sm:$0xff]  ;;  %s4596_s25 = sld [smem:[#allocation7 + $0x4]] }
 0x490   : > { %v1396_v28 = vsel %vm491_vm3, %v5463_v52, %v5462_v44  ;;  %v2452_v52 = vmul.f32 %v2449_v51, %v3715_v32 }
 0x491   : > { %v4571_v19 = vpop.permute.xlu0 %1544  ;;  %v1357_v17 = vadd.f32 %v1352_v4, %v1335_v40  ;;  %v1358_v12 = vadd.f32 %v1353_v14, %v1336_v18  ;;  %v1371_v36 = vpop.permute.xlu1 %1370  ;;  %v1397_v18 = vsel %vm491_vm3, %v5462_v44, %v5447_v54  ;;  %v5464_v40 = vld [vmem:[#allocation81_spill] sm:$0xff]  ;;  %v1187_v49 = vadd.f32 %v5445_v47, %v1165_v34  ;;  %v5466_v47 = vld [vmem:[#allocation56_spill] sm:$0xff] }
 0x492   : > { %v1374_v6 = vsel %vm491_vm3, %v4405_v11, %v1371_v36  ;;  %v1375_v62 = vsel %vm491_vm3, %v1371_v36, %v4431_v23  ;;  %v1535_v5 = vadd.f32 %v5464_v40, %v1513_v21  ;;  %v2450_v11 = vmul.f32 %v2449_v51, %v3255_v46 }
 0x493   : > { %v1379_v3 = vadd.f32 %v1374_v6, %v1357_v17  ;;  %v1380_v57 = vadd.f32 %v1375_v62, %v1358_v12  ;;  %2482 = vrot.lane.b32.xlu0 %v2474_v45, %s2962_s24  ;;  %2154 = vrot.lane.b32.xlu1 %v2147_v25, %s2962_s24  ;;  %v971_v23 = vadd.f32 %v5465_v61, %v949_v30  ;;  %v5467_v30 = vld [vmem:[#allocation71_spill] sm:$0xff] }
 0x494   : > { %v1209_v54 = vadd.f32 %v4489_v42, %v1187_v49  ;;  %v1440_v34 = vsel %vm532_vm4, %v5467_v30, %v5466_v47  ;;  %v5470_v49 = vld [vmem:[#allocation75_spill] sm:$0xff] }
 0x495   : > { %v1549_v4 = vpop.permute.xlu0 %1548  ;;  %v1401_v45 = vadd.f32 %v1396_v28, %v1379_v3  ;;  %v1402_v14 = vadd.f32 %v1397_v18, %v1380_v57  ;;  %v1415_v25 = vpop.permute.xlu1 %1414  ;;  %v4636_v30 = vstv %s4596_s25 }
 0x496   : > { %v1557_v17 = vadd.f32 %v1549_v4, %v1535_v5  ;;  %v1418_v12 = vsel %vm532_vm4, %v4449_v58, %v1415_v25  ;;  %v1419_v36 = vsel %vm532_vm4, %v1415_v25, %v4471_v37  ;;  %v1441_v58 = vsel %vm532_vm4, %v5466_v47, %v5453_v8  ;;  %v5468_v37 = vld [vmem:[#allocation85_spill] sm:$0xff] }
 0x497   : > { %v1423_v21 = vadd.f32 %v1418_v12, %v1401_v45  ;;  %v1424_v6 = vadd.f32 %v1419_v36, %v1402_v14  ;;  %985 = vrot.lane.b32.xlu0 %v971_v23, %s2963_s16  ;;  %2456 = vrot.lane.b32.xlu1 %v2450_v11, %s2962_s24  ;;  %v1231_v5 = vadd.f32 %v5451_v15, %v1209_v54  ;;  %v5469_v23 = vld [vmem:[#allocation58_spill] sm:$0xff] }
 0x498   : > { %v1579_v62 = vadd.f32 %v5468_v37, %v1557_v17  ;;  %v1484_v51 = vsel %vm573_vm5, %v5470_v49, %v5469_v23  ;;  %v2473_v17 = vmul.f32 %v5455_v59, %v3180_v0  ;;  %v4639_v59 = vstv %s4605_s23 }
 0x499   : > { %v1631_v42 = vpop.permute.xlu0 %1630  ;;  %v1445_v3 = vadd.f32 %v1440_v34, %v1423_v21  ;;  %v1446_v57 = vadd.f32 %v1441_v58, %v1424_v6  ;;  %v1459_v44 = vpop.permute.xlu1 %1458  ;;  %v5472_v6 = vld [vmem:[#allocation79_spill] sm:$0xff]  ;;  %v1607_v49 = vmul.f32 %v4636_v30, %v3264_v50  ;;  %v1616_v37 = vmul.f32 %v4639_v59, %v3183_v1 }
 0x49a   : > { %v1462_v28 = vsel %vm573_vm5, %v4487_v60, %v1459_v44  ;;  %v1463_v18 = vsel %vm573_vm5, %v1459_v44, %v4509_v26  ;;  %v1485_v60 = vsel %vm573_vm5, %v5469_v23, %v5457_v10  ;;  %v1253_v26 = vadd.f32 %v4528_v48, %v1231_v5  ;;  %v5471_v10 = vld [vmem:[#allocation60_spill] sm:$0xff] }
 0x49b   : > { %v1467_v11 = vadd.f32 %v1462_v28, %v1445_v3  ;;  %v1468_v8 = vadd.f32 %v1463_v18, %v1446_v57  ;;  %1593 = vrot.lane.b32.xlu0 %v1579_v62, %s2964_s20  ;;  %2460 = vrot.lane.b32.xlu1 %v2452_v52, %s2962_s24  ;;  %v1528_v48 = vsel %vm614_vm6, %v5472_v6, %v5471_v10  ;;  %v5476_v18 = vld [vmem:[#allocation15_spill] sm:$0xff] }
 0x49c   : > { %v1529_v47 = vsel %vm614_vm6, %v5471_v10, %v5464_v40  ;;  %v1606_v57 = vmul.f32 %v4636_v30, %v3255_v46  ;;  %v1614_v5 = vmul.f32 %v4639_v59, %v5476_v18 }
 0x49d   : > { %v1675_v15 = vpop.permute.xlu0 %1674  ;;  %v1489_v45 = vadd.f32 %v1484_v51, %v1467_v11  ;;  %v1490_v14 = vadd.f32 %v1485_v60, %v1468_v8  ;;  %v1503_v25 = vpop.permute.xlu1 %1502  ;;  %v1615_v51 = vmul.f32 %v4639_v59, %v3180_v0  ;;  %v1608_v59 = vmul.f32 %v4636_v30, %v3715_v32 }
 0x49e   : > { %v1506_v12 = vsel %vm614_vm6, %v4526_v41, %v1503_v25  ;;  %v1507_v36 = vsel %vm614_vm6, %v1503_v25, %v4543_v29  ;;  %v5473_v41 = vld [vmem:[#allocation51_spill] sm:$0xff]  ;;  %v1617_v8 = vadd.f32 %v1614_v5, %v1606_v57 }
 0x49f   : > { %v1511_v54 = vadd.f32 %v1506_v12, %v1489_v45  ;;  %v1512_v21 = vadd.f32 %v1507_v36, %v1490_v14  ;;  %2480 = vrot.lane.b32.xlu1 %v2473_v17, %s2962_s24  ;;  %v1275_v34 = vadd.f32 %v5473_v41, %v1253_v26  ;;  %s2965_s24 = smov 126   ;;  %v1618_v26 = vadd.f32 %v1615_v51, %v1607_v49  ;;  %v5477_v17 = vld [vmem:[#allocation87_spill] sm:$0xff]  ;;  %v5478_v12 = vld [vmem:[#allocation64_spill] sm:$0xff] }
 0x4a0   : > { %v1656_v36 = vsel %vm450_vm2, %v5478_v12, %v5477_v17  ;;  %v5481_v49 = vld [vmem:[#allocation68_spill] sm:$0xff] }
 0x4a1   : > { %v1719_v58 = vpop.permute.xlu0 %1718  ;;  %v1533_v29 = vadd.f32 %v1528_v48, %v1511_v54  ;;  %v1534_v62 = vadd.f32 %v1529_v47, %v1512_v21  ;;  %v1547_v3 = vpop.permute.xlu1 %1546  ;;  %v2213_v47 = vstv %s2732_s5  ;;  %s2541_s5 = scalar_lea.sflag [#allocation5], %s3132_s18 }
 0x4a2   : > { %v1550_v44 = vsel %vm655_vm7, %v4571_v19, %v1547_v3  ;;  %v1551_v52 = vsel %vm655_vm7, %v1547_v3, %v1549_v4  ;;  %v2216_v5 = vmul.f32 %v2213_v47, %v3715_v32 }
 0x4a3   : > { %v4647_v28 = vadd.f32 %v1550_v44, %v1533_v29  ;;  %v4649_v40 = vadd.f32 %v1551_v52, %v1534_v62  ;;  %1289 = vrot.lane.b32.xlu1 %v1275_v34, %s2965_s24  ;;  %v2221_v34 = vstv %s2733_s11  ;;  %v5479_v29 = vld [vmem:[#allocation66_spill] sm:$0xff] }
 0x4a4   : > { %v1657_v62 = vsel %vm450_vm2, %v5477_v17, %v5479_v29 }
 0x4a5   : > { %5474 = vst [vmem:[#allocation128_spill] sm:$0xff] %v4647_v28  ;;  %5475 = vst [vmem:[#allocation21_spill] sm:$0xff] %v4649_v40  ;;  %v1763_v11 = vpop.permute.xlu0 %1762  ;;  %v1629_v23 = vpop.permute.xlu1 %1628  ;;  %v2215_v40 = vmul.f32 %v2213_v47, %v3264_v50 }
 0x4a6   : > { %v1634_v19 = vsel %vm450_vm2, %v1629_v23, %v1631_v42  ;;  %v5480_v23 = vld [vmem:[#allocation89_spill] sm:$0xff] }
 0x4a7   : > { %v1639_v4 = vadd.f32 %v1634_v19, %v1617_v8  ;;  %v1700_v19 = vsel %vm491_vm3, %v5481_v49, %v5480_v23 }
 0x4a9   : > { %v4659_v60 = vpop.permute.xlu0 %1932  ;;  %v4661_v45 = vpop.permute.xlu1 %1632  ;;  %v1661_v21 = vadd.f32 %v1656_v36, %v1639_v4  ;;  %v5482_v36 = vld [vmem:[#allocation70_spill] sm:$0xff] }
 0x4aa   : > { %v1635_v14 = vsel %vm450_vm2, %v1631_v42, %v4661_v45  ;;  %v2224_v42 = vmul.f32 %v2221_v34, %v3183_v1 }
 0x4ab   : > { %v1640_v25 = vadd.f32 %v1635_v14, %v1618_v26 }
 0x4ac   : > { %v2227_v4 = vadd.f32 %v2224_v42, %v2216_v5 }
 0x4ad   : > { %v4668_v54 = vpop.permute.xlu0 %1936  ;;  %v1673_v10 = vpop.permute.xlu1 %1672  ;;  %v1662_v57 = vadd.f32 %v1657_v62, %v1640_v25 }
 0x4ae   : > { %v1678_v6 = vsel %vm491_vm3, %v1673_v10, %v1675_v15 }
 0x4af   : > { %v1683_v48 = vadd.f32 %v1678_v6, %v1661_v21  ;;  %v1701_v21 = vsel %vm491_vm3, %v5480_v23, %v5482_v36 }
 0x4b1   : > { %v4675_v3 = vpop.permute.xlu0 %2236  ;;  %v4677_v44 = vpop.permute.xlu1 %1676  ;;  %v1705_v26 = vadd.f32 %v1700_v19, %v1683_v48  ;;  %v5483_v48 = vld [vmem:[#allocation91_spill] sm:$0xff] }
 0x4b2   : > { %v1679_v52 = vsel %vm491_vm3, %v1675_v15, %v4677_v44 }
 0x4b3   : > { %v1684_v8 = vadd.f32 %v1679_v52, %v1662_v57  ;;  %v5484_v57 = vld [vmem:[#allocation72_spill] sm:$0xff] }
 0x4b4   : > { %v1744_v52 = vsel %vm532_vm4, %v5484_v57, %v5483_v48 }
 0x4b5   : > { %v2241_v51 = vpop.permute.xlu0 %2240  ;;  %v1717_v14 = vpop.permute.xlu1 %1716  ;;  %v1706_v10 = vadd.f32 %v1701_v21, %v1684_v8  ;;  %v5486_v8 = vld [vmem:[#allocation74_spill] sm:$0xff] }
 0x4b6   : > { %v2249_v17 = vadd.f32 %v2241_v51, %v2227_v4  ;;  %v1722_v12 = vsel %vm532_vm4, %v1717_v14, %v1719_v58 }
 0x4b7   : > { %v1727_v25 = vadd.f32 %v1722_v12, %v1705_v26  ;;  %v1745_v26 = vsel %vm532_vm4, %v5483_v48, %v5486_v8  ;;  %v723_v48 = vsel %vm450_vm2, %v4271_v31, %v5432_v13  ;;  %v2214_v13 = vmul.f32 %v2213_v47, %v3255_v46 }
 0x4b9   : > { %v4689_v15 = vpop.permute.xlu0 %1978  ;;  %v4691_v6 = vpop.permute.xlu1 %1720  ;;  %v1749_v49 = vadd.f32 %v1744_v52, %v1727_v25  ;;  %v1909_v52 = vstv %s2718_s15 }
 0x4ba   : > { %v1723_v62 = vsel %vm532_vm4, %v1719_v58, %v4691_v6  ;;  %v5487_v58 = vld [vmem:[#allocation84_spill] sm:$0xff] }
 0x4bb   : > { %v1728_v42 = vadd.f32 %v1723_v62, %v1706_v10  ;;  %v2271_v14 = vadd.f32 %v5487_v58, %v2249_v17 }
 0x4bd   : > { %v4698_v5 = vpop.permute.xlu0 %2280  ;;  %v1761_v19 = vpop.permute.xlu1 %1760  ;;  %v1750_v21 = vadd.f32 %v1745_v26, %v1728_v42  ;;  %v1910_v42 = vmul.f32 %v1909_v52, %v3255_v46  ;;  %v2223_v46 = vmul.f32 %v2221_v34, %v3180_v0 }
 0x4be   : > { %v1766_v23 = vsel %vm573_vm5, %v1761_v19, %v1763_v11 }
 0x4bf   : > { %v4701_v4 = vadd.f32 %v1766_v23, %v1749_v49  ;;  %v1917_v49 = vstv %s2719_s17  ;;  %v1911_v23 = vmul.f32 %v1909_v52, %v3264_v50 }
 0x4c0   : > { %v1918_v26 = vmul.f32 %v1917_v49, %v5476_v18 }
 0x4c1   : > { %5485 = vst [vmem:[#allocation54_spill] sm:$0xff] %v4701_v4  ;;  %v4707_v12 = vpop.permute.xlu0 %2284  ;;  %v4709_v10 = vpop.permute.xlu1 %1764 }
 0x4c2   : > { %v4712_v62 = vadd.f32 %v4707_v12, %v2271_v14  ;;  %v1767_v25 = vsel %vm573_vm5, %v1763_v11, %v4709_v10  ;;  %v1919_v11 = vmul.f32 %v1917_v49, %v3180_v0  ;;  %v5490_v14 = vld [vmem:[#allocation19_spill] sm:$0xff]  ;;  %v1921_v28 = vadd.f32 %v1918_v26, %v1910_v42 }
 0x4c3   : > { %v4716_v57 = vadd.f32 %v1767_v25, %v1750_v21  ;;  %v728_v21 = vadd.f32 %v723_v48, %v5490_v14  ;;  %v2222_v48 = vmul.f32 %v2221_v34, %v5476_v18  ;;  %v5492_v14 = vld [vmem:[#allocation25_spill] sm:$0xff]  ;;  %v5493_v34 = vld [vmem:[#allocation80_spill] sm:$0xff] }
 0x4c4   : > { %5488 = vst [vmem:[#allocation37_spill] sm:$0xff] %v4712_v62  ;;  %v745_v42 = vsel %vm450_vm2, %v5492_v14, %v5437_v22 }
 0x4c5   : > { %5489 = vst [vmem:[#allocation22_spill] sm:$0xff] %v4716_v57  ;;  %v4721_v17 = vpop.permute.xlu0 %2022  ;;  %v4723_v19 = vpop.permute.xlu1 %1804  ;;  %v1922_v57 = vadd.f32 %v1919_v11, %v1911_v23  ;;  %v750_v50 = vadd.f32 %v745_v42, %v728_v21  ;;  %v2225_v18 = vadd.f32 %v2222_v48, %v2214_v13  ;;  %v5496_v42 = vld [vmem:[#allocation126_spill] sm:$0xff] }
 0x4c9   : > { %v4730_v25 = vpop.permute.xlu0 %2324  ;;  %v1935_v62 = vpop.permute.xlu1 %1934 }
 0x4ca   : > { %5491 = vst [vmem:[#allocation32_spill] sm:$0xff] %v4730_v25  ;;  %v1938_v4 = vsel %vm450_vm2, %v4659_v60, %v1935_v62  ;;  %v1939_v41 = vsel %vm450_vm2, %v1935_v62, %v4668_v54  ;;  %v767_v60 = vsel %vm491_vm3, %v4287_v63, %v4125_v24  ;;  %v2226_v62 = vadd.f32 %v2223_v46, %v2215_v40 }
 0x4cb   : > { %v1943_v23 = vadd.f32 %v1938_v4, %v1921_v28  ;;  %v4744_v26 = vadd.f32 %v1939_v41, %v1922_v57  ;;  %v1619_v25 = vadd.f32 %v1616_v37, %v1608_v59  ;;  %v5494_v4 = vld [vmem:[#allocation95_spill] sm:$0xff]  ;;  %v772_v57 = vadd.f32 %v767_v60, %v750_v50 }
 0x4cc   : > { %v1960_v30 = vsel %vm450_vm2, %v5494_v4, %v5493_v34  ;;  %v722_v46 = vsel %vm450_vm2, %v5496_v42, %v4271_v31 }
 0x4cd   : > { %v4752_v47 = vpop.permute.xlu0 %2328  ;;  %v2239_v11 = vpop.permute.xlu1 %2238  ;;  %v1641_v24 = vadd.f32 %v4661_v45, %v1619_v25  ;;  %v1965_v13 = vadd.f32 %v1960_v30, %v1943_v23  ;;  %v811_v25 = vsel %vm532_vm4, %v4296_v27, %v4165_v55  ;;  %v1912_v55 = vmul.f32 %v1909_v52, %v3715_v32 }
 0x4ce   : > { %v2242_v22 = vsel %vm450_vm2, %v4675_v3, %v2239_v11  ;;  %v2243_v41 = vsel %vm450_vm2, %v2239_v11, %v2241_v51  ;;  %v5495_v3 = vld [vmem:[#allocation26_spill] sm:$0xff] }
 0x4cf   : > { %v2247_v0 = vadd.f32 %v2242_v22, %v2225_v18  ;;  %v2248_v28 = vadd.f32 %v2243_v41, %v2226_v62  ;;  %v789_v51 = vsel %vm491_vm3, %v5495_v3, %v5443_v33  ;;  %v1663_v45 = vadd.f32 %v5479_v29, %v1641_v24  ;;  %v5497_v18 = vld [vmem:[#allocation18_spill] sm:$0xff]  ;;  %v5498_v62 = vld [vmem:[#allocation99_spill] sm:$0xff] }
 0x4d0   : > { %v794_v50 = vadd.f32 %v789_v51, %v772_v57  ;;  %v727_v33 = vadd.f32 %v722_v46, %v5497_v18  ;;  %v5499_v11 = vld [vmem:[#allocation82_spill] sm:$0xff]  ;;  %v2265_v31 = vsel %vm450_vm2, %v5498_v62, %v5487_v58  ;;  %v1920_v41 = vmul.f32 %v1917_v49, %v3183_v1  ;;  %v5500_v24 = vld [vmem:[#allocation31_spill] sm:$0xff]  ;;  %v5503_v18 = vld [vmem:[#allocation33_spill] sm:$0xff] }
 0x4d1   : > { %v4761_v21 = vpop.permute.xlu0 %2066  ;;  %v1977_v40 = vpop.permute.xlu1 %1976  ;;  %v1685_v60 = vadd.f32 %v4677_v44, %v1663_v45  ;;  %v2264_v22 = vsel %vm450_vm2, %v5499_v11, %v5498_v62  ;;  %v2270_v57 = vadd.f32 %v2265_v31, %v2248_v28  ;;  %v5501_v1 = vld [vmem:[#allocation27_spill] sm:$0xff]  ;;  %v5502_v28 = vld [vmem:[#allocation129_spill] sm:$0xff]  ;;  %v5505_v11 = vld [vmem:[#allocation28_spill] sm:$0xff] }
 0x4d2   : > { %v1982_v37 = vsel %vm491_vm3, %v1977_v40, %v4689_v15  ;;  %v816_v29 = vadd.f32 %v811_v25, %v794_v50  ;;  %v2269_v30 = vadd.f32 %v2264_v22, %v2247_v0  ;;  %v833_v32 = vsel %vm532_vm4, %v5501_v1, %v5446_v53 }
 0x4d3   : > { %v4768_v48 = vadd.f32 %v1982_v37, %v1965_v13  ;;  %v744_v13 = vsel %vm450_vm2, %v5500_v24, %v5492_v14  ;;  %v1707_v40 = vadd.f32 %v5482_v36, %v1685_v60  ;;  %v766_v14 = vsel %vm491_vm3, %v5502_v28, %v4287_v63  ;;  %v5507_v24 = vld [vmem:[#allocation103_spill] sm:$0xff] }
 0x4d4   : > { %v749_v52 = vadd.f32 %v744_v13, %v727_v33  ;;  %v838_v36 = vadd.f32 %v833_v32, %v816_v29  ;;  %v1923_v51 = vadd.f32 %v1920_v41, %v1912_v55  ;;  %v877_v22 = vsel %vm573_vm5, %v5505_v11, %v5452_v7  ;;  %v5506_v55 = vld [vmem:[#allocation78_spill] sm:$0xff] }
 0x4d5   : > { %v4777_v23 = vpop.permute.xlu0 %1808  ;;  %v1981_v59 = vpop.permute.xlu1 %1980  ;;  %v899_v41 = vsel %vm614_vm6, %v4317_v16, %v4269_v9 }
 0x4d6   : > { %v1945_v46 = vadd.f32 %v4668_v54, %v1923_v51  ;;  %v771_v50 = vadd.f32 %v766_v14, %v749_v52  ;;  %v854_v14 = vsel %vm573_vm5, %v4183_v38, %v4307_v43  ;;  %v1983_v51 = vsel %vm491_vm3, %v4689_v15, %v1981_v59 }
 0x4d9   : > { %v4789_v4 = vpop.permute.xlu0 %2368  ;;  %v2283_v44 = vpop.permute.xlu1 %2282 }
 0x4da   : > { %v2286_v37 = vsel %vm491_vm3, %v4698_v5, %v2283_v44  ;;  %v2287_v58 = vsel %vm491_vm3, %v2283_v44, %v4707_v12  ;;  %v1729_v5 = vadd.f32 %v4691_v6, %v1707_v40  ;;  %v855_v12 = vsel %vm573_vm5, %v4307_v43, %v4214_v20  ;;  %v5504_v20 = vld [vmem:[#allocation97_spill] sm:$0xff] }
 0x4db   : > { %v4802_v49 = vadd.f32 %v2286_v37, %v2269_v30  ;;  %v4804_v0 = vadd.f32 %v2287_v58, %v2270_v57  ;;  %v860_v45 = vadd.f32 %v855_v12, %v838_v36  ;;  %v788_v6 = vsel %vm491_vm3, %v5503_v18, %v5495_v3  ;;  %v5509_v58 = vld [vmem:[#allocation29_spill] sm:$0xff] }
 0x4dc   : > { %v1751_v25 = vadd.f32 %v5486_v8, %v1729_v5  ;;  %v1967_v62 = vadd.f32 %v5504_v20, %v1945_v46  ;;  %v793_v54 = vadd.f32 %v788_v6, %v771_v50  ;;  %v810_v8 = vsel %vm532_vm4, %v4142_v35, %v4296_v27  ;;  %v5508_v27 = vld [vmem:[#allocation36_spill] sm:$0xff]  ;;  %v5510_v5 = vld [vmem:[#allocation117_spill] sm:$0xff]  ;;  %v5512_v6 = vld [vmem:[#allocation123_spill] sm:$0xff] }
 0x4dd   : > { %v4813_v42 = vpop.permute.xlu0 %2372  ;;  %v4815_v53 = vpop.permute.xlu1 %2020  ;;  %v882_v31 = vadd.f32 %v877_v22, %v860_v45  ;;  %v832_v9 = vsel %vm532_vm4, %v5508_v27, %v5501_v1  ;;  %v921_v32 = vsel %vm614_vm6, %v5509_v58, %v5456_v39  ;;  %v1961_v52 = vsel %vm450_vm2, %v5493_v34, %v5504_v20  ;;  %v5511_v45 = vld [vmem:[#allocation109_spill] sm:$0xff]  ;;  %v5518_v27 = vld [vmem:[#allocation44_spill] sm:$0xff] }
 0x4de   : > { %v1773_v33 = vadd.f32 %v4709_v10, %v1751_v25  ;;  %v1989_v29 = vadd.f32 %v1981_v59, %v1967_v62  ;;  %v815_v57 = vadd.f32 %v810_v8, %v793_v54  ;;  %v943_v12 = vsel %vm655_vm7, %v4327_v56, %v4294_v2  ;;  %v5513_v2 = vld [vmem:[#allocation40_spill] sm:$0xff]  ;;  %v5514_v62 = vld [vmem:[#allocation86_spill] sm:$0xff] }
 0x4df   : > { %v904_v44 = vadd.f32 %v899_v41, %v882_v31  ;;  %v1966_v39 = vadd.f32 %v1961_v52, %v4744_v26  ;;  %v876_v26 = vsel %vm573_vm5, %v5513_v2, %v5505_v11  ;;  %v2005_v22 = vsel %vm491_vm3, %v5514_v62, %v5507_v24  ;;  %v5515_v8 = vld [vmem:[#allocation30_spill] sm:$0xff]  ;;  %v5521_v52 = vld [vmem:[#allocation76_spill] sm:$0xff] }
 0x4e0   : > { %v1795_v30 = vadd.f32 %v5506_v55, %v1773_v33  ;;  %v2011_v13 = vadd.f32 %v5507_v24, %v1989_v29  ;;  %v837_v28 = vadd.f32 %v832_v9, %v815_v57  ;;  %v965_v31 = vsel %vm655_vm7, %v5515_v8, %v5465_v61  ;;  %v5519_v61 = vld [vmem:[#allocation48_spill] sm:$0xff]  ;;  %v5529_v2 = vld [vmem:[#allocation62_spill] sm:$0xff] }
 0x4e1   : > { %v4819_v60 = vpop.permute.xlu0 %2108  ;;  %v2025_v63 = vpop.permute.xlu1 %2024  ;;  %v926_v36 = vadd.f32 %v921_v32, %v904_v44  ;;  %v1988_v43 = vadd.f32 %v1983_v51, %v1966_v39  ;;  %v5517_v44 = vld [vmem:[#allocation115_spill] sm:$0xff]  ;;  %v920_v9 = vsel %vm614_vm6, %v5518_v27, %v5509_v58  ;;  %v5520_v32 = vld [vmem:[#allocation93_spill] sm:$0xff]  ;;  %v5525_v39 = vld [vmem:[#allocation54_spill] sm:$0xff] }
 0x4e2   : > { %v1817_v7 = vadd.f32 %v4777_v23, %v1795_v30  ;;  %v2033_v37 = vadd.f32 %v2025_v63, %v2011_v13  ;;  %v859_v38 = vadd.f32 %v854_v14, %v837_v28  ;;  %v2027_v54 = vsel %vm532_vm4, %v4721_v17, %v2025_v63  ;;  %v5516_v30 = vld [vmem:[#allocation132_spill] sm:$0xff]  ;;  %v5522_v14 = vld [vmem:[#allocation61_spill] sm:$0xff]  ;;  %v5524_v58 = vld [vmem:[#allocation51_spill] sm:$0xff] }
 0x4e3   : > { %v948_v18 = vadd.f32 %v943_v12, %v926_v36  ;;  %v2010_v41 = vadd.f32 %v2005_v22, %v1988_v43  ;;  %v898_v11 = vsel %vm614_vm6, %v5516_v30, %v4317_v16  ;;  %v1788_v16 = vsel %vm573_vm5, %v5521_v52, %v5520_v32  ;;  %v5523_v36 = vld [vmem:[#allocation49_spill] sm:$0xff]  ;;  %v5527_v43 = vld [vmem:[#allocation16_spill] sm:$0xff] }
 0x4e4   : > { %v1839_v1 = vadd.f32 %v5510_v5, %v1817_v7  ;;  %v2055_v25 = vadd.f32 %v5511_v45, %v2033_v37  ;;  %v881_v29 = vadd.f32 %v876_v26, %v859_v38  ;;  %v4900_v37 = vsel %vm655_vm7, %v5519_v61, %v5515_v8  ;;  %v5532_v30 = vld [vmem:[#allocation88_spill] sm:$0xff] }
 0x4e5   : > { %v4835_v3 = vpop.permute.xlu0 %2112  ;;  %v4837_v10 = vpop.permute.xlu1 %2326  ;;  %v970_v57 = vadd.f32 %v965_v31, %v948_v18  ;;  %v2032_v24 = vadd.f32 %v2027_v54, %v2010_v41  ;;  %v1268_v51 = vsel %vm655_vm7, %v5523_v36, %v5522_v14  ;;  %v1789_v22 = vsel %vm573_vm5, %v5520_v32, %v5506_v55  ;;  %v5531_v41 = vld [vmem:[#allocation105_spill] sm:$0xff]  ;;  %v5534_v55 = vld [vmem:[#allocation98_spill] sm:$0xff]  ;;  %v5535_v27 = vld [vmem:[#allocation100_spill] sm:$0xff] }
 0x4e6   : > { %v903_v12 = vadd.f32 %v898_v11, %v881_v29  ;;  %v5530_v29 = vld [vmem:[#allocation101_spill] sm:$0xff]  ;;  %v2308_v11 = vsel %vm491_vm3, %v5532_v30, %v5531_v41  ;;  %v5536_v61 = vld [vmem:[#allocation116_spill] sm:$0xff] }
 0x4e7   : > { %v1832_v32 = vsel %vm614_vm6, %v5536_v61, %v5535_v27 }
 0x4e8   : > { %v925_v52 = vadd.f32 %v920_v9, %v903_v12  ;;  %v5541_v9 = vld [vmem:[#allocation37_spill] sm:$0xff] }
 0x4e9   : > { %v4842_v40 = vpop.permute.xlu0 %1848  ;;  %v4844_v35 = vpop.permute.xlu1 %2064 }
 0x4ed   : > { %v4865_v46 = vpop.permute.xlu0 %1852  ;;  %v2069_v34 = vpop.permute.xlu1 %2068 }
 0x4ee   : > { %v1861_v50 = vadd.f32 %v4865_v46, %v1839_v1  ;;  %v2077_v59 = vadd.f32 %v2069_v34, %v2055_v25  ;;  %v4915_v1 = vsel %vm655_vm7, %v5522_v14, %v5524_v58  ;;  %v5526_v25 = vld [vmem:[#allocation92_spill] sm:$0xff]  ;;  %v2071_v18 = vsel %vm573_vm5, %v4761_v21, %v2069_v34  ;;  %v5539_v58 = vld [vmem:[#allocation121_spill] sm:$0xff] }
 0x4ef   : > { %v2049_v38 = vsel %vm532_vm4, %v5526_v25, %v5511_v45  ;;  %v2004_v34 = vsel %vm491_vm3, %v5530_v29, %v5514_v62  ;;  %v2026_v62 = vsel %vm532_vm4, %v4815_v53, %v4721_v17  ;;  %v2313_v17 = vadd.f32 %v2308_v11, %v4802_v49  ;;  %v5545_v11 = vld [vmem:[#allocation112_spill] sm:$0xff] }
 0x4f0   : > { %v1883_v15 = vadd.f32 %v5512_v6, %v1861_v50  ;;  %v2099_v7 = vadd.f32 %v5517_v44, %v2077_v59  ;;  %v1793_v50 = vadd.f32 %v1788_v16, %v5525_v39  ;;  %v5528_v59 = vld [vmem:[#allocation85_spill] sm:$0xff]  ;;  %v2054_v54 = vadd.f32 %v2049_v38, %v2032_v24 }
 0x4f1   : > { %v4870_v33 = vpop.permute.xlu0 %2412  ;;  %v4872_v20 = vpop.permute.xlu1 %1806  ;;  %v1573_v26 = vsel %vm655_vm7, %v5529_v2, %v5528_v59  ;;  %v2093_v24 = vsel %vm573_vm5, %v5534_v55, %v5517_v44  ;;  %v2009_v36 = vadd.f32 %v2004_v34, %v4768_v48  ;;  %v5544_v34 = vld [vmem:[#allocation122_spill] sm:$0xff] }
 0x4f2   : > { %1897 = vrot.lane.b32.xlu1 %v1883_v15, %s2966_s12  ;;  %v1810_v28 = vsel %vm614_vm6, %v4723_v19, %v4872_v20  ;;  %v1273_v19 = vadd.f32 %v1268_v51, %v5527_v43  ;;  %v2121_v15 = vadd.f32 %v4835_v3, %v2099_v7  ;;  %v2076_v16 = vadd.f32 %v2071_v18, %v2054_v54  ;;  %v5538_v51 = vld [vmem:[#allocation32_spill] sm:$0xff] }
 0x4f3   : > { %v1815_v8 = vadd.f32 %v1810_v28, %v1793_v50  ;;  %v5537_v28 = vld [vmem:[#allocation21_spill] sm:$0xff]  ;;  %v2330_v44 = vsel %vm532_vm4, %v5538_v51, %v4837_v10  ;;  %v2031_v18 = vadd.f32 %v2026_v62, %v2009_v36  ;;  %v5546_v62 = vld [vmem:[#allocation111_spill] sm:$0xff] }
 0x4f4   : > { %v1578_v14 = vadd.f32 %v1573_v26, %v5537_v28  ;;  %v2143_v39 = vadd.f32 %v5539_v58, %v2121_v15  ;;  %v5540_v50 = vld [vmem:[#allocation137_spill] sm:$0xff]  ;;  %v2335_v54 = vadd.f32 %v2330_v44, %v2313_v17  ;;  %v2098_v49 = vadd.f32 %v2093_v24, %v2076_v16  ;;  %v5547_v16 = vld [vmem:[#allocation94_spill] sm:$0xff] }
 0x4f5   : > { %v4890_v13 = vpop.permute.xlu0 %2416  ;;  %v4892_v63 = vpop.permute.xlu1 %2370  ;;  %v942_v38 = vsel %vm655_vm7, %v5540_v50, %v4327_v56  ;;  %v1837_v43 = vadd.f32 %v1832_v32, %v1815_v8  ;;  %v5542_v56 = vld [vmem:[#allocation107_spill] sm:$0xff]  ;;  %v5543_v8 = vld [vmem:[#allocation106_spill] sm:$0xff]  ;;  %v2352_v28 = vsel %vm532_vm4, %v5547_v16, %v5546_v62 }
 0x4f6   : > { %983 = vrot.lane.b32.xlu1 %v970_v57, %s2963_s16  ;;  %v5533_v57 = vld [vmem:[#allocation90_spill] sm:$0xff]  ;;  %v2048_v26 = vsel %vm532_vm4, %v5542_v56, %v5526_v25  ;;  %v947_v30 = vadd.f32 %v942_v38, %v925_v52  ;;  %v2070_v25 = vsel %vm573_vm5, %v4844_v35, %v4761_v21  ;;  %v2374_v36 = vsel %vm573_vm5, %v4789_v4, %v4892_v63  ;;  %v5551_v38 = vld [vmem:[#allocation113_spill] sm:$0xff] }
 0x4f7   : > { %v2309_v7 = vsel %vm491_vm3, %v5531_v41, %v5533_v57  ;;  %v2315_v12 = vadd.f32 %v5533_v57, %v5541_v9  ;;  %v1876_v41 = vsel %vm655_vm7, %v5544_v34, %v5543_v8  ;;  %v2092_v9 = vsel %vm573_vm5, %v5551_v38, %v5534_v55  ;;  %v5563_v38 = vld [vmem:[#allocation114_spill] sm:$0xff] }
 0x4f8   : > { %v2314_v52 = vadd.f32 %v2309_v7, %v4804_v0  ;;  %v1811_v0 = vsel %vm614_vm6, %v4872_v20, %v4777_v23  ;;  %v2357_v7 = vadd.f32 %v2352_v28, %v2335_v54  ;;  %v969_v4 = vadd.f32 %v4900_v37, %v947_v30  ;;  %v5553_v23 = vld [vmem:[#allocation118_spill] sm:$0xff]  ;;  %v5555_v54 = vld [vmem:[#allocation35_spill] sm:$0xff] }
 0x4f9   : > { %v4931_v31 = vpop.permute.xlu0 %2152  ;;  %v4933_v45 = vpop.permute.xlu1 %2110 }
 0x4fa   : > { %1285 = vrot.lane.b32.xlu1 %v1273_v19, %s2965_s24  ;;  %v2115_v48 = vsel %vm614_vm6, %v4933_v45, %v4835_v3  ;;  %v2337_v3 = vadd.f32 %v4752_v47, %v2315_v12  ;;  %v2114_v56 = vsel %vm614_vm6, %v4819_v60, %v4933_v45 }
 0x4fb   : > { %v2120_v61 = vadd.f32 %v2115_v48, %v2098_v49  ;;  %v5554_v48 = vld [vmem:[#allocation127_spill] sm:$0xff]  ;;  %v1274_v49 = vadd.f32 %v4915_v1, %v5555_v54 }
 0x4fc   : > { %v2181_v37 = vsel %vm655_vm7, %v5554_v48, %v5545_v11  ;;  %v5556_v1 = vld [vmem:[#allocation83_spill] sm:$0xff] }
 0x4fd   : > { %v2157_v53 = vpop.permute.xlu0 %2156  ;;  %v1851_v19 = vpop.permute.xlu1 %1850 }
 0x4fe   : > { %v2165_v59 = vadd.f32 %v2157_v53, %v2143_v39  ;;  %v1854_v15 = vsel %vm655_vm7, %v4842_v40, %v1851_v19  ;;  %1591 = vrot.lane.b32.xlu1 %v1578_v14, %s2964_s20  ;;  %v2331_v40 = vsel %vm532_vm4, %v4837_v10, %v4752_v47  ;;  %v2053_v14 = vadd.f32 %v2048_v26, %v2031_v18  ;;  %v5548_v47 = vld [vmem:[#allocation96_spill] sm:$0xff]  ;;  %v5550_v39 = vld [vmem:[#allocation22_spill] sm:$0xff] }
 0x4ff   : > { %v1859_v29 = vadd.f32 %v1854_v15, %v1837_v43  ;;  %v2353_v21 = vsel %vm532_vm4, %v5546_v62, %v5548_v47  ;;  %v5549_v10 = vld [vmem:[#allocation104_spill] sm:$0xff]  ;;  %v2336_v51 = vadd.f32 %v2331_v40, %v2314_v52  ;;  %v1794_v50 = vadd.f32 %v1789_v22, %v5550_v39  ;;  %v5552_v18 = vld [vmem:[#allocation102_spill] sm:$0xff] }
 0x500   : > { %v2187_v57 = vadd.f32 %v5545_v11, %v2165_v59  ;;  %v2137_v35 = vsel %vm614_vm6, %v5549_v10, %v5539_v58  ;;  %v2075_v44 = vadd.f32 %v2070_v25, %v2053_v14  ;;  %v2359_v12 = vadd.f32 %v5548_v47, %v2337_v3  ;;  %v5560_v14 = vld [vmem:[#allocation108_spill] sm:$0xff] }
 0x501   : > { %v1881_v24 = vadd.f32 %v1876_v41, %v1859_v29  ;;  %v2415_v32 = vpop.permute.xlu1 %2414  ;;  %v2379_v58 = vadd.f32 %v2374_v36, %v2357_v7  ;;  %v2142_v17 = vadd.f32 %v2137_v35, %v2120_v61  ;;  %v2396_v20 = vsel %vm573_vm5, %v5553_v23, %v5552_v18  ;;  %v5559_v61 = vld [vmem:[#allocation120_spill] sm:$0xff]  ;;  %v2459_v16 = vpop.permute.xlu0 %2458 }
 0x502   : > { %2201 = vrot.lane.b32.xlu0 %v2187_v57, %s2967_s13  ;;  %v1816_v59 = vadd.f32 %v1811_v0, %v1794_v50  ;;  %v2381_v55 = vadd.f32 %v4813_v42, %v2359_v12  ;;  %v2375_v15 = vsel %vm573_vm5, %v4892_v63, %v4813_v42  ;;  %v2358_v29 = vadd.f32 %v2353_v21, %v2336_v51  ;;  %v5561_v36 = vld [vmem:[#allocation124_spill] sm:$0xff]  ;;  %v5562_v51 = vld [vmem:[#allocation125_spill] sm:$0xff]  ;;  %v5564_v12 = vld [vmem:[#allocation110_spill] sm:$0xff] }
 0x503   : > { %1893 = vrot.lane.b32.xlu1 %v1881_v24, %s2966_s12  ;;  %v2097_v34 = vadd.f32 %v2092_v9, %v2075_v44  ;;  %v1833_v41 = vsel %vm614_vm6, %v5535_v27, %v5510_v5  ;;  %v1855_v42 = vsel %vm655_vm7, %v1851_v19, %v4865_v46  ;;  %v2401_v63 = vadd.f32 %v2396_v20, %v2379_v58  ;;  %v5558_v46 = vld [vmem:[#allocation128_spill] sm:$0xff] }
 0x504   : > { %v2380_v60 = vadd.f32 %v2375_v15, %v2358_v29  ;;  %v1838_v11 = vadd.f32 %v1833_v41, %v1816_v59  ;;  %v1572_v57 = vsel %vm655_vm7, %v5556_v1, %v5529_v2  ;;  %v2136_v24 = vsel %vm614_vm6, %v5559_v61, %v5549_v10  ;;  %v5565_v15 = vld [vmem:[#allocation131_spill] sm:$0xff]  ;;  %v5567_v29 = vld [vmem:[#allocation136_spill] sm:$0xff] }
 0x505   : > { %v2155_v43 = vpop.permute.xlu1 %2154  ;;  %v2119_v45 = vadd.f32 %v2114_v56, %v2097_v34  ;;  %v1577_v27 = vadd.f32 %v1572_v57, %v5558_v46  ;;  %v2419_v2 = vsel %vm614_vm6, %v2415_v32, %v4890_v13  ;;  %v2440_v47 = vsel %vm614_vm6, %v5561_v36, %v5560_v14 }
 0x506   : > { %v2159_v22 = vsel %vm655_vm7, %v2155_v43, %v2157_v53  ;;  %981 = vrot.lane.b32.xlu0 %v969_v4, %s2963_s16  ;;  %v2418_v53 = vsel %vm614_vm6, %v4870_v33, %v2415_v32  ;;  %v5557_v33 = vld [vmem:[#allocation119_spill] sm:$0xff]  ;;  %v1860_v19 = vadd.f32 %v1855_v42, %v1838_v11  ;;  %v2158_v28 = vsel %vm655_vm7, %v4931_v31, %v2155_v43  ;;  %v2483_v43 = vpop.permute.xlu0 %2482  ;;  %s309_s16 = scalar_lea.vmem [#allocation8], %s2645_s19  ;;  %s2887_s19 = sshll.u32 %s2969_s6, 4  ;;  %s2888_s19 = int_to_ptr.vmem [resolvable:$false] %s2887_s19 }
 0x507   : > { %v2164_v26 = vadd.f32 %v2159_v22, %v2142_v17  ;;  %v2403_v40 = vadd.f32 %v5557_v33, %v2381_v55  ;;  %v2423_v25 = vadd.f32 %v2418_v53, %v2401_v63  ;;  %v2397_v5 = vsel %vm573_vm5, %v5552_v18, %v5557_v33  ;;  %v5571_v33 = vld [vmem:[#allocation135_spill] sm:$0xff]  ;;  %s2555_s25 = sshll.u32 %s309_s16, 4  ;;  %s2889_s15 = scalar_lea.vmem %s2888_s19, 512  ;;  %s2556_s25 = int_to_ptr.vmem [resolvable:$true] %s2555_s25 }
 0x508   : > { %v2402_v21 = vadd.f32 %v2397_v5, %v2380_v60  ;;  %v2141_v35 = vadd.f32 %v2136_v24, %v2119_v45  ;;  %v1877_v10 = vsel %vm655_vm7, %v5543_v8, %v5512_v6  ;;  %v2441_v50 = vsel %vm614_vm6, %v5560_v14, %v5562_v51  ;;  %v5569_v45 = vld [vmem:[#allocation130_spill] sm:$0xff]  ;;  %s2883_s11 = scalar_lea.vmem %s2556_s25, 256  ;;  %p2890_p2 = scmp.lt.s32.totalorder %s2556_s25, %s2888_s19 }
 0x509   : > { %v2186_v30 = vadd.f32 %v2181_v37, %v2164_v26  ;;  %v2457_v3 = vpop.permute.xlu1 %2456  ;;  %v2425_v62 = vadd.f32 %v4890_v13, %v2403_v40  ;;  %v2445_v7 = vadd.f32 %v2440_v47, %v2423_v25  ;;  %v1882_v13 = vadd.f32 %v1877_v10, %v1860_v19  ;;  %p2884_p9 = scmp.ne.s32.totalorder %s2556_s25, %s2883_s11  ;;  %p2891_p1 = scmp.lt.s32.totalorder %s2889_s15, %s2883_s11 }
 0x50a   : > { %1287 = vrot.lane.b32.xlu0 %v1274_v49, %s2965_s24  ;;  %v2462_v0 = vsel %vm655_vm7, %v2457_v3, %v2459_v16  ;;  %v2424_v32 = vadd.f32 %v2419_v2, %v2402_v21  ;;  %v2163_v4 = vadd.f32 %v2158_v28, %v2141_v35  ;;  %v2180_v6 = vsel %vm655_vm7, %v5564_v12, %v5554_v48  ;;  %v986_v26 = vpop.permute.xlu0 %985  ;;  %s5142_s24 = scalar_lea.hbm %s5186_s7, %s2754_s10 }
 0x50b   : > { %2199 = vrot.lane.b32.xlu1 %v2186_v30, %s2967_s13  ;;  %v2467_v31 = vadd.f32 %v2462_v0, %v2445_v7  ;;  %v2447_v44 = vadd.f32 %v5562_v51, %v2425_v62  ;;  %vm973_vm14 = vcmp.ge.f32.partialorder %v5565_v15, 2.0  ;;  %vm975_vm15 = vcmp.le.f32.partialorder %v5565_v15, 17.0  ;;  %p2885_p13 = pnand %p2884_p9, %p5582_p11  ;;  %p2892_p0 = por %p2891_p1, %p2890_p2 }
 0x50c   : > { %v2185_v18 = vadd.f32 %v2180_v6, %v2163_v4  ;;  %v2446_v23 = vadd.f32 %v2441_v50, %v2424_v32  ;;  %v422_v56 = vstv %s421_s8  ;;  %vm977_vm1 = vmand %vm973_vm14, %vm975_vm15  ;;  %v5568_v34 = vsel %vm4250_vm12, %v5567_v29, 0.0 }
 0x50d   : > { %v2461_v52 = vpop.permute.xlu1 %2460  ;;  %v691_v53 = vadd.f32 %v5568_v34, %v422_v56  ;;  %vm972_vm2 = vcmp.ge.f32.partialorder %v5569_v45, 2.0  ;;  %vm974_vm3 = vcmp.le.f32.partialorder %v5569_v45, 17.0  ;;  %vm1276_vm5 = vcmp.ge.f32.partialorder %v5569_v45, 1.0  ;;  %p2886_p10 = pneg %p2885_p13 }
 0x50e   : > { %1589 = vrot.lane.b32.xlu0 %v1577_v27, %s2964_s20  ;;  %v2463_v8 = vsel %vm655_vm7, %v2459_v16, %v2461_v52  ;;  %v2469_v58 = vadd.f32 %v2461_v52, %v2447_v44  ;;  %v1594_v30 = vpop.permute.xlu0 %1593  ;;  %vm976_vm4 = vmand %vm972_vm2, %vm974_vm3  ;;  %vm1278_vm6 = vcmp.le.f32.partialorder %v5569_v45, 16.0  ;;  %vm1279_vm8 = vcmp.le.f32.partialorder %v5565_v15, 16.0 }
 0x50f   : > { %v2468_v37 = vadd.f32 %v2463_v8, %v2446_v23  ;;  %vm1581_vm9 = vcmp.ge.f32.partialorder %v5565_v15, 0.0  ;;  %v5572_v40 = vsel %vm4261_vm13, %v5571_v33, 0.0  ;;  %vm1583_vm10 = vcmp.le.f32.partialorder %v5565_v15, 15.0  ;;  %vm1280_vm12 = vmand %vm1276_vm5, %vm1278_vm6  ;;  %p2893_p3 = pnand %p2892_p0, %p2886_p10 }
 0x510   : > { %v2491_v59 = vadd.f32 %v2483_v43, %v2469_v58  ;;  %v690_v25 = vadd.f32 %v5572_v40, %v422_v56  ;;  %vm1291_vm14 = vcmask 1031168   ;;  %vm1582_vm2 = vcmp.le.f32.partialorder %v5569_v45, 15.0  ;;  %vm5097_vm3 = vmand %vm1581_vm9, %vm1583_vm10 }
 0x511   : > { %v2481_v39 = vpop.permute.xlu1 %2480  ;;  %vm1885_vm5 = vcmp.ge.f32.partialorder %v5565_v15, -1.0  ;;  %vm1887_vm6 = vcmp.le.f32.partialorder %v5565_v15, 14.0  ;;  %vm2203_vm9 = vcmask 1006592  }
 0x512   : > { %v2484_v9 = vsel %vm655_vm7, %v5563_v38, %v2481_v39  ;;  %1895 = vrot.lane.b32.xlu0 %v1882_v13, %s2966_s12  ;;  %v2485_v20 = vsel %vm655_vm7, %v2481_v39, %v2483_v43  ;;  %vm1277_vm7 = vcmp.ge.f32.partialorder %v5565_v15, 1.0 }
 0x513   : > { %v2489_v17 = vadd.f32 %v2484_v9, %v2467_v31  ;;  %v2490_v22 = vadd.f32 %v2485_v20, %v2468_v37  ;;  %vm1281_vm15 = vmand %vm1277_vm7, %vm1279_vm8  ;;  %vm2189_vm7 = vcmp.ge.f32.partialorder %v5565_v15, -2.0  ;;  %vm2191_vm8 = vcmp.le.f32.partialorder %v5565_v15, 13.0 }
 0x515   : > { %2501 = vrot.lane.b32.xlu1 %v2489_v17, %s2968_s30  ;;  %v1290_v48 = vpop.permute.xlu1 %1289 }
 0x516   : > { %2197 = vrot.lane.b32.xlu0 %v2185_v18, %s2967_s13 }
 0x519   : > { %2505 = vrot.lane.b32.xlu1 %v2491_v59, %s2968_s30 }
 0x51a   : > { %2503 = vrot.lane.b32.xlu0 %v2490_v22, %s2968_s30 }
 0x564   : > { %v5073_v55 = vpop.permute.xlu1 %1897 }
 0x568   : > { %v984_v54 = vpop.permute.xlu1 %983 }
 0x569   : > { %v989_v41 = vsel %vm987_vm0, %v984_v54, %v986_v26 }
 0x56a   : > { %v993_v42 = vsel %vm977_vm1, %v989_v41, 0.0  ;;  %vm1580_vm1 = vcmp.ge.f32.partialorder %v5569_v45, 0.0 }
 0x56b   : > { %v995_v63 = vadd.f32 %v993_v42, %v691_v53  ;;  %vm5102_vm13 = vmand %vm1580_vm1, %vm1582_vm2  ;;  %vm2190_vm1 = vcmp.le.f32.partialorder %v5569_v45, 13.0 }
 0x56c   : > { %v1286_v3 = vpop.permute.xlu1 %1285  ;;  %vm5119_vm2 = vmand %vm2189_vm7, %vm2191_vm8 }
 0x570   : > { %v1592_v11 = vpop.permute.xlu1 %1591 }
 0x571   : > { %v1597_v24 = vsel %vm1595_vm11, %v1592_v11, %v1594_v30 }
 0x572   : > { %v1601_v21 = vsel %vm5097_vm3, %v1597_v24, 0.0  ;;  %vm2492_vm3 = vcmp.ge.f32.partialorder %v5569_v45, -3.0 }
 0x574   : > { %v2202_v60 = vpop.permute.xlu0 %2201 }
 0x575   : > { %v1894_v2 = vpop.permute.xlu1 %1893 }
 0x578   : > { %v982_v1 = vpop.permute.xlu0 %981 }
 0x579   : > { %v988_v5 = vsel %vm987_vm0, %v982_v1, %v984_v54  ;;  %vm1884_vm0 = vcmp.ge.f32.partialorder %v5569_v45, -1.0 }
 0x57a   : > { %v992_v46 = vsel %vm976_vm4, %v988_v5, 0.0  ;;  %vm1886_vm4 = vcmp.le.f32.partialorder %v5569_v45, 14.0 }
 0x57b   : > { %v994_v27 = vadd.f32 %v992_v46, %v690_v25  ;;  %vm1888_vm10 = vmand %vm1884_vm0, %vm1886_vm4  ;;  %vm2493_vm0 = vcmp.ge.f32.partialorder %v5565_v15, -3.0  ;;  %vm2495_vm4 = vcmp.le.f32.partialorder %v5565_v15, 12.0 }
 0x57c   : > { %v1288_v19 = vpop.permute.xlu0 %1287  ;;  %vm2497_vm7 = vmand %vm2493_vm0, %vm2495_vm4 }
 0x57d   : > { %v1292_v62 = vsel %vm1291_vm14, %v1286_v3, %v1288_v19  ;;  %v1293_v16 = vsel %vm1291_vm14, %v1288_v19, %v1290_v48  ;;  %v2200_v7 = vpop.permute.xlu1 %2199  ;;  %vm1889_vm14 = vmand %vm1885_vm5, %vm1887_vm6  ;;  %vm2507_vm6 = vcmask 998400  }
 0x57e   : > { %v1296_v28 = vsel %vm1280_vm12, %v1292_v62, 0.0  ;;  %v1297_v52 = vsel %vm1281_vm15, %v1293_v16, 0.0  ;;  %vm1899_vm12 = vcmask 1014784   ;;  %vm2188_vm15 = vcmp.ge.f32.partialorder %v5569_v45, -2.0 }
 0x57f   : > { %v1298_v14 = vadd.f32 %v1296_v28, %v994_v27  ;;  %v1299_v36 = vadd.f32 %v1297_v52, %v995_v63  ;;  %v2205_v51 = vsel %vm2203_vm9, %v2200_v7, %v2202_v60  ;;  %v5579_v63 = vld [vmem:[#allocation12_spill] sm:$0xff]  ;;  %v5580_v60 = vld [vmem:[#allocation13_spill] sm:$0xff] }
 0x580   : > { %v1590_v35 = vpop.permute.xlu0 %1589  ;;  %v2209_v8 = vsel %vm5119_vm2, %v2205_v51, 0.0 }
 0x581   : > { %v1596_v0 = vsel %vm1595_vm11, %v1590_v35, %v1592_v11  ;;  %v1603_v10 = vadd.f32 %v1601_v21, %v1299_v36  ;;  %vm2192_vm11 = vmand %vm2188_vm15, %vm2190_vm1  ;;  %v5581_v11 = vld [vmem:[#allocation14_spill] sm:$0xff] }
 0x582   : > { %v1600_v13 = vsel %vm5102_vm13, %v1596_v0, 0.0  ;;  %vm2494_vm13 = vcmp.le.f32.partialorder %v5569_v45, 12.0 }
 0x583   : > { %v1602_v32 = vadd.f32 %v1600_v13, %v1298_v14  ;;  %vm2496_vm5 = vmand %vm2492_vm3, %vm2494_vm13 }
 0x584   : > { %v1896_v4 = vpop.permute.xlu0 %1895 }
 0x585   : > { %v1900_v44 = vsel %vm1899_vm12, %v1894_v2, %v1896_v4  ;;  %v1901_v39 = vsel %vm1899_vm12, %v1896_v4, %v5073_v55 }
 0x586   : > { %v1904_v50 = vsel %vm1888_vm10, %v1900_v44, 0.0  ;;  %v1905_v38 = vsel %vm1889_vm14, %v1901_v39, 0.0 }
 0x587   : > { %v1906_v9 = vadd.f32 %v1904_v50, %v1602_v32  ;;  %v1907_v12 = vadd.f32 %v1905_v38, %v1603_v10  ;;  %v2502_v6 = vpop.permute.xlu1 %2501 }
 0x588   : > { %v2198_v58 = vpop.permute.xlu0 %2197 }
 0x589   : > { %v2204_v17 = vsel %vm2203_vm9, %v2198_v58, %v2200_v7  ;;  %v2211_v43 = vadd.f32 %v2209_v8, %v1907_v12 }
 0x58a   : > { %v2208_v18 = vsel %vm2192_vm11, %v2204_v17, 0.0 }
 0x58b   : > { %v2210_v23 = vadd.f32 %v2208_v18, %v1906_v9  ;;  %v2506_v20 = vpop.permute.xlu1 %2505 }
 0x58c   : > { %v2504_v37 = vpop.permute.xlu0 %2503 }
 0x58d   : > { %v2508_v59 = vsel %vm2507_vm6, %v2502_v6, %v2504_v37  ;;  %v2509_v22 = vsel %vm2507_vm6, %v2504_v37, %v2506_v20 }
 0x58e   : > { %v2512_v48 = vsel %vm2496_vm5, %v2508_v59, 0.0  ;;  %v2513_v55 = vsel %vm2497_vm7, %v2509_v22, 0.0 }
 0x58f   : > { %v2514_v56 = vadd.f32 %v2512_v48, %v2210_v23  ;;  %v2515_v26 = vadd.f32 %v2513_v55, %v2211_v43 }
 0x591   : > { %v2746_v54 = vmul.f32 -1.442695, %v2514_v56  ;;  %v2747_v15 = vmul.f32 -1.442695, %v2515_v26 }
 0x593   : > { %2832 = vpow2.f32 %v2746_v54 }
 0x594   : > { %2834 = vpow2.f32 %v2747_v15 }
 0x5a0   : > { %v2833_v49 = vpop.eup %2832 }
 0x5a1   : > { %v2835_v29 = vpop.eup %2834  ;;  %v2522_v34 = vadd.f32 1.0, %v2833_v49 }
 0x5a2   : > { %v2523_v53 = vadd.f32 1.0, %v2835_v29 }
 0x5a3   : > { %2836 = vrcp.f32 %v2522_v34 }
 0x5a4   : > { %2838 = vrcp.f32 %v2523_v53 }
 0x5b0   : > { %v2837_v41 = vpop.eup %2836 }
 0x5b1   : > { %v2839_v42 = vpop.eup %2838  ;;  %v2531_v30 = vrot.slane %v2837_v41, %v5579_v63 }
 0x5b2   : > { %v2535_v3 = vrot.slane %v2839_v42, %v5579_v63 }
 0x5b3   : > { %v2536_v45 = vmul.f32 %v2531_v30, %v5580_v60 }
 0x5b4   : > { %v2537_v1 = vmul.f32 %v2535_v3, %v5581_v11 }
 0x5b5   : > { %2538 = vst [vmem:[%s309_s16] sm:$0xff] %v2536_v45 }
 0x5b6   : > { %2539 = vst [vmem:[%s309_s16 + $0x8] sm:$0xff] %v2537_v1 }
 0x5b7   : > { %2896 = shalt.err (!%p2893_p3)
}
 0x5b8   : > { %s2897_s17 = scalar_lea.hbm %s5142_s24, 256  ;;  %s2901_s13 = scalar_lea.hbm %s5186_s7, 512 }
 0x5b9   : > { %p2898_p12 = scmp.ne.s32.totalorder %s5142_s24, %s2897_s17  ;;  %p2902_p4 = scmp.lt.s32.totalorder %s5142_s24, %s5186_s7 }
 0x5ba   : > { %p2903_p6 = scmp.lt.s32.totalorder %s2901_s13, %s2897_s17 }
 0x5bb   : > { %p2899_p5 = pnand %p2898_p12, %p5582_p11 }
 0x5bc   : > { %p2904_p8 = por %p2903_p6, %p2902_p4 }
 0x5bd   : > { %p2900_p7 = pneg %p2899_p5 }
 0x5bf   : > { %p2905_p9 = pnand %p2904_p8, %p2900_p7 }
 0x5c1   : > { %2908 = shalt.err (!%p2905_p9)
}
 0x5c2   : > { %2761 = dma.vmem_to_hbm [thread:$0]  (%p5582_p11), %s2556_s25, 256, %s5142_s24, %s2541_s5  }
 0x5c3 PF: > { %s2567_s10 = sand.u32 1, %s2939_s26   ;;  %p5583_p13 = scmp.ne.s32.totalorder %s5283_s9, 0 }
 0x5c4   : > { %p5584_p10 = scmp.ge.s32.totalorder %s2951_s29, 2  ;;  %s2568_s16 = scalar_lea.sflag [#allocation5], %s2567_s10 }
 0x5c6   : > { %p2772_p2 = pnand %p5584_p10, %p5583_p13 }
 0x5c8   : > { %p2773_p1 = pneg %p2772_p2 }
 0x5ca   : > { %2934 = dma.done.wait (%p2773_p1), %s2568_s16, 256  }
 0x5cb   : > { %2936 = vsyncadd (%p2773_p1), %s2568_s16, 4294967040  ;;  %p22_p0 = scmp.ge.s32.totalorder %s3064_s14, 4   ;;  %s5585_s26 = smov %s2943_s27 }
 0x5cc   : > { %s5586_s27 = smov %s2947_s28  ;;  %s5587_s28 = smov %s3088_s21 }
 0x5cd   : > { %s5588_s29 = smov %s3064_s14  ;;  %24 = sbr.rel (!%p22_p0) target bundleno = 9 (0x9), region = 98 }
 0x5d2   :  { %2573 = vsyncpa [#allocation4], 1 }
 0x5d3   :  { %2575 = vsyncpa [#allocation4 + $0x1], 1 }
 0x5d4   :  { %2576 = vsyncpa [#allocation5], 1 }
 0x5d5   :  { %2578 = vsyncpa [#allocation5 + $0x1], 1 }
 0x5d6   :  { %2579 = vsyncpa [#allocation6], 1 }
 0x5d7   :  { %2581 = vsyncpa [#allocation6 + $0x1], 1 }

</bundles_post_ra>
